<compile_context>
chip_gen: v7x
topology: tpu7x:2x2x1
jax: 0.10.0
libtpu: 0.0.40
codegen_flags: <defaults>
</compile_context>

<pallas_src>
from functools import partial

import numpy as np
import jax
import jax.numpy as jnp
from jax.experimental import pallas as pl
from jax.experimental.pallas import tpu as pltpu


# ----------------------------------------------------------------------------
# Fused 3x3 conv (single wide-K matmul per Cin step) + BN scale/bias + ReLU
# ----------------------------------------------------------------------------
def _conv3x3_bn_kernel(x_ref, w_ref, sb_ref, o_ref, col_ref, *acc_scratch,
                       H, W, TCi, n_ci, relu):
    """One (batch, Cout-tile) output block; grid axis 2 reduces over Cin tiles.

    x_ref  : (1, H, W, TCi)   bf16  unpadded NHWC activation block
    w_ref  : (1, 9*TCi, TCo)  bf16  weights, K ordered (dy, dx, cin)
    sb_ref : (2, TCo)         f32   row 0 = folded BN scale, row 1 = bias
    o_ref  : (1, H*W, TCo)    bf16  output slab
    col_ref: (H, W, 9*TCi)    bf16  im2col slab (VMEM scratch)
    acc    : (H*W, TCo)       f32   accumulator scratch (only when n_ci > 1)
    """
    acc_ref = acc_scratch[0] if acc_scratch else None
    ci = pl.program_id(2)
    last = n_ci - 1

    # --- one-time halo zeroing: the slab's border strips never change across
    #     Cin steps, so write them only at ci == 0.
    @pl.when(ci == 0)
    def _zero_halo():
        for dy in range(3):
            for dx in range(3):
                c0 = (dy * 3 + dx) * TCi
                if dy == 0:
                    col_ref[0:1, :, c0:c0 + TCi] = jnp.zeros((1, W, TCi), jnp.bfloat16)
                if dy == 2:
                    col_ref[H - 1:H, :, c0:c0 + TCi] = jnp.zeros((1, W, TCi), jnp.bfloat16)
                if dx == 0:
                    col_ref[:, 0:1, c0:c0 + TCi] = jnp.zeros((H, 1, TCi), jnp.bfloat16)
                if dx == 2:
                    col_ref[:, W - 1:W, c0:c0 + TCi] = jnp.zeros((H, 1, TCi), jnp.bfloat16)

    # --- assemble the im2col slab for this Cin tile: 9 shifted valid rects
    #     (padding expressed by the untouched zero strips above).
    for dy in range(3):
        oh0, oh1 = max(0, 1 - dy), min(H, H + 1 - dy)
        ih0, nh = oh0 + dy - 1, min(H, H + 1 - dy) - max(0, 1 - dy)
        for dx in range(3):
            ow0, ow1 = max(0, 1 - dx), min(W, W + 1 - dx)
            iw0, nw = ow0 + dx - 1, ow1 - ow0
            c0 = (dy * 3 + dx) * TCi
            col_ref[oh0:oh1, ow0:ow1, c0:c0 + TCi] = \
                x_ref[0, ih0:ih0 + nh, iw0:iw0 + nw, :]

    # --- single wide-K MXU push for this Cin step.
    col = col_ref[...].reshape(H * W, 9 * TCi)
    part = jnp.dot(col, w_ref[0], preferred_element_type=jnp.float32)

    # --- at most one accumulator write per step (none at all when n_ci == 1;
    #     the last step folds its partial sum directly into the epilogue).
    if n_ci > 1:
        @pl.when(ci == 0)
        def _init():
            acc_ref[...] = part

        @pl.when(jnp.logical_and(ci > 0, ci < last))
        def _accum():
            acc_ref[...] += part

    # --- folded-BN + ReLU epilogue, bf16 store, last Cin step only.
    @pl.when(ci == last)
    def _epilogue():
        total = part if acc_ref is None else acc_ref[...] + part
        y = total * sb_ref[0:1, :] + sb_ref[1:2, :]
        if relu:
            y = jnp.maximum(y, 0.0)
        o_ref[0] = y.astype(o_ref.dtype)


def _channel_tile(c):
    """Full dim when it avoids channel tiling (<=512, avoids re-fetching the
    activation block per Cout tile), else a lane-friendly 128-multiple."""
    if c <= 512:
        return c
    for t in (256, 128):
        if c % t == 0:
            return t
    return c        # odd channel counts: full dim (correct, VMEM-heavy)


def _vmem_limit_bytes():
    """~112 MiB on 128-MiB-VMEM parts (v5e/v6e), 48 MiB otherwise (v7x-safe)."""
    limit = 48 * 1024 * 1024
    try:
        cap = int(pltpu.get_tpu_info().vmem_capacity_bytes)
        if cap >= 96 * 1024 * 1024:
            limit = 112 * 1024 * 1024
    except Exception:
        pass
    return limit


def conv3x3_bn_relu(x, w, scale, bias, *, relu=True):
    """y = relu(conv3x3(x, w, pad=1) * scale + bias); NHWC in, bf16 NHWC out.

    x: (N, H, W, Cin), w: (3, 3, Cin, Cout), scale/bias: (Cout,)."""
    N, H, W, Cin = x.shape
    Cout = w.shape[-1]
    TCi, TCo = _channel_tile(Cin), _channel_tile(Cout)
    n_ci, n_co = Cin // TCi, Cout // TCo

    xb = x.astype(jnp.bfloat16)
    # Weights -> (n_ci, 9*TCi, Cout) with K ordered (dy, dx, cin) to match the
    # im2col slab's column order.
    wk = (w.reshape(3, 3, n_ci, TCi, Cout)
           .transpose(2, 0, 1, 3, 4)
           .reshape(n_ci, 9 * TCi, Cout)
           .astype(jnp.bfloat16))
    sb = jnp.stack([scale, bias]).astype(jnp.float32)            # (2, Cout)

    # Deeper weight-stream buffering only when the Cin reduction is long
    # (hides DMA latency on v5e's lower HBM bandwidth; no-op for small layers).
    w_kwargs = {"pipeline_mode": pl.Buffered(3)} if n_ci >= 3 else {}
    w_spec = pl.BlockSpec((1, 9 * TCi, TCo),
                          lambda n, co, ci: (ci, 0, co), **w_kwargs)

    scratch = [pltpu.VMEM((H, W, 9 * TCi), jnp.bfloat16)]        # im2col slab
    if n_ci > 1:
        scratch.append(pltpu.VMEM((H * W, TCo), jnp.float32))    # Cin accumulator

    out = pl.pallas_call(
        partial(_conv3x3_bn_kernel, H=H, W=W, TCi=TCi, n_ci=n_ci, relu=relu),
        out_shape=jax.ShapeDtypeStruct((N, H * W, Cout), jnp.bfloat16),
        grid=(N, n_co, n_ci),
        in_specs=[
            pl.BlockSpec((1, H, W, TCi), lambda n, co, ci: (n, 0, 0, ci)),
            w_spec,
            pl.BlockSpec((2, TCo), lambda n, co, ci: (0, co)),
        ],
        out_specs=pl.BlockSpec((1, H * W, TCo), lambda n, co, ci: (n, 0, co)),
        scratch_shapes=scratch,
        compiler_params=pltpu.CompilerParams(
            dimension_semantics=("parallel", "parallel", "arbitrary"),
            vmem_limit_bytes=_vmem_limit_bytes()),
    )(xb, wk, sb)
    return out.reshape(N, H, W, Cout)        # row-major bitcast, free


# ----------------------------------------------------------------------------
# conv_block.forward : (Conv3x3 -> BN -> ReLU) x 2, NCHW in / NCHW out
# ----------------------------------------------------------------------------
def conv_block_forward(x_nchw, p):
    x = jnp.transpose(x_nchw, (0, 2, 3, 1)).astype(jnp.bfloat16)   # NCHW->NHWC
    x = conv3x3_bn_relu(x, p['w1'], p['s1'], p['b1'], relu=True)   # bf16 out
    x = conv3x3_bn_relu(x, p['w2'], p['s2'], p['b2'], relu=True)   # bf16 out
    return jnp.transpose(x, (0, 3, 1, 2)).astype(jnp.float32)      # NHWC->NCHW


# ----------------------------------------------------------------------------
# Deterministic synthetic parameters (inference-mode BN fold)
# ----------------------------------------------------------------------------
def init_params(key, ch_in, ch_out):
    ks = jax.random.split(key, 4)

    def conv_w(k, cin, cout):
        std = float(np.sqrt(2.0 / (cin * 9)))
        return jax.random.normal(k, (3, 3, cin, cout), jnp.float32) * std

    def bn(k, c):
        k1, k2, k3, k4 = jax.random.split(k, 4)
        gamma = 1.0 + 0.1 * jax.random.normal(k1, (c,), jnp.float32)
        beta = 0.1 * jax.random.normal(k2, (c,), jnp.float32)
        mean = 0.1 * jax.random.normal(k3, (c,), jnp.float32)
        var = 1.0 + 0.1 * jax.random.uniform(k4, (c,), jnp.float32)
        scale = gamma / jnp.sqrt(var + 1e-5)
        bias = beta - mean * scale
        return scale, bias

    s1, b1 = bn(ks[1], ch_out)
    s2, b2 = bn(ks[3], ch_out)
    return dict(w1=conv_w(ks[0], ch_in, ch_out), s1=s1, b1=b1,
                w2=conv_w(ks[2], ch_out, ch_out), s2=s2, b2=b2)


# ----------------------------------------------------------------------------
# Plain-JAX reference (bf16 rounding at the same points as the kernel)
# ----------------------------------------------------------------------------
def _reference(x_nchw, p):
    x = jnp.transpose(x_nchw, (0, 2, 3, 1)).astype(jnp.float32)

    def layer(x, w, s, b):
        xb = x.astype(jnp.bfloat16).astype(jnp.float32)
        wb = w.astype(jnp.bfloat16).astype(jnp.float32)
        y = jax.lax.conv_general_dilated(
            xb, wb, window_strides=(1, 1), padding='SAME',
            dimension_numbers=('NHWC', 'HWIO', 'NHWC'),
            preferred_element_type=jnp.float32)
        y = jnp.maximum(y * s + b, 0.0)
        return y.astype(jnp.bfloat16).astype(jnp.float32)

    x = layer(x, p['w1'], p['s1'], p['b1'])
    x = layer(x, p['w2'], p['s2'], p['b2'])
    return jnp.transpose(x, (0, 3, 1, 2))


# ----------------------------------------------------------------------------
if __name__ == "__main__":
    key = jax.random.PRNGKey(0)
    pkey, xkey = jax.random.split(key)

    N, C_IN, C_OUT, H, W = 2, 4, 32, 16, 16
    params = init_params(pkey, C_IN, C_OUT)
    x = jax.random.normal(xkey, (N, C_IN, H, W), jnp.float32)

    out = jax.jit(conv_block_forward)(x, params)
    out = jax.block_until_ready(out)

    assert out.shape == (N, C_OUT, H, W), out.shape
    assert bool(jnp.all(jnp.isfinite(out)))

    ref = jax.block_until_ready(jax.jit(_reference)(x, params))
    err = float(jnp.max(jnp.abs(out - ref) / (1.0 + jnp.abs(ref))))
    assert err < 3e-2, f"max rel diff vs reference = {err}"

    print("KERNEL_OK")
</pallas_src>

<mosaic_0001>
module attributes {stable_mosaic.version = 11 : i64} {
  func.func @_conv3x3_bn_kernel(%arg0: i32, %arg1: i32, %arg2: i32, %arg3: memref<1x16x16x4xbf16, #tpu.memory_space<vmem>>, %arg4: memref<1x36x32xbf16, #tpu.memory_space<vmem>>, %arg5: memref<2x32xf32, #tpu.memory_space<vmem>>, %arg6: memref<1x256x32xbf16, #tpu.memory_space<vmem>>, %arg7: memref<16x16x36xbf16, #tpu.memory_space<vmem>>) attributes {dimension_semantics = [#tpu.dimension_semantics<parallel>, #tpu.dimension_semantics<parallel>, #tpu.dimension_semantics<arbitrary>], iteration_bounds = array<i64: 2, 1, 1>, scalar_prefetch = 0 : i64, scratch_operands = 1 : i64, tpu.core_type = #tpu.core_type<tc>, window_params = [{transform_indices = @transform_0, window_bounds = array<i64: 1, 16, 16, 4>}, {transform_indices = @transform_1, window_bounds = array<i64: 1, 36, 32>}, {transform_indices = @transform_2, window_bounds = array<i64: 2, 32>}, {transform_indices = @transform_3, window_bounds = array<i64: 1, 256, 32>}]} {
    %c0_i32 = arith.constant 0 : i32
    %0 = arith.cmpi eq, %arg2, %c0_i32 : i32
    %1 = arith.extui %0 : i1 to i32
    %c0_i32_0 = arith.constant 0 : i32
    %2 = arith.cmpi ne, %1, %c0_i32_0 : i32
    scf.if %2 {
      %cst_62 = arith.constant 0.000000e+00 : bf16
      %38 = vector.broadcast %cst_62 : bf16 to vector<1x16x4xbf16>
      %c0_63 = arith.constant 0 : index
      %c0_64 = arith.constant 0 : index
      %c0_65 = arith.constant 0 : index
      %39 = vector.load %arg7[%c0_63, %c0_64, %c0_65] : memref<16x16x36xbf16, #tpu.memory_space<vmem>>, vector<1x16x4xbf16>
      tpu.vector_store %arg7[%c0_63, %c0_64, %c0_65], %38 {strides = array<i32>} : memref<16x16x36xbf16, #tpu.memory_space<vmem>>, vector<1x16x4xbf16>,
      %cst_66 = arith.constant 0.000000e+00 : bf16
      %40 = vector.broadcast %cst_66 : bf16 to vector<16x1x4xbf16>
      %c0_67 = arith.constant 0 : index
      %c0_68 = arith.constant 0 : index
      %c0_69 = arith.constant 0 : index
      %41 = vector.load %arg7[%c0_67, %c0_68, %c0_69] : memref<16x16x36xbf16, #tpu.memory_space<vmem>>, vector<16x1x4xbf16>
      tpu.vector_store %arg7[%c0_67, %c0_68, %c0_69], %40 {strides = array<i32>} : memref<16x16x36xbf16, #tpu.memory_space<vmem>>, vector<16x1x4xbf16>,
      %cst_70 = arith.constant 0.000000e+00 : bf16
      %42 = vector.broadcast %cst_70 : bf16 to vector<1x16x4xbf16>
      %c0_71 = arith.constant 0 : index
      %c0_72 = arith.constant 0 : index
      %c4_73 = arith.constant 4 : index
      %43 = vector.load %arg7[%c0_71, %c0_72, %c4_73] : memref<16x16x36xbf16, #tpu.memory_space<vmem>>, vector<1x16x4xbf16>
      tpu.vector_store %arg7[%c0_71, %c0_72, %c4_73], %42 {strides = array<i32>} : memref<16x16x36xbf16, #tpu.memory_space<vmem>>, vector<1x16x4xbf16>,
      %cst_74 = arith.constant 0.000000e+00 : bf16
      %44 = vector.broadcast %cst_74 : bf16 to vector<1x16x4xbf16>
      %c0_75 = arith.constant 0 : index
      %c0_76 = arith.constant 0 : index
      %c8_77 = arith.constant 8 : index
      %45 = vector.load %arg7[%c0_75, %c0_76, %c8_77] : memref<16x16x36xbf16, #tpu.memory_space<vmem>>, vector<1x16x4xbf16>
      tpu.vector_store %arg7[%c0_75, %c0_76, %c8_77], %44 {strides = array<i32>} : memref<16x16x36xbf16, #tpu.memory_space<vmem>>, vector<1x16x4xbf16>,
      %cst_78 = arith.constant 0.000000e+00 : bf16
      %46 = vector.broadcast %cst_78 : bf16 to vector<16x1x4xbf16>
      %c0_79 = arith.constant 0 : index
      %c15 = arith.constant 15 : index
      %c8_80 = arith.constant 8 : index
      %47 = vector.load %arg7[%c0_79, %c15, %c8_80] : memref<16x16x36xbf16, #tpu.memory_space<vmem>>, vector<16x1x4xbf16>
      tpu.vector_store %arg7[%c0_79, %c15, %c8_80], %46 {strides = array<i32>} : memref<16x16x36xbf16, #tpu.memory_space<vmem>>, vector<16x1x4xbf16>,
      %cst_81 = arith.constant 0.000000e+00 : bf16
      %48 = vector.broadcast %cst_81 : bf16 to vector<16x1x4xbf16>
      %c0_82 = arith.constant 0 : index
      %c0_83 = arith.constant 0 : index
      %c12_84 = arith.constant 12 : index
      %49 = vector.load %arg7[%c0_82, %c0_83, %c12_84] : memref<16x16x36xbf16, #tpu.memory_space<vmem>>, vector<16x1x4xbf16>
      tpu.vector_store %arg7[%c0_82, %c0_83, %c12_84], %48 {strides = array<i32>} : memref<16x16x36xbf16, #tpu.memory_space<vmem>>, vector<16x1x4xbf16>,
      %cst_85 = arith.constant 0.000000e+00 : bf16
      %50 = vector.broadcast %cst_85 : bf16 to vector<16x1x4xbf16>
      %c0_86 = arith.constant 0 : index
      %c15_87 = arith.constant 15 : index
      %c20_88 = arith.constant 20 : index
      %51 = vector.load %arg7[%c0_86, %c15_87, %c20_88] : memref<16x16x36xbf16, #tpu.memory_space<vmem>>, vector<16x1x4xbf16>
      tpu.vector_store %arg7[%c0_86, %c15_87, %c20_88], %50 {strides = array<i32>} : memref<16x16x36xbf16, #tpu.memory_space<vmem>>, vector<16x1x4xbf16>,
      %cst_89 = arith.constant 0.000000e+00 : bf16
      %52 = vector.broadcast %cst_89 : bf16 to vector<1x16x4xbf16>
      %c15_90 = arith.constant 15 : index
      %c0_91 = arith.constant 0 : index
      %c24_92 = arith.constant 24 : index
      %53 = vector.load %arg7[%c15_90, %c0_91, %c24_92] : memref<16x16x36xbf16, #tpu.memory_space<vmem>>, vector<1x16x4xbf16>
      tpu.vector_store %arg7[%c15_90, %c0_91, %c24_92], %52 {strides = array<i32>} : memref<16x16x36xbf16, #tpu.memory_space<vmem>>, vector<1x16x4xbf16>,
      %cst_93 = arith.constant 0.000000e+00 : bf16
      %54 = vector.broadcast %cst_93 : bf16 to vector<16x1x4xbf16>
      %c0_94 = arith.constant 0 : index
      %c0_95 = arith.constant 0 : index
      %c24_96 = arith.constant 24 : index
      %55 = vector.load %arg7[%c0_94, %c0_95, %c24_96] : memref<16x16x36xbf16, #tpu.memory_space<vmem>>, vector<16x1x4xbf16>
      tpu.vector_store %arg7[%c0_94, %c0_95, %c24_96], %54 {strides = array<i32>} : memref<16x16x36xbf16, #tpu.memory_space<vmem>>, vector<16x1x4xbf16>,
      %cst_97 = arith.constant 0.000000e+00 : bf16
      %56 = vector.broadcast %cst_97 : bf16 to vector<1x16x4xbf16>
      %c15_98 = arith.constant 15 : index
      %c0_99 = arith.constant 0 : index
      %c28_100 = arith.constant 28 : index
      %57 = vector.load %arg7[%c15_98, %c0_99, %c28_100] : memref<16x16x36xbf16, #tpu.memory_space<vmem>>, vector<1x16x4xbf16>
      tpu.vector_store %arg7[%c15_98, %c0_99, %c28_100], %56 {strides = array<i32>} : memref<16x16x36xbf16, #tpu.memory_space<vmem>>, vector<1x16x4xbf16>,
      %cst_101 = arith.constant 0.000000e+00 : bf16
      %58 = vector.broadcast %cst_101 : bf16 to vector<1x16x4xbf16>
      %c15_102 = arith.constant 15 : index
      %c0_103 = arith.constant 0 : index
      %c32_104 = arith.constant 32 : index
      %59 = vector.load %arg7[%c15_102, %c0_103, %c32_104] : memref<16x16x36xbf16, #tpu.memory_space<vmem>>, vector<1x16x4xbf16>
      tpu.vector_store %arg7[%c15_102, %c0_103, %c32_104], %58 {strides = array<i32>} : memref<16x16x36xbf16, #tpu.memory_space<vmem>>, vector<1x16x4xbf16>,
      %cst_105 = arith.constant 0.000000e+00 : bf16
      %60 = vector.broadcast %cst_105 : bf16 to vector<16x1x4xbf16>
      %c0_106 = arith.constant 0 : index
      %c15_107 = arith.constant 15 : index
      %c32_108 = arith.constant 32 : index
      %61 = vector.load %arg7[%c0_106, %c15_107, %c32_108] : memref<16x16x36xbf16, #tpu.memory_space<vmem>>, vector<16x1x4xbf16>
      tpu.vector_store %arg7[%c0_106, %c15_107, %c32_108], %60 {strides = array<i32>} : memref<16x16x36xbf16, #tpu.memory_space<vmem>>, vector<16x1x4xbf16>,
    } else {
    }
    %c0 = arith.constant 0 : index
    %c0_1 = arith.constant 0 : index
    %c0_2 = arith.constant 0 : index
    %c0_3 = arith.constant 0 : index
    %3 = vector.load %arg3[%c0, %c0_1, %c0_2, %c0_3] : memref<1x16x16x4xbf16, #tpu.memory_space<vmem>>, vector<1x15x15x4xbf16>
    %4 = vector.shape_cast %3 : vector<1x15x15x4xbf16> to vector<15x15x4xbf16>
    %c1 = arith.constant 1 : index
    %c1_4 = arith.constant 1 : index
    %c0_5 = arith.constant 0 : index
    %5 = vector.load %arg7[%c1, %c1_4, %c0_5] : memref<16x16x36xbf16, #tpu.memory_space<vmem>>, vector<15x15x4xbf16>
    tpu.vector_store %arg7[%c1, %c1_4, %c0_5], %4 {strides = array<i32>} : memref<16x16x36xbf16, #tpu.memory_space<vmem>>, vector<15x15x4xbf16>,
    %c0_6 = arith.constant 0 : index
    %c0_7 = arith.constant 0 : index
    %c0_8 = arith.constant 0 : index
    %c0_9 = arith.constant 0 : index
    %6 = vector.load %arg3[%c0_6, %c0_7, %c0_8, %c0_9] : memref<1x16x16x4xbf16, #tpu.memory_space<vmem>>, vector<1x15x16x4xbf16>
    %7 = vector.shape_cast %6 : vector<1x15x16x4xbf16> to vector<15x16x4xbf16>
    %c1_10 = arith.constant 1 : index
    %c0_11 = arith.constant 0 : index
    %c4 = arith.constant 4 : index
    %8 = vector.load %arg7[%c1_10, %c0_11, %c4] : memref<16x16x36xbf16, #tpu.memory_space<vmem>>, vector<15x16x4xbf16>
    tpu.vector_store %arg7[%c1_10, %c0_11, %c4], %7 {strides = array<i32>} : memref<16x16x36xbf16, #tpu.memory_space<vmem>>, vector<15x16x4xbf16>,
    %c0_12 = arith.constant 0 : index
    %c0_13 = arith.constant 0 : index
    %c1_14 = arith.constant 1 : index
    %c0_15 = arith.constant 0 : index
    %9 = vector.load %arg3[%c0_12, %c0_13, %c1_14, %c0_15] : memref<1x16x16x4xbf16, #tpu.memory_space<vmem>>, vector<1x15x15x4xbf16>
    %10 = vector.shape_cast %9 : vector<1x15x15x4xbf16> to vector<15x15x4xbf16>
    %c1_16 = arith.constant 1 : index
    %c0_17 = arith.constant 0 : index
    %c8 = arith.constant 8 : index
    %11 = vector.load %arg7[%c1_16, %c0_17, %c8] : memref<16x16x36xbf16, #tpu.memory_space<vmem>>, vector<15x15x4xbf16>
    tpu.vector_store %arg7[%c1_16, %c0_17, %c8], %10 {strides = array<i32>} : memref<16x16x36xbf16, #tpu.memory_space<vmem>>, vector<15x15x4xbf16>,
    %c0_18 = arith.constant 0 : index
    %c0_19 = arith.constant 0 : index
    %c0_20 = arith.constant 0 : index
    %c0_21 = arith.constant 0 : index
    %12 = vector.load %arg3[%c0_18, %c0_19, %c0_20, %c0_21] : memref<1x16x16x4xbf16, #tpu.memory_space<vmem>>, vector<1x16x15x4xbf16>
    %13 = vector.shape_cast %12 : vector<1x16x15x4xbf16> to vector<16x15x4xbf16>
    %c0_22 = arith.constant 0 : index
    %c1_23 = arith.constant 1 : index
    %c12 = arith.constant 12 : index
    %14 = vector.load %arg7[%c0_22, %c1_23, %c12] : memref<16x16x36xbf16, #tpu.memory_space<vmem>>, vector<16x15x4xbf16>
    tpu.vector_store %arg7[%c0_22, %c1_23, %c12], %13 {strides = array<i32>} : memref<16x16x36xbf16, #tpu.memory_space<vmem>>, vector<16x15x4xbf16>,
    %c0_24 = arith.constant 0 : index
    %c0_25 = arith.constant 0 : index
    %c0_26 = arith.constant 0 : index
    %c0_27 = arith.constant 0 : index
    %15 = vector.load %arg3[%c0_24, %c0_25, %c0_26, %c0_27] : memref<1x16x16x4xbf16, #tpu.memory_space<vmem>>, vector<1x16x16x4xbf16>
    %16 = vector.shape_cast %15 : vector<1x16x16x4xbf16> to vector<16x16x4xbf16>
    %c0_28 = arith.constant 0 : index
    %c0_29 = arith.constant 0 : index
    %c16 = arith.constant 16 : index
    %17 = vector.load %arg7[%c0_28, %c0_29, %c16] : memref<16x16x36xbf16, #tpu.memory_space<vmem>>, vector<16x16x4xbf16>
    tpu.vector_store %arg7[%c0_28, %c0_29, %c16], %16 {strides = array<i32>} : memref<16x16x36xbf16, #tpu.memory_space<vmem>>, vector<16x16x4xbf16>,
    %c0_30 = arith.constant 0 : index
    %c0_31 = arith.constant 0 : index
    %c1_32 = arith.constant 1 : index
    %c0_33 = arith.constant 0 : index
    %18 = vector.load %arg3[%c0_30, %c0_31, %c1_32, %c0_33] : memref<1x16x16x4xbf16, #tpu.memory_space<vmem>>, vector<1x16x15x4xbf16>
    %19 = vector.shape_cast %18 : vector<1x16x15x4xbf16> to vector<16x15x4xbf16>
    %c0_34 = arith.constant 0 : index
    %c0_35 = arith.constant 0 : index
    %c20 = arith.constant 20 : index
    %20 = vector.load %arg7[%c0_34, %c0_35, %c20] : memref<16x16x36xbf16, #tpu.memory_space<vmem>>, vector<16x15x4xbf16>
    tpu.vector_store %arg7[%c0_34, %c0_35, %c20], %19 {strides = array<i32>} : memref<16x16x36xbf16, #tpu.memory_space<vmem>>, vector<16x15x4xbf16>,
    %c0_36 = arith.constant 0 : index
    %c1_37 = arith.constant 1 : index
    %c0_38 = arith.constant 0 : index
    %c0_39 = arith.constant 0 : index
    %21 = vector.load %arg3[%c0_36, %c1_37, %c0_38, %c0_39] : memref<1x16x16x4xbf16, #tpu.memory_space<vmem>>, vector<1x15x15x4xbf16>
    %22 = vector.shape_cast %21 : vector<1x15x15x4xbf16> to vector<15x15x4xbf16>
    %c0_40 = arith.constant 0 : index
    %c1_41 = arith.constant 1 : index
    %c24 = arith.constant 24 : index
    %23 = vector.load %arg7[%c0_40, %c1_41, %c24] : memref<16x16x36xbf16, #tpu.memory_space<vmem>>, vector<15x15x4xbf16>
    tpu.vector_store %arg7[%c0_40, %c1_41, %c24], %22 {strides = array<i32>} : memref<16x16x36xbf16, #tpu.memory_space<vmem>>, vector<15x15x4xbf16>,
    %c0_42 = arith.constant 0 : index
    %c1_43 = arith.constant 1 : index
    %c0_44 = arith.constant 0 : index
    %c0_45 = arith.constant 0 : index
    %24 = vector.load %arg3[%c0_42, %c1_43, %c0_44, %c0_45] : memref<1x16x16x4xbf16, #tpu.memory_space<vmem>>, vector<1x15x16x4xbf16>
    %25 = vector.shape_cast %24 : vector<1x15x16x4xbf16> to vector<15x16x4xbf16>
    %c0_46 = arith.constant 0 : index
    %c0_47 = arith.constant 0 : index
    %c28 = arith.constant 28 : index
    %26 = vector.load %arg7[%c0_46, %c0_47, %c28] : memref<16x16x36xbf16, #tpu.memory_space<vmem>>, vector<15x16x4xbf16>
    tpu.vector_store %arg7[%c0_46, %c0_47, %c28], %25 {strides = array<i32>} : memref<16x16x36xbf16, #tpu.memory_space<vmem>>, vector<15x16x4xbf16>,
    %c0_48 = arith.constant 0 : index
    %c1_49 = arith.constant 1 : index
    %c1_50 = arith.constant 1 : index
    %c0_51 = arith.constant 0 : index
    %27 = vector.load %arg3[%c0_48, %c1_49, %c1_50, %c0_51] : memref<1x16x16x4xbf16, #tpu.memory_space<vmem>>, vector<1x15x15x4xbf16>
    %28 = vector.shape_cast %27 : vector<1x15x15x4xbf16> to vector<15x15x4xbf16>
    %c0_52 = arith.constant 0 : index
    %c0_53 = arith.constant 0 : index
    %c32 = arith.constant 32 : index
    %29 = vector.load %arg7[%c0_52, %c0_53, %c32] : memref<16x16x36xbf16, #tpu.memory_space<vmem>>, vector<15x15x4xbf16>
    tpu.vector_store %arg7[%c0_52, %c0_53, %c32], %28 {strides = array<i32>} : memref<16x16x36xbf16, #tpu.memory_space<vmem>>, vector<15x15x4xbf16>,
    %c0_54 = arith.constant 0 : index
    %c0_55 = arith.constant 0 : index
    %c0_56 = arith.constant 0 : index
    %30 = vector.load %arg7[%c0_54, %c0_55, %c0_56] : memref<16x16x36xbf16, #tpu.memory_space<vmem>>, vector<16x16x36xbf16>
    %31 = vector.shape_cast %30 : vector<16x16x36xbf16> to vector<256x36xbf16>
    %c0_57 = arith.constant 0 : index
    %c0_58 = arith.constant 0 : index
    %c0_59 = arith.constant 0 : index
    %32 = vector.load %arg4[%c0_57, %c0_58, %c0_59] : memref<1x36x32xbf16, #tpu.memory_space<vmem>>, vector<1x36x32xbf16>
    %33 = vector.shape_cast %32 : vector<1x36x32xbf16> to vector<36x32xbf16>
    %cst = arith.constant dense<0.000000e+00> : vector<256x32xf32>
    %34 = tpu.matmul %31, %33, %cst {dimension_numbers = #tpu.dot_dimension_numbers<[1], [0], [0], [1], [0, 0, 1, 1], [], []>} : vector<256x36xbf16>, vector<36x32xbf16>, vector<256x32xf32> -> vector<256x32xf32>
    %c0_i32_60 = arith.constant 0 : i32
    %35 = arith.cmpi eq, %arg2, %c0_i32_60 : i32
    %36 = arith.extui %35 : i1 to i32
    %c0_i32_61 = arith.constant 0 : i32
    %37 = arith.cmpi ne, %36, %c0_i32_61 : i32
    scf.if %37 {
      %c0_62 = arith.constant 0 : index
      %c0_63 = arith.constant 0 : index
      %38 = vector.load %arg5[%c0_62, %c0_63] : memref<2x32xf32, #tpu.memory_space<vmem>>, vector<1x32xf32>
      %39 = vector.broadcast %38 : vector<1x32xf32> to vector<256x32xf32>
      %40 = arith.mulf %34, %39 : vector<256x32xf32>
      %c1_64 = arith.constant 1 : index
      %c0_65 = arith.constant 0 : index
      %41 = vector.load %arg5[%c1_64, %c0_65] : memref<2x32xf32, #tpu.memory_space<vmem>>, vector<1x32xf32>
      %42 = vector.broadcast %41 : vector<1x32xf32> to vector<256x32xf32>
      %43 = arith.addf %40, %42 : vector<256x32xf32>
      %cst_66 = arith.constant 0.000000e+00 : f32
      %44 = vector.broadcast %cst_66 : f32 to vector<256x32xf32>
      %45 = arith.maximumf %43, %44 : vector<256x32xf32>
      %46 = arith.truncf %45 : vector<256x32xf32> to vector<256x32xbf16>
      %c0_67 = arith.constant 0 : index
      %c0_68 = arith.constant 0 : index
      %c0_69 = arith.constant 0 : index
      %47 = vector.load %arg6[%c0_67, %c0_68, %c0_69] : memref<1x256x32xbf16, #tpu.memory_space<vmem>>, vector<1x256x32xbf16>
      %48 = vector.shape_cast %47 : vector<1x256x32xbf16> to vector<256x32xbf16>
      %49 = vector.shape_cast %46 : vector<256x32xbf16> to vector<1x256x32xbf16>
      tpu.vector_store %arg6[%c0_67, %c0_68, %c0_69], %49 {strides = array<i32>} : memref<1x256x32xbf16, #tpu.memory_space<vmem>>, vector<1x256x32xbf16>,
    } else {
    }
    return
  }
  func.func @transform_0(%arg0: i32, %arg1: i32, %arg2: i32) -> (i32, i32, i32, i32) {
    %c0_i32 = arith.constant 0 : i32
    %c0_i32_0 = arith.constant 0 : i32
    %c0_i32_1 = arith.constant 0 : i32
    return %arg0, %c0_i32, %c0_i32_0, %arg2 : i32, i32, i32, i32
  }
  func.func @transform_1(%arg0: i32, %arg1: i32, %arg2: i32) -> (i32, i32, i32) {
    %c0_i32 = arith.constant 0 : i32
    %c0_i32_0 = arith.constant 0 : i32
    return %arg2, %c0_i32, %arg1 : i32, i32, i32
  }
  func.func @transform_2(%arg0: i32, %arg1: i32, %arg2: i32) -> (i32, i32) {
    %c0_i32 = arith.constant 0 : i32
    %c0_i32_0 = arith.constant 0 : i32
    return %c0_i32, %arg1 : i32, i32
  }
  func.func @transform_3(%arg0: i32, %arg1: i32, %arg2: i32) -> (i32, i32, i32) {
    %c0_i32 = arith.constant 0 : i32
    %c0_i32_0 = arith.constant 0 : i32
    return %arg0, %c0_i32, %arg1 : i32, i32, i32
  }
}

module attributes {stable_mosaic.version = 11 : i64} {
  func.func @_conv3x3_bn_kernel(%arg0: i32, %arg1: i32, %arg2: i32, %arg3: memref<1x16x16x32xbf16, #tpu.memory_space<vmem>>, %arg4: memref<1x288x32xbf16, #tpu.memory_space<vmem>>, %arg5: memref<2x32xf32, #tpu.memory_space<vmem>>, %arg6: memref<1x256x32xbf16, #tpu.memory_space<vmem>>, %arg7: memref<16x16x288xbf16, #tpu.memory_space<vmem>>) attributes {dimension_semantics = [#tpu.dimension_semantics<parallel>, #tpu.dimension_semantics<parallel>, #tpu.dimension_semantics<arbitrary>], iteration_bounds = array<i64: 2, 1, 1>, scalar_prefetch = 0 : i64, scratch_operands = 1 : i64, tpu.core_type = #tpu.core_type<tc>, window_params = [{transform_indices = @transform_0, window_bounds = array<i64: 1, 16, 16, 32>}, {transform_indices = @transform_1, window_bounds = array<i64: 1, 288, 32>}, {transform_indices = @transform_2, window_bounds = array<i64: 2, 32>}, {transform_indices = @transform_3, window_bounds = array<i64: 1, 256, 32>}]} {
    %c0_i32 = arith.constant 0 : i32
    %0 = arith.cmpi eq, %arg2, %c0_i32 : i32
    %1 = arith.extui %0 : i1 to i32
    %c0_i32_0 = arith.constant 0 : i32
    %2 = arith.cmpi ne, %1, %c0_i32_0 : i32
    scf.if %2 {
      %cst_62 = arith.constant 0.000000e+00 : bf16
      %38 = vector.broadcast %cst_62 : bf16 to vector<1x16x32xbf16>
      %c0_63 = arith.constant 0 : index
      %c0_64 = arith.constant 0 : index
      %c0_65 = arith.constant 0 : index
      %39 = vector.load %arg7[%c0_63, %c0_64, %c0_65] : memref<16x16x288xbf16, #tpu.memory_space<vmem>>, vector<1x16x32xbf16>
      tpu.vector_store %arg7[%c0_63, %c0_64, %c0_65], %38 {strides = array<i32>} : memref<16x16x288xbf16, #tpu.memory_space<vmem>>, vector<1x16x32xbf16>,
      %cst_66 = arith.constant 0.000000e+00 : bf16
      %40 = vector.broadcast %cst_66 : bf16 to vector<16x1x32xbf16>
      %c0_67 = arith.constant 0 : index
      %c0_68 = arith.constant 0 : index
      %c0_69 = arith.constant 0 : index
      %41 = vector.load %arg7[%c0_67, %c0_68, %c0_69] : memref<16x16x288xbf16, #tpu.memory_space<vmem>>, vector<16x1x32xbf16>
      tpu.vector_store %arg7[%c0_67, %c0_68, %c0_69], %40 {strides = array<i32>} : memref<16x16x288xbf16, #tpu.memory_space<vmem>>, vector<16x1x32xbf16>,
      %cst_70 = arith.constant 0.000000e+00 : bf16
      %42 = vector.broadcast %cst_70 : bf16 to vector<1x16x32xbf16>
      %c0_71 = arith.constant 0 : index
      %c0_72 = arith.constant 0 : index
      %c32_73 = arith.constant 32 : index
      %43 = vector.load %arg7[%c0_71, %c0_72, %c32_73] : memref<16x16x288xbf16, #tpu.memory_space<vmem>>, vector<1x16x32xbf16>
      tpu.vector_store %arg7[%c0_71, %c0_72, %c32_73], %42 {strides = array<i32>} : memref<16x16x288xbf16, #tpu.memory_space<vmem>>, vector<1x16x32xbf16>,
      %cst_74 = arith.constant 0.000000e+00 : bf16
      %44 = vector.broadcast %cst_74 : bf16 to vector<1x16x32xbf16>
      %c0_75 = arith.constant 0 : index
      %c0_76 = arith.constant 0 : index
      %c64_77 = arith.constant 64 : index
      %45 = vector.load %arg7[%c0_75, %c0_76, %c64_77] : memref<16x16x288xbf16, #tpu.memory_space<vmem>>, vector<1x16x32xbf16>
      tpu.vector_store %arg7[%c0_75, %c0_76, %c64_77], %44 {strides = array<i32>} : memref<16x16x288xbf16, #tpu.memory_space<vmem>>, vector<1x16x32xbf16>,
      %cst_78 = arith.constant 0.000000e+00 : bf16
      %46 = vector.broadcast %cst_78 : bf16 to vector<16x1x32xbf16>
      %c0_79 = arith.constant 0 : index
      %c15 = arith.constant 15 : index
      %c64_80 = arith.constant 64 : index
      %47 = vector.load %arg7[%c0_79, %c15, %c64_80] : memref<16x16x288xbf16, #tpu.memory_space<vmem>>, vector<16x1x32xbf16>
      tpu.vector_store %arg7[%c0_79, %c15, %c64_80], %46 {strides = array<i32>} : memref<16x16x288xbf16, #tpu.memory_space<vmem>>, vector<16x1x32xbf16>,
      %cst_81 = arith.constant 0.000000e+00 : bf16
      %48 = vector.broadcast %cst_81 : bf16 to vector<16x1x32xbf16>
      %c0_82 = arith.constant 0 : index
      %c0_83 = arith.constant 0 : index
      %c96_84 = arith.constant 96 : index
      %49 = vector.load %arg7[%c0_82, %c0_83, %c96_84] : memref<16x16x288xbf16, #tpu.memory_space<vmem>>, vector<16x1x32xbf16>
      tpu.vector_store %arg7[%c0_82, %c0_83, %c96_84], %48 {strides = array<i32>} : memref<16x16x288xbf16, #tpu.memory_space<vmem>>, vector<16x1x32xbf16>,
      %cst_85 = arith.constant 0.000000e+00 : bf16
      %50 = vector.broadcast %cst_85 : bf16 to vector<16x1x32xbf16>
      %c0_86 = arith.constant 0 : index
      %c15_87 = arith.constant 15 : index
      %c160_88 = arith.constant 160 : index
      %51 = vector.load %arg7[%c0_86, %c15_87, %c160_88] : memref<16x16x288xbf16, #tpu.memory_space<vmem>>, vector<16x1x32xbf16>
      tpu.vector_store %arg7[%c0_86, %c15_87, %c160_88], %50 {strides = array<i32>} : memref<16x16x288xbf16, #tpu.memory_space<vmem>>, vector<16x1x32xbf16>,
      %cst_89 = arith.constant 0.000000e+00 : bf16
      %52 = vector.broadcast %cst_89 : bf16 to vector<1x16x32xbf16>
      %c15_90 = arith.constant 15 : index
      %c0_91 = arith.constant 0 : index
      %c192_92 = arith.constant 192 : index
      %53 = vector.load %arg7[%c15_90, %c0_91, %c192_92] : memref<16x16x288xbf16, #tpu.memory_space<vmem>>, vector<1x16x32xbf16>
      tpu.vector_store %arg7[%c15_90, %c0_91, %c192_92], %52 {strides = array<i32>} : memref<16x16x288xbf16, #tpu.memory_space<vmem>>, vector<1x16x32xbf16>,
      %cst_93 = arith.constant 0.000000e+00 : bf16
      %54 = vector.broadcast %cst_93 : bf16 to vector<16x1x32xbf16>
      %c0_94 = arith.constant 0 : index
      %c0_95 = arith.constant 0 : index
      %c192_96 = arith.constant 192 : index
      %55 = vector.load %arg7[%c0_94, %c0_95, %c192_96] : memref<16x16x288xbf16, #tpu.memory_space<vmem>>, vector<16x1x32xbf16>
      tpu.vector_store %arg7[%c0_94, %c0_95, %c192_96], %54 {strides = array<i32>} : memref<16x16x288xbf16, #tpu.memory_space<vmem>>, vector<16x1x32xbf16>,
      %cst_97 = arith.constant 0.000000e+00 : bf16
      %56 = vector.broadcast %cst_97 : bf16 to vector<1x16x32xbf16>
      %c15_98 = arith.constant 15 : index
      %c0_99 = arith.constant 0 : index
      %c224_100 = arith.constant 224 : index
      %57 = vector.load %arg7[%c15_98, %c0_99, %c224_100] : memref<16x16x288xbf16, #tpu.memory_space<vmem>>, vector<1x16x32xbf16>
      tpu.vector_store %arg7[%c15_98, %c0_99, %c224_100], %56 {strides = array<i32>} : memref<16x16x288xbf16, #tpu.memory_space<vmem>>, vector<1x16x32xbf16>,
      %cst_101 = arith.constant 0.000000e+00 : bf16
      %58 = vector.broadcast %cst_101 : bf16 to vector<1x16x32xbf16>
      %c15_102 = arith.constant 15 : index
      %c0_103 = arith.constant 0 : index
      %c256_104 = arith.constant 256 : index
      %59 = vector.load %arg7[%c15_102, %c0_103, %c256_104] : memref<16x16x288xbf16, #tpu.memory_space<vmem>>, vector<1x16x32xbf16>
      tpu.vector_store %arg7[%c15_102, %c0_103, %c256_104], %58 {strides = array<i32>} : memref<16x16x288xbf16, #tpu.memory_space<vmem>>, vector<1x16x32xbf16>,
      %cst_105 = arith.constant 0.000000e+00 : bf16
      %60 = vector.broadcast %cst_105 : bf16 to vector<16x1x32xbf16>
      %c0_106 = arith.constant 0 : index
      %c15_107 = arith.constant 15 : index
      %c256_108 = arith.constant 256 : index
      %61 = vector.load %arg7[%c0_106, %c15_107, %c256_108] : memref<16x16x288xbf16, #tpu.memory_space<vmem>>, vector<16x1x32xbf16>
      tpu.vector_store %arg7[%c0_106, %c15_107, %c256_108], %60 {strides = array<i32>} : memref<16x16x288xbf16, #tpu.memory_space<vmem>>, vector<16x1x32xbf16>,
    } else {
    }
    %c0 = arith.constant 0 : index
    %c0_1 = arith.constant 0 : index
    %c0_2 = arith.constant 0 : index
    %c0_3 = arith.constant 0 : index
    %3 = vector.load %arg3[%c0, %c0_1, %c0_2, %c0_3] : memref<1x16x16x32xbf16, #tpu.memory_space<vmem>>, vector<1x15x15x32xbf16>
    %4 = vector.shape_cast %3 : vector<1x15x15x32xbf16> to vector<15x15x32xbf16>
    %c1 = arith.constant 1 : index
    %c1_4 = arith.constant 1 : index
    %c0_5 = arith.constant 0 : index
    %5 = vector.load %arg7[%c1, %c1_4, %c0_5] : memref<16x16x288xbf16, #tpu.memory_space<vmem>>, vector<15x15x32xbf16>
    tpu.vector_store %arg7[%c1, %c1_4, %c0_5], %4 {strides = array<i32>} : memref<16x16x288xbf16, #tpu.memory_space<vmem>>, vector<15x15x32xbf16>,
    %c0_6 = arith.constant 0 : index
    %c0_7 = arith.constant 0 : index
    %c0_8 = arith.constant 0 : index
    %c0_9 = arith.constant 0 : index
    %6 = vector.load %arg3[%c0_6, %c0_7, %c0_8, %c0_9] : memref<1x16x16x32xbf16, #tpu.memory_space<vmem>>, vector<1x15x16x32xbf16>
    %7 = vector.shape_cast %6 : vector<1x15x16x32xbf16> to vector<15x16x32xbf16>
    %c1_10 = arith.constant 1 : index
    %c0_11 = arith.constant 0 : index
    %c32 = arith.constant 32 : index
    %8 = vector.load %arg7[%c1_10, %c0_11, %c32] : memref<16x16x288xbf16, #tpu.memory_space<vmem>>, vector<15x16x32xbf16>
    tpu.vector_store %arg7[%c1_10, %c0_11, %c32], %7 {strides = array<i32>} : memref<16x16x288xbf16, #tpu.memory_space<vmem>>, vector<15x16x32xbf16>,
    %c0_12 = arith.constant 0 : index
    %c0_13 = arith.constant 0 : index
    %c1_14 = arith.constant 1 : index
    %c0_15 = arith.constant 0 : index
    %9 = vector.load %arg3[%c0_12, %c0_13, %c1_14, %c0_15] : memref<1x16x16x32xbf16, #tpu.memory_space<vmem>>, vector<1x15x15x32xbf16>
    %10 = vector.shape_cast %9 : vector<1x15x15x32xbf16> to vector<15x15x32xbf16>
    %c1_16 = arith.constant 1 : index
    %c0_17 = arith.constant 0 : index
    %c64 = arith.constant 64 : index
    %11 = vector.load %arg7[%c1_16, %c0_17, %c64] : memref<16x16x288xbf16, #tpu.memory_space<vmem>>, vector<15x15x32xbf16>
    tpu.vector_store %arg7[%c1_16, %c0_17, %c64], %10 {strides = array<i32>} : memref<16x16x288xbf16, #tpu.memory_space<vmem>>, vector<15x15x32xbf16>,
    %c0_18 = arith.constant 0 : index
    %c0_19 = arith.constant 0 : index
    %c0_20 = arith.constant 0 : index
    %c0_21 = arith.constant 0 : index
    %12 = vector.load %arg3[%c0_18, %c0_19, %c0_20, %c0_21] : memref<1x16x16x32xbf16, #tpu.memory_space<vmem>>, vector<1x16x15x32xbf16>
    %13 = vector.shape_cast %12 : vector<1x16x15x32xbf16> to vector<16x15x32xbf16>
    %c0_22 = arith.constant 0 : index
    %c1_23 = arith.constant 1 : index
    %c96 = arith.constant 96 : index
    %14 = vector.load %arg7[%c0_22, %c1_23, %c96] : memref<16x16x288xbf16, #tpu.memory_space<vmem>>, vector<16x15x32xbf16>
    tpu.vector_store %arg7[%c0_22, %c1_23, %c96], %13 {strides = array<i32>} : memref<16x16x288xbf16, #tpu.memory_space<vmem>>, vector<16x15x32xbf16>,
    %c0_24 = arith.constant 0 : index
    %c0_25 = arith.constant 0 : index
    %c0_26 = arith.constant 0 : index
    %c0_27 = arith.constant 0 : index
    %15 = vector.load %arg3[%c0_24, %c0_25, %c0_26, %c0_27] : memref<1x16x16x32xbf16, #tpu.memory_space<vmem>>, vector<1x16x16x32xbf16>
    %16 = vector.shape_cast %15 : vector<1x16x16x32xbf16> to vector<16x16x32xbf16>
    %c0_28 = arith.constant 0 : index
    %c0_29 = arith.constant 0 : index
    %c128 = arith.constant 128 : index
    %17 = vector.load %arg7[%c0_28, %c0_29, %c128] : memref<16x16x288xbf16, #tpu.memory_space<vmem>>, vector<16x16x32xbf16>
    tpu.vector_store %arg7[%c0_28, %c0_29, %c128], %16 {strides = array<i32>} : memref<16x16x288xbf16, #tpu.memory_space<vmem>>, vector<16x16x32xbf16>,
    %c0_30 = arith.constant 0 : index
    %c0_31 = arith.constant 0 : index
    %c1_32 = arith.constant 1 : index
    %c0_33 = arith.constant 0 : index
    %18 = vector.load %arg3[%c0_30, %c0_31, %c1_32, %c0_33] : memref<1x16x16x32xbf16, #tpu.memory_space<vmem>>, vector<1x16x15x32xbf16>
    %19 = vector.shape_cast %18 : vector<1x16x15x32xbf16> to vector<16x15x32xbf16>
    %c0_34 = arith.constant 0 : index
    %c0_35 = arith.constant 0 : index
    %c160 = arith.constant 160 : index
    %20 = vector.load %arg7[%c0_34, %c0_35, %c160] : memref<16x16x288xbf16, #tpu.memory_space<vmem>>, vector<16x15x32xbf16>
    tpu.vector_store %arg7[%c0_34, %c0_35, %c160], %19 {strides = array<i32>} : memref<16x16x288xbf16, #tpu.memory_space<vmem>>, vector<16x15x32xbf16>,
    %c0_36 = arith.constant 0 : index
    %c1_37 = arith.constant 1 : index
    %c0_38 = arith.constant 0 : index
    %c0_39 = arith.constant 0 : index
    %21 = vector.load %arg3[%c0_36, %c1_37, %c0_38, %c0_39] : memref<1x16x16x32xbf16, #tpu.memory_space<vmem>>, vector<1x15x15x32xbf16>
    %22 = vector.shape_cast %21 : vector<1x15x15x32xbf16> to vector<15x15x32xbf16>
    %c0_40 = arith.constant 0 : index
    %c1_41 = arith.constant 1 : index
    %c192 = arith.constant 192 : index
    %23 = vector.load %arg7[%c0_40, %c1_41, %c192] : memref<16x16x288xbf16, #tpu.memory_space<vmem>>, vector<15x15x32xbf16>
    tpu.vector_store %arg7[%c0_40, %c1_41, %c192], %22 {strides = array<i32>} : memref<16x16x288xbf16, #tpu.memory_space<vmem>>, vector<15x15x32xbf16>,
    %c0_42 = arith.constant 0 : index
    %c1_43 = arith.constant 1 : index
    %c0_44 = arith.constant 0 : index
    %c0_45 = arith.constant 0 : index
    %24 = vector.load %arg3[%c0_42, %c1_43, %c0_44, %c0_45] : memref<1x16x16x32xbf16, #tpu.memory_space<vmem>>, vector<1x15x16x32xbf16>
    %25 = vector.shape_cast %24 : vector<1x15x16x32xbf16> to vector<15x16x32xbf16>
    %c0_46 = arith.constant 0 : index
    %c0_47 = arith.constant 0 : index
    %c224 = arith.constant 224 : index
    %26 = vector.load %arg7[%c0_46, %c0_47, %c224] : memref<16x16x288xbf16, #tpu.memory_space<vmem>>, vector<15x16x32xbf16>
    tpu.vector_store %arg7[%c0_46, %c0_47, %c224], %25 {strides = array<i32>} : memref<16x16x288xbf16, #tpu.memory_space<vmem>>, vector<15x16x32xbf16>,
    %c0_48 = arith.constant 0 : index
    %c1_49 = arith.constant 1 : index
    %c1_50 = arith.constant 1 : index
    %c0_51 = arith.constant 0 : index
    %27 = vector.load %arg3[%c0_48, %c1_49, %c1_50, %c0_51] : memref<1x16x16x32xbf16, #tpu.memory_space<vmem>>, vector<1x15x15x32xbf16>
    %28 = vector.shape_cast %27 : vector<1x15x15x32xbf16> to vector<15x15x32xbf16>
    %c0_52 = arith.constant 0 : index
    %c0_53 = arith.constant 0 : index
    %c256 = arith.constant 256 : index
    %29 = vector.load %arg7[%c0_52, %c0_53, %c256] : memref<16x16x288xbf16, #tpu.memory_space<vmem>>, vector<15x15x32xbf16>
    tpu.vector_store %arg7[%c0_52, %c0_53, %c256], %28 {strides = array<i32>} : memref<16x16x288xbf16, #tpu.memory_space<vmem>>, vector<15x15x32xbf16>,
    %c0_54 = arith.constant 0 : index
    %c0_55 = arith.constant 0 : index
    %c0_56 = arith.constant 0 : index
    %30 = vector.load %arg7[%c0_54, %c0_55, %c0_56] : memref<16x16x288xbf16, #tpu.memory_space<vmem>>, vector<16x16x288xbf16>
    %31 = vector.shape_cast %30 : vector<16x16x288xbf16> to vector<256x288xbf16>
    %c0_57 = arith.constant 0 : index
    %c0_58 = arith.constant 0 : index
    %c0_59 = arith.constant 0 : index
    %32 = vector.load %arg4[%c0_57, %c0_58, %c0_59] : memref<1x288x32xbf16, #tpu.memory_space<vmem>>, vector<1x288x32xbf16>
    %33 = vector.shape_cast %32 : vector<1x288x32xbf16> to vector<288x32xbf16>
    %cst = arith.constant dense<0.000000e+00> : vector<256x32xf32>
    %34 = tpu.matmul %31, %33, %cst {dimension_numbers = #tpu.dot_dimension_numbers<[1], [0], [0], [1], [0, 0, 1, 1], [], []>} : vector<256x288xbf16>, vector<288x32xbf16>, vector<256x32xf32> -> vector<256x32xf32>
    %c0_i32_60 = arith.constant 0 : i32
    %35 = arith.cmpi eq, %arg2, %c0_i32_60 : i32
    %36 = arith.extui %35 : i1 to i32
    %c0_i32_61 = arith.constant 0 : i32
    %37 = arith.cmpi ne, %36, %c0_i32_61 : i32
    scf.if %37 {
      %c0_62 = arith.constant 0 : index
      %c0_63 = arith.constant 0 : index
      %38 = vector.load %arg5[%c0_62, %c0_63] : memref<2x32xf32, #tpu.memory_space<vmem>>, vector<1x32xf32>
      %39 = vector.broadcast %38 : vector<1x32xf32> to vector<256x32xf32>
      %40 = arith.mulf %34, %39 : vector<256x32xf32>
      %c1_64 = arith.constant 1 : index
      %c0_65 = arith.constant 0 : index
      %41 = vector.load %arg5[%c1_64, %c0_65] : memref<2x32xf32, #tpu.memory_space<vmem>>, vector<1x32xf32>
      %42 = vector.broadcast %41 : vector<1x32xf32> to vector<256x32xf32>
      %43 = arith.addf %40, %42 : vector<256x32xf32>
      %cst_66 = arith.constant 0.000000e+00 : f32
      %44 = vector.broadcast %cst_66 : f32 to vector<256x32xf32>
      %45 = arith.maximumf %43, %44 : vector<256x32xf32>
      %46 = arith.truncf %45 : vector<256x32xf32> to vector<256x32xbf16>
      %c0_67 = arith.constant 0 : index
      %c0_68 = arith.constant 0 : index
      %c0_69 = arith.constant 0 : index
      %47 = vector.load %arg6[%c0_67, %c0_68, %c0_69] : memref<1x256x32xbf16, #tpu.memory_space<vmem>>, vector<1x256x32xbf16>
      %48 = vector.shape_cast %47 : vector<1x256x32xbf16> to vector<256x32xbf16>
      %49 = vector.shape_cast %46 : vector<256x32xbf16> to vector<1x256x32xbf16>
      tpu.vector_store %arg6[%c0_67, %c0_68, %c0_69], %49 {strides = array<i32>} : memref<1x256x32xbf16, #tpu.memory_space<vmem>>, vector<1x256x32xbf16>,
    } else {
    }
    return
  }
  func.func @transform_0(%arg0: i32, %arg1: i32, %arg2: i32) -> (i32, i32, i32, i32) {
    %c0_i32 = arith.constant 0 : i32
    %c0_i32_0 = arith.constant 0 : i32
    %c0_i32_1 = arith.constant 0 : i32
    return %arg0, %c0_i32, %c0_i32_0, %arg2 : i32, i32, i32, i32
  }
  func.func @transform_1(%arg0: i32, %arg1: i32, %arg2: i32) -> (i32, i32, i32) {
    %c0_i32 = arith.constant 0 : i32
    %c0_i32_0 = arith.constant 0 : i32
    return %arg2, %c0_i32, %arg1 : i32, i32, i32
  }
  func.func @transform_2(%arg0: i32, %arg1: i32, %arg2: i32) -> (i32, i32) {
    %c0_i32 = arith.constant 0 : i32
    %c0_i32_0 = arith.constant 0 : i32
    return %c0_i32, %arg1 : i32, i32
  }
  func.func @transform_3(%arg0: i32, %arg1: i32, %arg2: i32) -> (i32, i32, i32) {
    %c0_i32 = arith.constant 0 : i32
    %c0_i32_0 = arith.constant 0 : i32
    return %arg0, %c0_i32, %arg1 : i32, i32, i32
  }
}

</mosaic_0001>

<bundles_post_ra>
// kernel: conv_block_forward.2
= control target key start
LH: loop header
LB: loop body
LE: loop exit
PB: predicated region body
PF: predicated region fallthrough
CT: control target
= control target key end

     0   :  { %s4175_s12 = smov 0   ;;  %s4177_s13 = smov 0   ;;  %s5556_s0 = inlined_call_operand.vmem [shape: bf16[2,16,16,4], index: 0, kind: input, shape index: {}]   ;;  %s5557_s1 = inlined_call_operand.vmem [shape: bf16[1,36,32], index: 1, kind: input, shape index: {}]   ;;  %s5558_s2 = inlined_call_operand.vmem [shape: f32[2,32], index: 2, kind: input, shape index: {}]   ;;  %s5559_s3 = inlined_call_operand.vmem [shape: bf16[2,256,32], index: 3, kind: output, shape index: {}]  }
   0x1   :  { %s4179_s14 = smov 0  }
   0x2 LB: > { %s32_s15 = sadd.s32 1, %s4140_s13  ;;  %p3561_p0 = scmp.ge.s32.totalorder %s4144_s14, 1  ;;  %s4144_s14 = sphi %s4179_s14, %s13_s14   ;;  %s4140_s13 = sphi %s4177_s13, %s5585_s13   ;;  %s4136_s12 = sphi %s4175_s12, %s5584_s12  }
   0x3   : > { %p34_p1 = scmp.ge.s32.totalorder %s32_s15, 2  ;;  %p187_p2 = scmp.lt.s32.totalorder %s4144_s14, 3 }
   0x5   : > { %s5587_s15 = smov (%p34_p1, %s32_s15), 0  ;;  %p188_p3 = pnand %p3561_p0, %p187_p2 }
   0x6   : > { %p229_p4 = scmp.lt.s32.totalorder (!%p188_p3), %s4136_s12, 1  ;;  %vm264_vm0 = vcmask (!%p188_p3), 24576   ;;  %vm265_vm1 = vsmask.f32 (!%p188_p3), 256  ;;  %v294_v1 = vld [vmem:[#allocation2 + $0x48] sm:$0x1] (!%p188_p3) }
   0x7   : > { %191 = sbr.rel (%p188_p3) target bundleno = 602 (0x25a), region = 32  ;;  %vm4194_vm2 = vmand (!%p188_p3), %vm264_vm0, %vm265_vm1  ;;  %vm319_vm3 = vcmask (!%p188_p3), 97351   ;;  %vm320_vm4 = vsmask.f32 (!%p188_p3), 7966  ;;  %v349_v3 = vld [vmem:[#allocation2 + $0x48] sm:$0x80] (!%p188_p3) }
   0x8   : > { %v295_v2 = vsel (!%p188_p3), %vm4194_vm2, 0, %v294_v1  ;;  %vm4203_vm5 = vmand (!%p188_p3), %vm319_vm3, %vm320_vm4  ;;  %v291_v6 = vld [vmem:[#allocation2 + $0x40] sm:$0x1] (!%p188_p3)  ;;  %v346_v8 = vld [vmem:[#allocation2 + $0x40] sm:$0x80] (!%p188_p3)  ;;  %s4146_s20 = smov (!%p188_p3), 4  }
   0x9   : > { %296 = vst [vmem:[#allocation2 + $0x48] sm:$0x1] (!%p188_p3), %v295_v2  ;;  %v350_v5 = vsel (!%p188_p3), %vm4203_vm5, 0, %v349_v3  ;;  %v292_v7 = vsel (!%p188_p3), %vm4194_vm2, 0, %v291_v6  ;;  %v273_v9 = vld [vmem:[#allocation2 + $0x10] sm:$0x1] (!%p188_p3) }
   0xa   : > { %351 = vst [vmem:[#allocation2 + $0x48] sm:$0x80] (!%p188_p3), %v350_v5  ;;  %293 = vst [vmem:[#allocation2 + $0x40] sm:$0x1] (!%p188_p3), %v292_v7  ;;  %v347_v11 = vsel (!%p188_p3), %vm4203_vm5, 0, %v346_v8  ;;  %v274_v13 = vsel (!%p188_p3), %vm4194_vm2, 0, %v273_v9 }
   0xb   : > { %348 = vst [vmem:[#allocation2 + $0x40] sm:$0x80] (!%p188_p3), %v347_v11  ;;  %vm262_vm6 = vcmask (!%p188_p3), 31744   ;;  %275 = vst [vmem:[#allocation2 + $0x10] sm:$0x1] (!%p188_p3), %v274_v13  ;;  %v4147_v17 = vmov (!%p188_p3), 0  }
   0xc   : > { %263 = vst.msk [vmem:[#allocation2] sm:$0xff] (!%p188_p3), %vm262_vm6, %v4147_v17  ;;  %s4148_s21 = smov (!%p188_p3), 8   ;;  %s4149_s22 = smov (!%p188_p3), 12   ;;  %vm370_vm7 = vcmask (!%p188_p3), 122976   ;;  %vm420_vm8 = vcmask (!%p188_p3), 195751   ;;  %vm473_vm9 = vcmask (!%p188_p3), 221376  }
   0xd   : > { %s4150_s23 = smov (!%p188_p3), 16   ;;  %vm527_vm10 = vcmask (!%p188_p3), 294151   ;;  %vm4347_vm11 = vmand (!%p188_p3), %vm370_vm7, %vm265_vm1  ;;  %vm804_vm13 = vsmask.f32 (!%p188_p3), 7938  ;;  %s4151_s24 = smov (!%p188_p3), 20   ;;  %vm317_vm3 = vcmask (!%p188_p3), 97344  }
   0xe   : > { %s5589_s12 = smov (!%p229_p4, %s4136_s12), 1  ;;  %vm4357_vm12 = vmand %vm420_vm8, %vm320_vm4  ;;  %s4152_s25 = smov 24  }
   0xf   : > { %s3849_s16 = sshll.u32 %s5589_s12, 7  ;;  %vm4411_vm14 = vmand %vm473_vm9, %vm265_vm1  ;;  %vm315_vm1 = vcmask 64544   ;;  %s4153_s26 = smov 28   ;;  %vm1802_vm9 = vcmask 162944  }
  0x10   : > { %s4215_s19 = scalar_lea.vmem %s5556_s0, %s3849_s16  ;;  %vm4424_vm15 = vmand %vm527_vm10, %vm320_vm4  ;;  %vm1273_vm4 = vsmask.f32 7424  ;;  %s4154_s27 = smov 32   ;;  %vm2091_vm10 = vcmask 195744  }
  0x11   : > { %v3981_v10 = vld [vmem:[%s4215_s19 + $0x40] sm:$0xff]   ;;  %v3982_v12 = vld [vmem:[%s4215_s19 + $0x38] sm:$0xff]   ;;  %v3983_v14 = vld [vmem:[%s4215_s19 + $0x8] sm:$0xff]   ;;  %s5424_s18 = scalar_lea.vmem %s5559_s3, %s3849_s16 }
  0x12   : > { %972 = vrot.lane.b32.xlu1 %v3981_v10, %s4146_s20  ;;  %970 = vrot.lane.b32.xlu0 %v3982_v12, %s4146_s20  ;;  %v3984_v15 = vld [vmem:[%s4215_s19] sm:$0xff]   ;;  %v3985_v16 = vld [vmem:[%s4215_s19 + $0x50] sm:$0xff]   ;;  %vm4469_vm0 = vmand %vm262_vm6, %vm804_vm13  ;;  %vm1592_vm6 = vcmask 130144  }
  0x13   : > { %v3987_v18 = vld [vmem:[%s4215_s19 + $0x38] sm:$0xff]   ;;  %v3986_v19 = vld [vmem:[%s4215_s19 + $0x48] sm:$0xff]   ;;  %v3989_v22 = vld [vmem:[%s4215_s19 + $0x40] sm:$0xff]  }
  0x14   : > { %v1172_v20 = vshrl.u32 %v3987_v18, 16  ;;  %v1174_v21 = vshll.u32 %v3987_v18, 16  ;;  %v3990_v24 = vld [vmem:[%s4215_s19] sm:$0xff]   ;;  %v3988_v25 = vld [vmem:[%s4215_s19 + $0x10] sm:$0xff]   ;;  %v1179_v26 = vshrl.u32 %v3989_v22, 16  ;;  %v1181_v27 = vshll.u32 %v3989_v22, 16  ;;  %vm4844_vm7 = vmand %vm317_vm3, %vm1273_vm4 }
  0x15   : > { %v1123_v29 = vshrl.u32 %v3990_v24, 16  ;;  %v1125_v30 = vshll.u32 %v3990_v24, 16  ;;  %v3993_v32 = vld [vmem:[%s4215_s19 + $0x48] sm:$0xff]   ;;  %v3991_v38 = vld [vmem:[%s4215_s19 + $0x58] sm:$0xff]   ;;  %v3997_v42 = vld [vmem:[%s4215_s19 + $0x50] sm:$0xff]  }
  0x16   : > { %958 = vrot.lane.b32.xlu1 %v3983_v14, %s4146_s20  ;;  %956 = vrot.lane.b32.xlu0 %v3984_v15, %s4146_s20  ;;  %v1176_v23 = vrot.slane %v1174_v21, 1  ;;  %v1183_v31 = vrot.slane %v1181_v27, 1  ;;  %v3994_v34 = vld [vmem:[%s4215_s19 + $0x8] sm:$0xff]   ;;  %v1188_v36 = vshll.u32 %v3993_v32, 16  ;;  %v3992_v40 = vld [vmem:[%s4215_s19 + $0x18] sm:$0xff]   ;;  %v1186_v41 = vshrl.u32 %v3993_v32, 16  ;;  %vm4861_vm8 = vmand %vm1592_vm6, %vm804_vm13 }
  0x17   : > { %v1127_v33 = vrot.slane %v1125_v30, 1  ;;  %v1132_v39 = vshll.u32 %v3994_v34, 16  ;;  %v3998_v44 = vld [vmem:[%s4215_s19 + $0x10] sm:$0xff]   ;;  %v1130_v45 = vshrl.u32 %v3994_v34, 16  ;;  %v1195_v47 = vshll.u32 %v3997_v42, 16  ;;  %v3999_v50 = vld [vmem:[%s4215_s19 + $0x40] sm:$0xff]  }
  0x18   : > { %v1177_v28 = vor.u32 %v1176_v23, %v1172_v20  ;;  %v1184_v35 = vor.u32 %v1183_v31, %v1179_v26  ;;  %v1190_v43 = vrot.slane %v1188_v36, 1  ;;  %v1139_v49 = vshll.u32 %v3998_v44, 16  ;;  %v4000_v52 = vld [vmem:[%s4215_s19] sm:$0xff]   ;;  %v4001_v58 = vld [vmem:[%s4215_s19 + $0x48] sm:$0xff]   ;;  %v4009_v20 = vld [vmem:[%s4215_s19 + $0x58] sm:$0xff]  }
  0x19   : > { %v1128_v37 = vor.u32 %v1127_v33, %v1123_v29  ;;  %v1134_v46 = vrot.slane %v1132_v39, 1  ;;  %v3995_v53 = vld [vmem:[%s4215_s19 + $0x60] sm:$0xff]   ;;  %v1193_v55 = vshrl.u32 %v3997_v42, 16  ;;  %v1197_v56 = vrot.slane %v1195_v47, 1  ;;  %v4002_v62 = vld [vmem:[%s4215_s19 + $0x8] sm:$0xff]   ;;  %v4010_v21 = vld [vmem:[%s4215_s19 + $0x18] sm:$0xff]  }
  0x1a   : > { %976 = vrot.lane.b32.xlu1 %v3985_v16, %s4146_s20  ;;  %974 = vrot.lane.b32.xlu0 %v3986_v19, %s4146_s20  ;;  %v1191_v48 = vor.u32 %v1190_v43, %v1186_v41  ;;  %v3996_v54 = vld [vmem:[%s4215_s19 + $0x20] sm:$0xff]   ;;  %v1137_v57 = vshrl.u32 %v3998_v44, 16  ;;  %v1141_v59 = vrot.slane %v1139_v49, 1  ;;  %v1489_v60 = vshrl.u32 %v3999_v50, 16  ;;  %v4005_v22 = vld [vmem:[%s4215_s19 + $0x48] sm:$0xff]  }
  0x1b   : > { %v1135_v51 = vor.u32 %v1134_v46, %v1130_v45  ;;  %v1433_v61 = vshrl.u32 %v4000_v52, 16  ;;  %v1492_v63 = vshll.u32 %v3999_v50, 16  ;;  %v1436_v1 = vshll.u32 %v4000_v52, 16  ;;  %v4003_v18 = vld [vmem:[%s4215_s19 + $0x40] sm:$0xff]   ;;  %v4006_v23 = vld [vmem:[%s4215_s19 + $0x8] sm:$0xff]   ;;  %v4013_v27 = vld [vmem:[%s4215_s19 + $0x10] sm:$0xff]  }
  0x1c   : > { %v1198_v2 = vor.u32 %v1197_v56, %v1193_v55  ;;  %v1491_v3 = vrot.slane %v1489_v60, 7  ;;  %v1496_v5 = vshrl.u32 %v4001_v58, 16  ;;  %v1142_v6 = vor.u32 %v1141_v59, %v1137_v57  ;;  %v4004_v19 = vld [vmem:[%s4215_s19] sm:$0xff]   ;;  %v4008_v30 = vld [vmem:[%s4215_s19 + $0x28] sm:$0xff]   ;;  %v4015_v33 = vld [vmem:[%s4215_s19 + $0x18] sm:$0xff]  }
  0x1d   : > { %v1435_v7 = vrot.slane %v1433_v61, 7  ;;  %v1440_v8 = vshrl.u32 %v4002_v62, 16  ;;  %v1499_v11 = vshll.u32 %v4001_v58, 16  ;;  %v1443_v14 = vshll.u32 %v4002_v62, 16  ;;  %v4014_v29 = vld [vmem:[%s4215_s19 + $0x60] sm:$0xff]   ;;  %v4284_v34 = vld [vmem:[%s4215_s19 + $0x50] sm:$0xff]  }
  0x1e   : > { %1241 = vrot.lane.b32.xlu1 %v1177_v28, %s4148_s21  ;;  %960 = vrot.lane.b32.xlu0 %v3988_v25, %s4146_s20  ;;  %v1494_v9 = vor.u32 %v1492_v63, %v1491_v3  ;;  %v1498_v10 = vrot.slane %v1496_v5, 7  ;;  %v1202_v24 = vshll.u32 %v4009_v20, 16  ;;  %v4011_v25 = vld [vmem:[%s4215_s19 + $0x20] sm:$0xff]   ;;  %v1146_v26 = vshll.u32 %v4010_v21, 16  ;;  %v4007_v28 = vld [vmem:[%s4215_s19 + $0x68] sm:$0xff]  }
  0x1f   : > { %v1438_v12 = vor.u32 %v1436_v1, %v1435_v7  ;;  %v1442_v13 = vrot.slane %v1440_v8, 7  ;;  %v1200_v31 = vshrl.u32 %v4009_v20, 16  ;;  %v1144_v32 = vshrl.u32 %v4010_v21, 16  ;;  %v4289_v39 = vld [vmem:[%s4215_s19 + $0x58] sm:$0xff]   ;;  %v4303_v55 = vld [vmem:[%s4215_s19 + $0x8] sm:$0xff]   ;;  %v4012_v56 = vld [vmem:[%s4215_s19 + $0x30] sm:$0xff]  }
  0x20   : > { %v1501_v15 = vor.u32 %v1499_v11, %v1498_v10  ;;  %v1153_v36 = vshll.u32 %v4011_v25, 16  ;;  %v1209_v41 = vshll.u32 %v4014_v29, 16  ;;  %v1151_v42 = vshrl.u32 %v4011_v25, 16  ;;  %v4310_v63 = vld [vmem:[%s4215_s19 + $0x28] sm:$0xff]  }
  0x21   : > { %v1445_v16 = vor.u32 %v1443_v14, %v1442_v13  ;;  %v1450_v43 = vshll.u32 %v4013_v27, 16  ;;  %v1454_v44 = vshrl.u32 %v4015_v33, 16  ;;  %v1503_v45 = vshrl.u32 %v4284_v34, 16  ;;  %v399_v25 = vld [vmem:[#allocation2 + $0x48] sm:$0x1] }
  0x22   : > { %1243 = vrot.lane.b32.xlu1 %v1184_v35, %s4148_s21  ;;  %1227 = vrot.lane.b32.xlu0 %v1128_v37, %s4148_s21  ;;  %v1204_v35 = vrot.slane %v1202_v24, 1  ;;  %v1148_v37 = vrot.slane %v1146_v26, 1  ;;  %v1155_v47 = vrot.slane %v1153_v36, 1  ;;  %v1457_v58 = vshll.u32 %v4015_v33, 16  ;;  %v4109_v24 = vld [vmem:[%s4215_s19 + $0x78] sm:$0xff]  }
  0x23   : > { %v1456_v57 = vrot.slane %v1454_v44, 7  ;;  %v1505_v59 = vrot.slane %v1503_v45, 7  ;;  %v1506_v60 = vshll.u32 %v4284_v34, 16  ;;  %v1513_v62 = vshll.u32 %v4289_v39, 16  ;;  %v396_v34 = vld [vmem:[#allocation2 + $0x40] sm:$0x1] }
  0x24   : > { %v1205_v46 = vor.u32 %v1204_v35, %v1200_v31  ;;  %v1149_v49 = vor.u32 %v1148_v37, %v1144_v32  ;;  %v1156_v61 = vor.u32 %v1155_v47, %v1151_v42  ;;  %v1941_v7 = vshll.u32 %v4303_v55, 16  ;;  %v4017_v31 = vld [vmem:[%s4215_s19 + $0x10] sm:$0xff]   ;;  %v4368_v37 = vld [vmem:[%s4215_s19 + $0x20] sm:$0xff]   ;;  %v4387_v47 = vld [vmem:[%s4215_s19 + $0x28] sm:$0xff]  }
  0x25   : > { %v1939_v8 = vshrl.u32 %v4303_v55, 16  ;;  %v1160_v11 = vshll.u32 %v4310_v63, 16  ;;  %v1158_v20 = vshrl.u32 %v4310_v63, 16  ;;  %v1508_v26 = vor.u32 %v1506_v60, %v1505_v59  ;;  %v328_v60 = vld [vmem:[#allocation2 + $0x10] sm:$0x80] }
  0x26   : > { %978 = vrot.lane.b32.xlu1 %v3991_v38, %s4146_s20  ;;  %962 = vrot.lane.b32.xlu0 %v3992_v40, %s4146_s20  ;;  %v1447_v38 = vshrl.u32 %v4013_v27, 16  ;;  %v4292_v40 = vld [vmem:[%s4215_s19] sm:$0xff]  }
  0x27   : > { %v1934_v52 = vshll.u32 %v4292_v40, 16  ;;  %v4341_v21 = vrot.slane %v1160_v11, 1 }
  0x28   : > { %v1449_v50 = vrot.slane %v1447_v38, 7  ;;  %v397_v38 = vsel %vm4347_vm11, 0, %v396_v34 }
  0x29   : > { %v4314_v3 = vrot.slane %v1934_v52, 1  ;;  %398 = vst [vmem:[#allocation2 + $0x40] sm:$0x1] %v397_v38  ;;  %v4444_v38 = vld [vmem:[%s4215_s19 + $0x50] sm:$0xff]  }
  0x2a   : > { %1245 = vrot.lane.b32.xlu1 %v1191_v48, %s4148_s21  ;;  %1229 = vrot.lane.b32.xlu0 %v1135_v51, %s4148_s21  ;;  %v1207_v48 = vshrl.u32 %v4014_v29, 16  ;;  %v1510_v51 = vshrl.u32 %v4289_v39, 16  ;;  %v1452_v10 = vor.u32 %v1450_v43, %v1449_v50  ;;  %v446_v39 = vld [vmem:[#allocation2 + $0x40] sm:$0x80]  ;;  %v4020_v50 = vld [vmem:[%s4215_s19 + $0x50] sm:$0xff]  }
  0x2b   : > { %v447_v42 = vsel %vm4357_vm12, 0, %v446_v39 }
  0x2c   : > { %v1512_v1 = vrot.slane %v1510_v51, 7  ;;  %448 = vst [vmem:[#allocation2 + $0x40] sm:$0x80] %v447_v42 }
  0x2e   : > { %980 = vrot.lane.b32.xlu1 %v3995_v53, %s4146_s20  ;;  %964 = vrot.lane.b32.xlu0 %v3996_v54, %s4146_s20  ;;  %v4300_v53 = vld [vmem:[%s4215_s19 + $0x40] sm:$0xff]   ;;  %v1211_v54 = vrot.slane %v1209_v41, 1  ;;  %v1515_v43 = vor.u32 %v1513_v62, %v1512_v1  ;;  %v1468_v1 = vshrl.u32 %v4387_v47, 16 }
  0x2f   : > { %v1988_v5 = vshrl.u32 %v4300_v53, 16  ;;  %v4374_v41 = vld [vmem:[%s4215_s19 + $0x40] sm:$0xff]  }
  0x30   : > { %v1212_v13 = vor.u32 %v1211_v54, %v1207_v48  ;;  %v1461_v54 = vshrl.u32 %v4368_v37, 16  ;;  %v739_v59 = vshrl.u32 %v4374_v41, 16 }
  0x32   : > { %1247 = vrot.lane.b32.xlu1 %v1198_v2, %s4148_s21  ;;  %1231 = vrot.lane.b32.xlu0 %v1142_v6, %s4148_s21  ;;  %v1932_v2 = vshrl.u32 %v4292_v40, 16  ;;  %v1990_v6 = vshll.u32 %v4300_v53, 16 }
  0x34   : > { %v4329_v14 = vrot.slane %v1990_v6, 1 }
  0x36   : > { %1560 = vrot.lane.b32.xlu1 %v1494_v9, %s4149_s22  ;;  %1544 = vrot.lane.b32.xlu0 %v1438_v12, %s4149_s22  ;;  %v4321_v9 = vld [vmem:[%s4215_s19 + $0x48] sm:$0xff]   ;;  %v4326_v12 = vld [vmem:[%s4215_s19 + $0x30] sm:$0xff]  }
  0x37   : > { %v1167_v27 = vshll.u32 %v4326_v12, 16  ;;  %v1165_v32 = vshrl.u32 %v4326_v12, 16 }
  0x39   : > { %v4381_v45 = vrot.slane %v1167_v27, 1  ;;  %v741_v27 = vrot.slane %v739_v59, 7  ;;  %v4461_v59 = vrot.slane %v1468_v1, 7  ;;  %v300_v1 = vld [vmem:[#allocation2 + $0x58] sm:$0x1] }
  0x3a   : > { %1562 = vrot.lane.b32.xlu1 %v1501_v15, %s4149_s22  ;;  %1546 = vrot.lane.b32.xlu0 %v1445_v16, %s4149_s22  ;;  %v4331_v15 = vrot.slane %v1941_v7, 1  ;;  %v4334_v16 = vld [vmem:[%s4215_s19 + $0x68] sm:$0xff]   ;;  %v4021_v7 = vld [vmem:[%s4215_s19 + $0x18] sm:$0xff]  }
  0x3b   : > { %v1216_v35 = vshll.u32 %v4334_v16, 16  ;;  %v1214_v48 = vshrl.u32 %v4334_v16, 16 }
  0x3d   : > { %v4394_v51 = vrot.slane %v1216_v35, 1 }
  0x3e   : > { %1770 = vrot.lane.b32.xlu1 %v4003_v18, %s4150_s23  ;;  %1754 = vrot.lane.b32.xlu0 %v4004_v19, %s4150_s23  ;;  %v4337_v18 = vld [vmem:[%s4215_s19 + $0x60] sm:$0xff]   ;;  %v1459_v19 = vor.u32 %v1457_v58, %v1456_v57  ;;  %v1937_v57 = vor.u32 %v4314_v3, %v1932_v2  ;;  %v329_v2 = vsel %vm4203_vm5, 0, %v328_v60 }
  0x3f   : > { %v1517_v36 = vshrl.u32 %v4337_v18, 16  ;;  %v1520_v52 = vshll.u32 %v4337_v18, 16  ;;  %330 = vst [vmem:[#allocation2 + $0x10] sm:$0x80] %v329_v2 }
  0x41   : > { %v4403_v58 = vrot.slane %v1517_v36, 7  ;;  %v325_v36 = vld [vmem:[#allocation2 + $0x8] sm:$0x80] }
  0x42   : > { %1772 = vrot.lane.b32.xlu1 %v4005_v22, %s4150_s23  ;;  %1756 = vrot.lane.b32.xlu0 %v4006_v23, %s4150_s23  ;;  %v1995_v22 = vshrl.u32 %v4321_v9, 16  ;;  %v1997_v23 = vshll.u32 %v4321_v9, 16  ;;  %v326_v53 = vsel %vm4203_vm5, 0, %v325_v36  ;;  %v4516_v36 = vld [vmem:[%s4215_s19 + $0x18] sm:$0xff]  }
  0x43   : > { %327 = vst [vmem:[#allocation2 + $0x8] sm:$0x80] %v326_v53  ;;  %v2002_v53 = vshrl.u32 %v4444_v38, 16  ;;  %v1522_v16 = vor.u32 %v1520_v52, %v4403_v58 }
  0x44   : > { %v4379_v44 = vrot.slane %v1997_v23, 1 }
  0x46   : > { %982 = vrot.lane.b32.xlu1 %v4007_v28, %s4146_s20  ;;  %966 = vrot.lane.b32.xlu0 %v4008_v30, %s4146_s20  ;;  %v400_v28 = vsel %vm4347_vm11, 0, %v399_v25  ;;  %v449_v30 = vld [vmem:[#allocation2 + $0x48] sm:$0x80]  ;;  %v742_v25 = vshll.u32 %v4374_v41, 16  ;;  %v428_v60 = vld [vmem:[#allocation2 + $0x10] sm:$0x80] }
  0x47   : > { %401 = vst [vmem:[#allocation2 + $0x48] sm:$0x1] %v400_v28  ;;  %v450_v33 = vsel %vm4357_vm12, 0, %v449_v30  ;;  %v553_v30 = vld [vmem:[#allocation2 + $0x40] sm:$0x80] }
  0x48   : > { %451 = vst [vmem:[#allocation2 + $0x48] sm:$0x80] %v450_v33  ;;  %v1993_v33 = vor.u32 %v4329_v14, %v1988_v5  ;;  %v554_v34 = vsel %vm4424_vm15, 0, %v553_v30  ;;  %v4024_v5 = vld [vmem:[%s4215_s19 + $0x58] sm:$0xff]   ;;  %v4450_v14 = vrot.slane %v1461_v54, 7  ;;  %v4464_v54 = vld [vmem:[%s4215_s19 + $0x10] sm:$0xff]  }
  0x49   : > { %555 = vst [vmem:[#allocation2 + $0x40] sm:$0x80] %v554_v34  ;;  %v1948_v63 = vshll.u32 %v4464_v54, 16  ;;  %v1946_v12 = vshrl.u32 %v4464_v54, 16 }
  0x4a   : > { %1249 = vrot.lane.b32.xlu1 %v1205_v46, %s4148_s21  ;;  %1233 = vrot.lane.b32.xlu0 %v1149_v49, %s4148_s21  ;;  %v4384_v46 = vld [vmem:[%s4215_s19 + $0x68] sm:$0xff]   ;;  %v4391_v49 = vld [vmem:[%s4215_s19 + $0x38] sm:$0xff]  }
  0x4b   : > { %v1524_v62 = vshrl.u32 %v4384_v46, 16  ;;  %v735_v41 = vshll.u32 %v4391_v49, 16  ;;  %v1527_v42 = vshll.u32 %v4384_v46, 16  ;;  %v4576_v46 = vld [vmem:[%s4215_s19 + $0x48] sm:$0xff]  }
  0x4e   : > { %1235 = vrot.lane.b32.xlu1 %v1156_v61, %s4148_s21  ;;  %968 = vrot.lane.b32.xlu0 %v4012_v56, %s4146_s20  ;;  %v1464_v56 = vshll.u32 %v4368_v37, 16  ;;  %v378_v61 = vld [vmem:[#allocation2 + $0x10] sm:$0x1]  ;;  %v502_v40 = vld [vmem:[#allocation2 + $0x48] sm:$0x1] }
  0x4f   : > { %v379_v3 = vsel %vm4347_vm11, 0, %v378_v61 }
  0x50   : > { %380 = vst [vmem:[#allocation2 + $0x10] sm:$0x1] %v379_v3  ;;  %v301_v3 = vsel %vm4194_vm2, 0, %v300_v1  ;;  %v4551_v1 = vld [vmem:[%s4215_s19 + $0x48] sm:$0xff]  }
  0x51   : > { %302 = vst [vmem:[#allocation2 + $0x58] sm:$0x1] %v301_v3 }
  0x52   : > { %1548 = vrot.lane.b32.xlu1 %v1452_v10, %s4149_s22  ;;  %1251 = vrot.lane.b32.xlu0 %v1212_v13, %s4148_s21  ;;  %v503_v10 = vsel %vm4411_vm14, 0, %v502_v40  ;;  %v556_v13 = vld [vmem:[#allocation2 + $0x48] sm:$0x80]  ;;  %v2004_v40 = vshll.u32 %v4444_v38, 16 }
  0x53   : > { %504 = vst [vmem:[#allocation2 + $0x48] sm:$0x1] %v503_v10  ;;  %v557_v23 = vsel %vm4424_vm15, 0, %v556_v13  ;;  %v1163_v10 = vor.u32 %v4341_v21, %v1158_v20  ;;  %v4496_v21 = vld [vmem:[%s4215_s19 + $0x58] sm:$0xff]  }
  0x54   : > { %558 = vst [vmem:[#allocation2 + $0x48] sm:$0x80] %v557_v23 }
  0x56   : > { %1550 = vrot.lane.b32.xlu1 %v1459_v19, %s4149_s22  ;;  %1564 = vrot.lane.b32.xlu0 %v1508_v26, %s4149_s22  ;;  %v732_v19 = vshrl.u32 %v4391_v49, 16  ;;  %v499_v26 = vld [vmem:[#allocation2 + $0x40] sm:$0x1]  ;;  %v1471_v49 = vshll.u32 %v4387_v47, 16 }
  0x57   : > { %v500_v28 = vsel %vm4411_vm14, 0, %v499_v26  ;;  %v481_v61 = vld [vmem:[#allocation2 + $0x10] sm:$0x1]  ;;  %v2000_v26 = vor.u32 %v4379_v44, %v1995_v22  ;;  %v4505_v22 = vld [vmem:[%s4215_s19] sm:$0xff]   ;;  %v352_v44 = vld [vmem:[#allocation2 + $0x50] sm:$0x80] }
  0x58   : > { %501 = vst [vmem:[#allocation2 + $0x40] sm:$0x1] %v500_v28  ;;  %v734_v39 = vrot.slane %v732_v19, 7  ;;  %v4486_v19 = vld [vmem:[%s4215_s19 + $0x8] sm:$0xff]   ;;  %v353_v34 = vsel %vm4203_vm5, 0, %v352_v44 }
  0x59   : > { %354 = vst [vmem:[#allocation2 + $0x50] sm:$0x80] %v353_v34  ;;  %v693_v18 = vshll.u32 %v4486_v19, 16  ;;  %v2304_v34 = vshrl.u32 %v4551_v1, 16 }
  0x5a   : > { %1758 = vrot.lane.b32.xlu1 %v4017_v31, %s4150_s23  ;;  %1566 = vrot.lane.b32.xlu0 %v1515_v43, %s4149_s22  ;;  %v270_v31 = vld [vmem:[#allocation2 + $0x8] sm:$0x1]  ;;  %v1944_v43 = vor.u32 %v4331_v15, %v1939_v8  ;;  %v737_v8 = vor.u32 %v735_v41, %v734_v39  ;;  %v429_v15 = vsel %vm4357_vm12, 0, %v428_v60  ;;  %v690_v39 = vshrl.u32 %v4486_v19, 16 }
  0x5b   : > { %v271_v35 = vsel %vm4194_vm2, 0, %v270_v31  ;;  %v830_v2 = vld [vmem:[#allocation2 + $0x48] sm:$0xff]  ;;  %430 = vst [vmem:[#allocation2 + $0x10] sm:$0x80] %v429_v15  ;;  %v1219_v41 = vor.u32 %v4394_v51, %v1214_v48  ;;  %v2011_v48 = vshll.u32 %v4496_v21, 16  ;;  %v1953_v51 = vshrl.u32 %v4516_v36, 16 }
  0x5c   : > { %272 = vst [vmem:[#allocation2 + $0x8] sm:$0x1] %v271_v35  ;;  %v425_v31 = vld [vmem:[#allocation2 + $0x8] sm:$0x80]  ;;  %v1170_v35 = vor.u32 %v4381_v45, %v1165_v32  ;;  %v4527_v32 = vrot.slane %v1948_v63, 1  ;;  %v2009_v45 = vshrl.u32 %v4496_v21, 16 }
  0x5d   : > { %v692_v15 = vrot.slane %v690_v39, 7  ;;  %v686_v19 = vshll.u32 %v4505_v22, 16 }
  0x5e   : > { %2043 = vrot.lane.b32.xlu1 %v1937_v57, %s4151_s24  ;;  %1774 = vrot.lane.b32.xlu0 %v4020_v50, %s4150_s23  ;;  %v4457_v50 = vrot.slane %v1524_v62, 7  ;;  %v744_v57 = vor.u32 %v742_v25, %v741_v27  ;;  %v482_v62 = vsel %vm4411_vm14, 0, %v481_v61  ;;  %v297_v25 = vld [vmem:[#allocation2 + $0x50] sm:$0x1]  ;;  %v405_v61 = vld [vmem:[#allocation2 + $0x58] sm:$0x1] }
  0x5f   : > { %483 = vst [vmem:[#allocation2 + $0x10] sm:$0x1] %v482_v62  ;;  %v827_v20 = vld [vmem:[#allocation2 + $0x40] sm:$0xff]  ;;  %v298_v28 = vsel %vm4194_vm2, 0, %v297_v25  ;;  %v406_v52 = vsel %vm4347_vm11, 0, %v405_v61  ;;  %v1466_v62 = vor.u32 %v1464_v56, %v4450_v14  ;;  %v746_v61 = vshrl.u32 %v4576_v46, 16 }
  0x60   : > { %v831_v13 = vsel %vm4469_vm0, %v744_v57, %v830_v2  ;;  %v828_v30 = vsel %vm4469_vm0, %v737_v8, %v827_v20  ;;  %299 = vst [vmem:[#allocation2 + $0x50] sm:$0x1] %v298_v28  ;;  %v683_v57 = vshrl.u32 %v4505_v22, 16  ;;  %v1955_v8 = vshll.u32 %v4516_v36, 16  ;;  %407 = vst [vmem:[#allocation2 + $0x58] sm:$0x1] %v406_v52 }
  0x61   : > { %832 = vst [vmem:[#allocation2 + $0x48] sm:$0xff] %v831_v13  ;;  %829 = vst [vmem:[#allocation2 + $0x40] sm:$0xff] %v828_v30  ;;  %v1529_v63 = vor.u32 %v1527_v42, %v4457_v50  ;;  %v695_v20 = vor.u32 %v693_v18, %v692_v15  ;;  %v331_v30 = vld [vmem:[#allocation2 + $0x18] sm:$0x80]  ;;  %v4033_v50 = vld [vmem:[%s4215_s19 + $0x60] sm:$0xff]   ;;  %v4582_v22 = vrot.slane %v2011_v48, 1 }
  0x62   : > { %1760 = vrot.lane.b32.xlu1 %v4021_v7, %s4150_s23  ;;  %2059 = vrot.lane.b32.xlu0 %v1993_v33, %s4151_s24  ;;  %v355_v7 = vld [vmem:[#allocation2 + $0x58] sm:$0x80]  ;;  %v426_v33 = vsel %vm4357_vm12, 0, %v425_v31  ;;  %v685_v13 = vrot.slane %v683_v57, 7  ;;  %v332_v42 = vsel %vm4203_vm5, 0, %v331_v30  ;;  %v4034_v31 = vld [vmem:[%s4215_s19 + $0x20] sm:$0xff]  }
  0x63   : > { %v356_v23 = vsel %vm4203_vm5, 0, %v355_v7  ;;  %v375_v27 = vld [vmem:[#allocation2 + $0x8] sm:$0x1]  ;;  %427 = vst [vmem:[#allocation2 + $0x8] sm:$0x80] %v426_v33  ;;  %v4584_v44 = vrot.slane %v1955_v8, 1 }
  0x64   : > { %357 = vst [vmem:[#allocation2 + $0x58] sm:$0x80] %v356_v23  ;;  %v376_v9 = vsel %vm4347_vm11, 0, %v375_v27  ;;  %v276_v7 = vld [vmem:[#allocation2 + $0x18] sm:$0x1]  ;;  %v4604_v15 = vld [vmem:[%s4215_s19 + $0x50] sm:$0xff]  }
  0x65   : > { %377 = vst [vmem:[#allocation2 + $0x8] sm:$0x1] %v376_v9  ;;  %v277_v37 = vsel %vm4194_vm2, 0, %v276_v7  ;;  %v1473_v9 = vor.u32 %v1471_v49, %v4461_v59  ;;  %333 = vst [vmem:[#allocation2 + $0x18] sm:$0x80] %v332_v42  ;;  %v2307_v49 = vshll.u32 %v4551_v1, 16 }
  0x66   : > { %2045 = vrot.lane.b32.xlu1 %v1944_v43, %s4151_s24  ;;  %1776 = vrot.lane.b32.xlu0 %v4024_v5, %s4150_s23  ;;  %v4524_v5 = vrot.slane %v2004_v40, 1  ;;  %v535_v43 = vld [vmem:[#allocation2 + $0x10] sm:$0x80]  ;;  %278 = vst [vmem:[#allocation2 + $0x18] sm:$0x1] %v277_v37  ;;  %v4592_v59 = vld [vmem:[%s4215_s19 + $0x8] sm:$0xff]  }
  0x67   : > { %v536_v60 = vsel %vm4424_vm15, 0, %v535_v43  ;;  %v4539_v40 = vld [vmem:[%s4215_s19 + $0x50] sm:$0xff]   ;;  %v2248_v54 = vshrl.u32 %v4592_v59, 16  ;;  %v748_v37 = vrot.slane %v746_v61, 7  ;;  %v2311_v30 = vshrl.u32 %v4604_v15, 16 }
  0x68   : > { %537 = vst [vmem:[#allocation2 + $0x10] sm:$0x80] %v536_v60  ;;  %v402_v3 = vld [vmem:[#allocation2 + $0x50] sm:$0x1]  ;;  %v753_v25 = vshrl.u32 %v4539_v40, 16  ;;  %v756_v39 = vshll.u32 %v4539_v40, 16 }
  0x69   : > { %v403_v23 = vsel %vm4347_vm11, 0, %v402_v3  ;;  %v4607_v18 = vld [vmem:[%s4215_s19 + $0x10] sm:$0xff]   ;;  %v361_v1 = vld [vmem:[#allocation2 + $0x68] sm:$0x80] }
  0x6a   : > { %1237 = vrot.lane.b32.xlu1 %v1163_v10, %s4148_s21  ;;  %2061 = vrot.lane.b32.xlu0 %v2000_v26, %s4151_s24  ;;  %v532_v14 = vld [vmem:[#allocation2 + $0x8] sm:$0x80]  ;;  %404 = vst [vmem:[#allocation2 + $0x50] sm:$0x1] %v403_v23  ;;  %v452_v26 = vld [vmem:[#allocation2 + $0x50] sm:$0x80] }
  0x6b   : > { %v455_v58 = vld [vmem:[#allocation2 + $0x58] sm:$0x80]  ;;  %v533_v27 = vsel %vm4424_vm15, 0, %v532_v14  ;;  %v453_v28 = vsel %vm4357_vm12, 0, %v452_v26  ;;  %v4037_v23 = vld [vmem:[%s4215_s19 + $0x68] sm:$0xff]  }
  0x6c   : > { %v456_v2 = vsel %vm4357_vm12, 0, %v455_v58  ;;  %v478_v10 = vld [vmem:[#allocation2 + $0x8] sm:$0x1]  ;;  %534 = vst [vmem:[#allocation2 + $0x8] sm:$0x80] %v533_v27 }
  0x6d   : > { %457 = vst [vmem:[#allocation2 + $0x58] sm:$0x80] %v456_v2  ;;  %v479_v56 = vsel %vm4411_vm14, 0, %v478_v10  ;;  %454 = vst [vmem:[#allocation2 + $0x50] sm:$0x80] %v453_v28 }
  0x6e   : > { %1239 = vrot.lane.b32.xlu1 %v1170_v35, %s4148_s21  ;;  %1253 = vrot.lane.b32.xlu0 %v1219_v41, %s4148_s21  ;;  %480 = vst [vmem:[#allocation2 + $0x8] sm:$0x1] %v479_v56  ;;  %v508_v35 = vld [vmem:[#allocation2 + $0x58] sm:$0x1]  ;;  %v688_v41 = vor.u32 %v686_v19, %v685_v13  ;;  %v303_v58 = vld [vmem:[#allocation2 + $0x60] sm:$0x1]  ;;  %v1951_v13 = vor.u32 %v4527_v32, %v1946_v12 }
  0x6f   : > { %v809_v33 = vld [vmem:[#allocation2 + $0x10] sm:$0xff]  ;;  %v509_v43 = vsel %vm4411_vm14, 0, %v508_v35  ;;  %v381_v8 = vld [vmem:[#allocation2 + $0x18] sm:$0x1]  ;;  %v304_v7 = vsel %vm4194_vm2, 0, %v303_v58  ;;  %v749_v12 = vshll.u32 %v4576_v46, 16 }
  0x70   : > { %v810_v47 = vsel %vm4469_vm0, %v695_v20, %v809_v33  ;;  %510 = vst [vmem:[#allocation2 + $0x58] sm:$0x1] %v509_v43  ;;  %v382_v52 = vsel %vm4347_vm11, 0, %v381_v8  ;;  %v358_v10 = vld [vmem:[#allocation2 + $0x60] sm:$0x80]  ;;  %v4038_v56 = vld [vmem:[%s4215_s19 + $0x28] sm:$0xff]  }
  0x71   : > { %811 = vst [vmem:[#allocation2 + $0x10] sm:$0xff] %v810_v47  ;;  %v505_v60 = vld [vmem:[#allocation2 + $0x50] sm:$0x1]  ;;  %383 = vst [vmem:[#allocation2 + $0x18] sm:$0x1] %v382_v52  ;;  %v359_v19 = vsel %vm4203_vm5, 0, %v358_v10 }
  0x72   : > { %1568 = vrot.lane.b32.xlu1 %v1522_v16, %s4149_s22  ;;  %1552 = vrot.lane.b32.xlu0 %v1466_v62, %s4149_s22  ;;  %v755_v16 = vrot.slane %v753_v25, 7  ;;  %v506_v40 = vsel %vm4411_vm14, 0, %v505_v60  ;;  %v2007_v62 = vor.u32 %v4524_v5, %v2002_v53  ;;  %v431_v5 = vld [vmem:[#allocation2 + $0x18] sm:$0x80]  ;;  %305 = vst [vmem:[#allocation2 + $0x60] sm:$0x1] %v304_v7 }
  0x73   : > { %507 = vst [vmem:[#allocation2 + $0x50] sm:$0x1] %v506_v40  ;;  %v432_v32 = vsel %vm4357_vm12, 0, %v431_v5  ;;  %360 = vst [vmem:[#allocation2 + $0x60] sm:$0x80] %v359_v19  ;;  %v4635_v20 = vld [vmem:[%s4215_s19 + $0x10] sm:$0xff]  }
  0x74   : > { %v562_v57 = vld [vmem:[#allocation2 + $0x58] sm:$0x80]  ;;  %v559_v3 = vld [vmem:[#allocation2 + $0x50] sm:$0x80]  ;;  %v758_v14 = vor.u32 %v756_v39, %v755_v16  ;;  %433 = vst [vmem:[#allocation2 + $0x18] sm:$0x80] %v432_v32  ;;  %v2014_v39 = vor.u32 %v4582_v22, %v2009_v45 }
  0x75   : > { %v563_v48 = vsel %vm4424_vm15, 0, %v562_v57  ;;  %v806_v2 = vld [vmem:[#allocation2 + $0x8] sm:$0xff]  ;;  %v560_v53 = vsel %vm4424_vm15, 0, %v559_v3  ;;  %v279_v25 = vld [vmem:[#allocation2 + $0x20] sm:$0x1]  ;;  %v2251_v46 = vshll.u32 %v4592_v59, 16  ;;  %v1958_v57 = vor.u32 %v4584_v44, %v1953_v51 }
  0x76   : > { %1570 = vrot.lane.b32.xlu1 %v1529_v63, %s4149_s22  ;;  %1554 = vrot.lane.b32.xlu0 %v1473_v9, %s4149_s22  ;;  %564 = vst [vmem:[#allocation2 + $0x58] sm:$0x80] %v563_v48  ;;  %v807_v38 = vsel %vm4469_vm0, %v688_v41, %v806_v2  ;;  %561 = vst [vmem:[#allocation2 + $0x50] sm:$0x80] %v560_v53  ;;  %v334_v26 = vld [vmem:[#allocation2 + $0x20] sm:$0x80] }
  0x77   : > { %808 = vst [vmem:[#allocation2 + $0x8] sm:$0xff] %v807_v38  ;;  %v2306_v63 = vrot.slane %v2304_v34, 7  ;;  %v280_v27 = vsel %vm4194_vm2, 0, %v279_v25  ;;  %v335_v28 = vsel %vm4203_vm5, 0, %v334_v26  ;;  %v2255_v9 = vshrl.u32 %v4607_v18, 16  ;;  %v4678_v3 = vld [vmem:[%s4215_s19 + $0x18] sm:$0xff]  }
  0x78   : > { %281 = vst [vmem:[#allocation2 + $0x20] sm:$0x1] %v280_v27  ;;  %336 = vst [vmem:[#allocation2 + $0x20] sm:$0x80] %v335_v28  ;;  %v2314_v34 = vshll.u32 %v4604_v15, 16  ;;  %v2258_v47 = vshll.u32 %v4607_v18, 16 }
  0x79   : > { %v484_v35 = vld [vmem:[#allocation2 + $0x18] sm:$0x1]  ;;  %v697_v41 = vshrl.u32 %v4635_v20, 16  ;;  %v408_v43 = vld [vmem:[#allocation2 + $0x60] sm:$0x1]  ;;  %v2313_v48 = vrot.slane %v2311_v30, 7  ;;  %v2309_v52 = vor.u32 %v2307_v49, %v2306_v63 }
  0x7a   : > { %1778 = vrot.lane.b32.xlu1 %v4033_v50, %s4150_s23  ;;  %1762 = vrot.lane.b32.xlu0 %v4034_v31, %s4150_s23  ;;  %v751_v50 = vor.u32 %v749_v12, %v748_v37  ;;  %v2250_v31 = vrot.slane %v2248_v54, 7  ;;  %v485_v59 = vsel %vm4411_vm14, 0, %v484_v35  ;;  %v2257_v60 = vrot.slane %v2255_v9, 7  ;;  %v458_v45 = vld [vmem:[#allocation2 + $0x60] sm:$0x80]  ;;  %v4671_v15 = vld [vmem:[%s4215_s19 + $0x58] sm:$0xff]  }
  0x7b   : > { %486 = vst [vmem:[#allocation2 + $0x18] sm:$0x1] %v485_v59  ;;  %v409_v21 = vsel %vm4347_vm11, 0, %v408_v43  ;;  %v538_v8 = vld [vmem:[#allocation2 + $0x18] sm:$0x80]  ;;  %v700_v40 = vshll.u32 %v4635_v20, 16  ;;  %v2316_v32 = vor.u32 %v2314_v34, %v2313_v48 }
  0x7c   : > { %410 = vst [vmem:[#allocation2 + $0x60] sm:$0x1] %v409_v21  ;;  %v459_v36 = vsel %vm4357_vm12, 0, %v458_v45  ;;  %v539_v44 = vsel %vm4424_vm15, 0, %v538_v8  ;;  %v699_v58 = vrot.slane %v697_v41, 7  ;;  %v2253_v7 = vor.u32 %v2251_v46, %v2250_v31  ;;  %v4686_v49 = vld [vmem:[%s4215_s19 + $0x70] sm:$0xff]  }
  0x7d   : > { %v836_v42 = vld [vmem:[#allocation2 + $0x58] sm:$0xff]  ;;  %v833_v16 = vld [vmem:[#allocation2 + $0x50] sm:$0xff]  ;;  %460 = vst [vmem:[#allocation2 + $0x60] sm:$0x80] %v459_v36  ;;  %540 = vst [vmem:[#allocation2 + $0x18] sm:$0x80] %v539_v44  ;;  %v2260_v26 = vor.u32 %v2258_v47, %v2257_v60 }
  0x7e   : > { %2063 = vrot.lane.b32.xlu1 %v2007_v62, %s4151_s24  ;;  %2047 = vrot.lane.b32.xlu0 %v1951_v13, %s4151_s24  ;;  %v837_v33 = vsel %vm4469_vm0, %v758_v14, %v836_v42  ;;  %v834_v61 = vsel %vm4469_vm0, %v751_v50, %v833_v16  ;;  %v306_v38 = vld [vmem:[#allocation2 + $0x68] sm:$0x1]  ;;  %v4689_v5 = vld [vmem:[%s4215_s19 + $0x30] sm:$0xff]   ;;  %v337_v12 = vld [vmem:[#allocation2 + $0x28] sm:$0x80]  ;;  %v760_v14 = vshrl.u32 %v4671_v15, 16 }
  0x7f   : > { %838 = vst [vmem:[#allocation2 + $0x58] sm:$0xff] %v837_v33  ;;  %835 = vst [vmem:[#allocation2 + $0x50] sm:$0xff] %v834_v61  ;;  %v384_v62 = vld [vmem:[#allocation2 + $0x20] sm:$0x1]  ;;  %v434_v2 = vld [vmem:[#allocation2 + $0x20] sm:$0x80] }
  0x80   : > { %v385_v10 = vsel %vm4347_vm11, 0, %v384_v62  ;;  %v435_v13 = vsel %vm4357_vm12, 0, %v434_v2  ;;  %v307_v19 = vsel %vm4194_vm2, 0, %v306_v38  ;;  %v282_v37 = vld [vmem:[#allocation2 + $0x28] sm:$0x1]  ;;  %v704_v20 = vshrl.u32 %v4678_v3, 16 }
  0x81   : > { %386 = vst [vmem:[#allocation2 + $0x20] sm:$0x1] %v385_v10  ;;  %436 = vst [vmem:[#allocation2 + $0x20] sm:$0x80] %v435_v13  ;;  %v283_v25 = vsel %vm4194_vm2, 0, %v282_v37  ;;  %v338_v27 = vsel %vm4203_vm5, 0, %v337_v12 }
  0x82   : > { %1780 = vrot.lane.b32.xlu1 %v4037_v23, %s4150_s23  ;;  %1764 = vrot.lane.b32.xlu0 %v4038_v56, %s4150_s23  ;;  %v362_v23 = vsel %vm4203_vm5, 0, %v361_v1  ;;  %308 = vst [vmem:[#allocation2 + $0x68] sm:$0x1] %v307_v19  ;;  %v702_v56 = vor.u32 %v700_v40, %v699_v58  ;;  %284 = vst [vmem:[#allocation2 + $0x28] sm:$0x1] %v283_v25  ;;  %v4052_v30 = vld [vmem:[%s4215_s19 + $0x48] sm:$0xff]  }
  0x83   : > { %363 = vst [vmem:[#allocation2 + $0x68] sm:$0x80] %v362_v23  ;;  %v511_v63 = vld [vmem:[#allocation2 + $0x60] sm:$0x1]  ;;  %v1531_v42 = vshrl.u32 %v4686_v49, 16  ;;  %v4053_v31 = vld [vmem:[%s4215_s19 + $0x8] sm:$0xff]  }
  0x84   : > { %v973_v22 = vpop.permute.xlu1 %972  ;;  %v971_v51 = vpop.permute.xlu0 %970  ;;  %v512_v9 = vsel %vm4411_vm14, 0, %v511_v63  ;;  %v565_v46 = vld [vmem:[#allocation2 + $0x60] sm:$0x80]  ;;  %339 = vst [vmem:[#allocation2 + $0x28] sm:$0x80] %v338_v27  ;;  %v812_v50 = vld [vmem:[#allocation2 + $0x18] sm:$0xff] }
  0x85   : > { %1010 = vst.msk [vmem:[#allocation2 + $0x48] sm:$0xff] %vm315_vm1, %v973_v22  ;;  %1009 = vst.msk [vmem:[#allocation2 + $0x40] sm:$0xff] %vm315_vm1, %v971_v51  ;;  %v566_v33 = vsel %vm4424_vm15, 0, %v565_v46  ;;  %v763_v34 = vshll.u32 %v4671_v15, 16  ;;  %v1475_v47 = vshrl.u32 %v4689_v5, 16  ;;  %v813_v35 = vsel %vm4469_vm0, %v702_v56, %v812_v50  ;;  %v4722_v59 = vld [vmem:[%s4215_s19 + $0x38] sm:$0xff]  }
  0x86   : > { %2065 = vrot.lane.b32.xlu1 %v2014_v39, %s4151_s24  ;;  %2049 = vrot.lane.b32.xlu0 %v1958_v57, %s4151_s24  ;;  %513 = vst [vmem:[#allocation2 + $0x60] sm:$0x1] %v512_v9  ;;  %567 = vst [vmem:[#allocation2 + $0x60] sm:$0x80] %v566_v33  ;;  %v762_v39 = vrot.slane %v760_v14, 7  ;;  %v706_v57 = vrot.slane %v704_v20, 7 }
  0x87   : > { %814 = vst [vmem:[#allocation2 + $0x18] sm:$0xff] %v813_v35  ;;  %v707_v16 = vshll.u32 %v4678_v3, 16  ;;  %v4054_v60 = vld [vmem:[%s4215_s19 + $0x50] sm:$0xff]   ;;  %v1533_v22 = vrot.slane %v1531_v42, 7  ;;  %v1534_v61 = vshll.u32 %v4686_v49, 16  ;;  %v1477_v51 = vrot.slane %v1475_v47, 7 }
  0x88   : > { %v959_v53 = vpop.permute.xlu1 %958  ;;  %v957_v54 = vpop.permute.xlu0 %956  ;;  %v487_v41 = vld [vmem:[#allocation2 + $0x20] sm:$0x1]  ;;  %v541_v43 = vld [vmem:[#allocation2 + $0x20] sm:$0x80]  ;;  %v4055_v36 = vld [vmem:[%s4215_s19 + $0x10] sm:$0xff]   ;;  %v1478_v44 = vshll.u32 %v4689_v5, 16  ;;  %v765_v62 = vor.u32 %v763_v34, %v762_v39 }
  0x89   : > { %1003 = vst.msk [vmem:[#allocation2 + $0x10] sm:$0xff] %vm315_vm1, %v959_v53  ;;  %1002 = vst.msk [vmem:[#allocation2 + $0x8] sm:$0xff] %vm315_vm1, %v957_v54  ;;  %v488_v21 = vsel %vm4411_vm14, 0, %v487_v41  ;;  %v542_v45 = vsel %vm4424_vm15, 0, %v541_v43  ;;  %v411_v8 = vld [vmem:[#allocation2 + $0x68] sm:$0x1]  ;;  %v709_v23 = vor.u32 %v707_v16, %v706_v57  ;;  %v1536_v56 = vor.u32 %v1534_v61, %v1533_v22 }
  0x8a   : > { %2368 = vrot.lane.b32.xlu1 %v2309_v52, %s4152_s25  ;;  %2352 = vrot.lane.b32.xlu0 %v2253_v7, %s4152_s25  ;;  %489 = vst [vmem:[#allocation2 + $0x20] sm:$0x1] %v488_v21  ;;  %543 = vst [vmem:[#allocation2 + $0x20] sm:$0x80] %v542_v45  ;;  %v412_v15 = vsel %vm4347_vm11, 0, %v411_v8  ;;  %v4739_v58 = vld [vmem:[%s4215_s19 + $0x20] sm:$0xff]   ;;  %v1480_v25 = vor.u32 %v1478_v44, %v1477_v51 }
  0x8b   : > { %v461_v52 = vld [vmem:[#allocation2 + $0x68] sm:$0x80]  ;;  %v1482_v2 = vshrl.u32 %v4722_v59, 16  ;;  %413 = vst [vmem:[#allocation2 + $0x68] sm:$0x1] %v412_v15  ;;  %v4748_v10 = vld [vmem:[%s4215_s19 + $0x60] sm:$0xff]  }
  0x8c   : > { %v977_v28 = vpop.permute.xlu1 %976  ;;  %v975_v18 = vpop.permute.xlu0 %974  ;;  %v462_v3 = vsel %vm4357_vm12, 0, %v461_v52  ;;  %v387_v7 = vld [vmem:[#allocation2 + $0x28] sm:$0x1]  ;;  %v437_v38 = vld [vmem:[#allocation2 + $0x28] sm:$0x80]  ;;  %v4757_v49 = vld [vmem:[%s4215_s19 + $0x20] sm:$0xff]  }
  0x8d   : > { %1012 = vst.msk [vmem:[#allocation2 + $0x58] sm:$0xff] %vm315_vm1, %v977_v28  ;;  %1011 = vst.msk [vmem:[#allocation2 + $0x50] sm:$0xff] %vm315_vm1, %v975_v18  ;;  %v388_v13 = vsel %vm4347_vm11, 0, %v387_v7  ;;  %v438_v53 = vsel %vm4357_vm12, 0, %v437_v38  ;;  %v839_v19 = vld [vmem:[#allocation2 + $0x60] sm:$0xff]  ;;  %v1485_v54 = vshll.u32 %v4722_v59, 16 }
  0x8e   : > { %2370 = vrot.lane.b32.xlu1 %v2316_v32, %s4152_s25  ;;  %2354 = vrot.lane.b32.xlu0 %v2260_v26, %s4152_s25  ;;  %463 = vst [vmem:[#allocation2 + $0x68] sm:$0x80] %v462_v3  ;;  %389 = vst [vmem:[#allocation2 + $0x28] sm:$0x1] %v388_v13  ;;  %v1962_v37 = vshll.u32 %v4739_v58, 16  ;;  %v4764_v12 = vld [vmem:[%s4215_s19 + $0x60] sm:$0xff]   ;;  %v840_v32 = vsel %vm4469_vm0, %v765_v62, %v839_v19 }
  0x8f   : > { %439 = vst [vmem:[#allocation2 + $0x28] sm:$0x80] %v438_v53  ;;  %v267_v14 = vld [vmem:[#allocation2] sm:$0x1]  ;;  %841 = vst [vmem:[#allocation2 + $0x60] sm:$0xff] %v840_v32  ;;  %v1484_v26 = vrot.slane %v1482_v2, 7 }
  0x90   : > { %v4726_v48 = vpop.permute.xlu1 %1241  ;;  %v961_v40 = vpop.permute.xlu0 %960  ;;  %v767_v63 = vshrl.u32 %v4748_v10, 16  ;;  %v268_v20 = vsel %vm4194_vm2, 0, %v267_v14  ;;  %v4774_v27 = vld [vmem:[%s4215_s19 + $0x28] sm:$0xff]   ;;  %v4060_v9 = vld [vmem:[%s4215_s19 + $0x30] sm:$0xff]   ;;  %v711_v46 = vshrl.u32 %v4757_v49, 16  ;;  %v1964_v33 = vrot.slane %v1962_v37, 1 }
  0x91   : > { %1004 = vst.msk [vmem:[#allocation2 + $0x18] sm:$0xff] %vm315_vm1, %v961_v40  ;;  %269 = vst [vmem:[#allocation2] sm:$0x1] %v268_v20  ;;  %v2018_v35 = vshll.u32 %v4764_v12, 16  ;;  %v1487_v39 = vor.u32 %v1485_v54, %v1484_v26  ;;  %v1969_v43 = vshll.u32 %v4774_v27, 16  ;;  %v4801_v22 = vld [vmem:[%s4215_s19 + $0x18] sm:$0xff]  }
  0x92   : > { %2565 = vrot.lane.b32.xlu1 %v4052_v30, %s4153_s26  ;;  %2549 = vrot.lane.b32.xlu0 %v4053_v31, %s4153_s26  ;;  %v815_v30 = vld [vmem:[#allocation2 + $0x20] sm:$0xff]  ;;  %v514_v50 = vld [vmem:[#allocation2 + $0x68] sm:$0x1]  ;;  %v1960_v31 = vshrl.u32 %v4739_v58, 16  ;;  %316 = vst.msk [vmem:[#allocation2] sm:$0xff] %vm315_vm1, %v4147_v17  ;;  %v769_v16 = vrot.slane %v767_v63, 7 }
  0x93   : > { %v816_v18 = vsel %vm4469_vm0, %v709_v23, %v815_v30  ;;  %v515_v34 = vsel %vm4411_vm14, 0, %v514_v50  ;;  %318 = vst.msk [vmem:[#allocation2] sm:$0xff] %vm317_vm3, %v4147_v17  ;;  %v714_v40 = vshll.u32 %v4757_v49, 16  ;;  %v713_v51 = vrot.slane %v711_v46, 7  ;;  %v4065_v15 = vld [vmem:[%s4215_s19 + $0x70] sm:$0xff]   ;;  %v4819_v38 = vld [vmem:[%s4215_s19 + $0x20] sm:$0xff]  }
  0x94   : > { %v4752_v1 = vpop.permute.xlu1 %1243  ;;  %v4759_v5 = vpop.permute.xlu0 %1227  ;;  %817 = vst [vmem:[#allocation2 + $0x20] sm:$0xff] %v816_v18  ;;  %516 = vst [vmem:[#allocation2 + $0x68] sm:$0x1] %v515_v34  ;;  %v1965_v44 = vor.u32 %v1964_v33, %v1960_v31  ;;  %v2016_v52 = vshrl.u32 %v4764_v12, 16  ;;  %v1967_v58 = vshrl.u32 %v4774_v27, 16  ;;  %v2020_v62 = vrot.slane %v2018_v35, 1 }
  0x95   : > { %v568_v47 = vld [vmem:[#allocation2 + $0x68] sm:$0x80]  ;;  %v490_v41 = vld [vmem:[#allocation2 + $0x28] sm:$0x1]  ;;  %v1971_v2 = vrot.slane %v1969_v43, 1  ;;  %v2262_v13 = vshrl.u32 %v4801_v22, 16  ;;  %v716_v37 = vor.u32 %v714_v40, %v713_v51 }
  0x96   : > { %2567 = vrot.lane.b32.xlu1 %v4054_v60, %s4153_s26  ;;  %2551 = vrot.lane.b32.xlu0 %v4055_v36, %s4153_s26  ;;  %v569_v59 = vsel %vm4424_vm15, 0, %v568_v47  ;;  %v770_v60 = vshll.u32 %v4748_v10, 16  ;;  %v491_v21 = vsel %vm4411_vm14, 0, %v490_v41  ;;  %v544_v45 = vld [vmem:[#allocation2 + $0x28] sm:$0x80]  ;;  %v4066_v10 = vld [vmem:[%s4215_s19 + $0x70] sm:$0xff]   ;;  %v2021_v14 = vor.u32 %v2020_v62, %v2016_v52 }
  0x97   : > { %570 = vst [vmem:[#allocation2 + $0x68] sm:$0x80] %v569_v59  ;;  %492 = vst [vmem:[#allocation2 + $0x28] sm:$0x1] %v491_v21  ;;  %v545_v8 = vsel %vm4424_vm15, 0, %v544_v45  ;;  %v4809_v36 = vld [vmem:[%s4215_s19 + $0x68] sm:$0xff]   ;;  %v1972_v59 = vor.u32 %v1971_v2, %v1967_v58 }
  0x98   : > { %v979_v28 = vpop.permute.xlu1 %978  ;;  %v963_v42 = vpop.permute.xlu0 %962  ;;  %546 = vst [vmem:[#allocation2 + $0x28] sm:$0x80] %v545_v8  ;;  %v772_v7 = vor.u32 %v770_v60, %v769_v16  ;;  %v2025_v23 = vshll.u32 %v4809_v36, 16  ;;  %v4823_v54 = vld [vmem:[%s4215_s19 + $0x58] sm:$0xff]   ;;  %v4833_v26 = vld [vmem:[%s4215_s19 + $0x60] sm:$0xff]   ;;  %v2023_v33 = vshrl.u32 %v4809_v36, 16 }
  0x99   : > { %1013 = vst.msk [vmem:[#allocation2 + $0x60] sm:$0xff] %vm315_vm1, %v979_v28  ;;  %1005 = vst.msk [vmem:[#allocation2 + $0x20] sm:$0xff] %vm315_vm1, %v963_v42  ;;  %v309_v63 = vld [vmem:[#allocation2 + $0x70] sm:$0x1]  ;;  %v2269_v28 = vshrl.u32 %v4819_v38, 16  ;;  %v1296_v42 = vld [vmem:[#allocation2 + $0x40] sm:$0xff] }
  0x9a   : > { %1572 = vrot.lane.b32.xlu1 %v1536_v56, %s4149_s22  ;;  %1556 = vrot.lane.b32.xlu0 %v1480_v25, %s4149_s22  ;;  %v322_v49 = vld [vmem:[#allocation2] sm:$0x80]  ;;  %v372_v19 = vld [vmem:[#allocation2] sm:$0x1]  ;;  %v2265_v25 = vshll.u32 %v4801_v22, 16  ;;  %v310_v30 = vsel %vm4194_vm2, 0, %v309_v63  ;;  %v1297_v40 = vsel %vm4844_vm7, %v4726_v48, %v1296_v42 }
  0x9b   : > { %v323_v12 = vsel %vm4203_vm5, 0, %v322_v49  ;;  %v373_v32 = vsel %vm4347_vm11, 0, %v372_v19  ;;  %v4069_v31 = vld [vmem:[%s4215_s19 + $0x38] sm:$0xff]   ;;  %v2318_v34 = vshrl.u32 %v4823_v54, 16  ;;  %311 = vst [vmem:[#allocation2 + $0x70] sm:$0x1] %v310_v30 }
  0x9c   : > { %v4795_v57 = vpop.permute.xlu1 %1245  ;;  %v4803_v61 = vpop.permute.xlu0 %1229  ;;  %324 = vst [vmem:[#allocation2] sm:$0x80] %v323_v12  ;;  %374 = vst [vmem:[#allocation2] sm:$0x1] %v373_v32  ;;  %v2264_v41 = vrot.slane %v2262_v13, 7  ;;  %v2027_v43 = vrot.slane %v2025_v23, 1 }
  0x9d   : > { %v285_v16 = vld [vmem:[#allocation2 + $0x30] sm:$0x1]  ;;  %v340_v60 = vld [vmem:[#allocation2 + $0x30] sm:$0x80]  ;;  %v2272_v21 = vshll.u32 %v4819_v38, 16  ;;  %v2325_v45 = vshrl.u32 %v4833_v26, 16 }
  0x9e   : > { %1766 = vrot.lane.b32.xlu1 %v4060_v9, %s4150_s23  ;;  %1558 = vrot.lane.b32.xlu0 %v1487_v39, %s4149_s22  ;;  %v842_v56 = vld [vmem:[#allocation2 + $0x68] sm:$0xff]  ;;  %v364_v9 = vld [vmem:[#allocation2 + $0x70] sm:$0x80]  ;;  %v286_v22 = vsel %vm4194_vm2, 0, %v285_v16  ;;  %v341_v8 = vsel %vm4203_vm5, 0, %v340_v60  ;;  %v2271_v51 = vrot.slane %v2269_v28, 7  ;;  %v2028_v13 = vor.u32 %v2027_v43, %v2023_v33 }
  0x9f   : > { %v843_v20 = vsel %vm4469_vm0, %v772_v7, %v842_v56  ;;  %v818_v18 = vld [vmem:[#allocation2 + $0x28] sm:$0xff]  ;;  %v365_v47 = vsel %vm4203_vm5, 0, %v364_v9  ;;  %287 = vst [vmem:[#allocation2 + $0x30] sm:$0x1] %v286_v22  ;;  %342 = vst [vmem:[#allocation2 + $0x30] sm:$0x80] %v341_v8 }
  0xa0   : > { %v981_v3 = vpop.permute.xlu1 %980  ;;  %v965_v53 = vpop.permute.xlu0 %964  ;;  %844 = vst [vmem:[#allocation2 + $0x68] sm:$0xff] %v843_v20  ;;  %v819_v35 = vsel %vm4469_vm0, %v716_v37, %v818_v18  ;;  %366 = vst [vmem:[#allocation2 + $0x70] sm:$0x80] %v365_v47  ;;  %v2320_v62 = vrot.slane %v2318_v34, 7  ;;  %v4882_v2 = vld [vmem:[%s4215_s19 + $0x8] sm:$0xff]   ;;  %v2327_v49 = vrot.slane %v2325_v45, 7  ;;  %v2274_v28 = vor.u32 %v2272_v21, %v2271_v51 }
  0xa1   : > { %1014 = vst.msk [vmem:[#allocation2 + $0x68] sm:$0xff] %vm315_vm1, %v981_v3  ;;  %820 = vst [vmem:[#allocation2 + $0x28] sm:$0xff] %v819_v35  ;;  %v1275_v48 = vld [vmem:[#allocation2 + $0x8] sm:$0xff]  ;;  %v2328_v19 = vshll.u32 %v4833_v26, 16  ;;  %v2718_v20 = vshll.u32 %v4882_v2, 16  ;;  %v4074_v35 = vld [vmem:[%s4215_s19 + $0x18] sm:$0xff]  }
  0xa2   : > { %2051 = vrot.lane.b32.xlu1 %v1965_v44, %s4151_s24  ;;  %1782 = vrot.lane.b32.xlu0 %v4065_v15, %s4150_s23  ;;  %1006 = vst.msk [vmem:[#allocation2 + $0x28] sm:$0xff] %vm315_vm1, %v965_v53  ;;  %v2321_v44 = vshll.u32 %v4823_v54, 16  ;;  %v1299_v15 = vld [vmem:[#allocation2 + $0x48] sm:$0xff]  ;;  %v414_v32 = vld [vmem:[#allocation2 + $0x70] sm:$0x1]  ;;  %v1276_v56 = vsel %vm4844_vm7, %v4759_v5, %v1275_v48  ;;  %v2716_v16 = vshrl.u32 %v4882_v2, 16 }
  0xa3   : > { %v422_v3 = vld [vmem:[#allocation2] sm:$0x80]  ;;  %v475_v7 = vld [vmem:[#allocation2] sm:$0x1]  ;;  %v4892_v23 = vld [vmem:[%s4215_s19 + $0x68] sm:$0xff]   ;;  %v1300_v37 = vsel %vm4844_vm7, %v4752_v1, %v1299_v15  ;;  %v415_v26 = vsel %vm4347_vm11, 0, %v414_v32  ;;  %v2330_v51 = vor.u32 %v2328_v19, %v2327_v49 }
  0xa4   : > { %v4837_v27 = vpop.permute.xlu1 %1247  ;;  %v4848_v50 = vpop.permute.xlu0 %1231  ;;  %v423_v38 = vsel %vm4357_vm12, 0, %v422_v3  ;;  %v476_v53 = vsel %vm4411_vm14, 0, %v475_v7  ;;  %v4895_v54 = vld [vmem:[%s4215_s19 + $0x28] sm:$0xff]   ;;  %416 = vst [vmem:[#allocation2 + $0x70] sm:$0x1] %v415_v26  ;;  %v2323_v42 = vor.u32 %v2321_v44, %v2320_v62  ;;  %v774_v18 = vshrl.u32 %v4892_v23, 16 }
  0xa5   : > { %424 = vst [vmem:[#allocation2] sm:$0x80] %v423_v38  ;;  %477 = vst [vmem:[#allocation2] sm:$0x1] %v476_v53  ;;  %v4914_v30 = vld [vmem:[%s4215_s19 + $0x48] sm:$0xff]   ;;  %v718_v43 = vshrl.u32 %v4895_v54, 16 }
  0xa6   : > { %984 = vrot.lane.b32.xlu1 %v4066_v10, %s4146_s20  ;;  %2067 = vrot.lane.b32.xlu0 %v2021_v14, %s4151_s24  ;;  %v2267_v10 = vor.u32 %v2265_v25, %v2264_v41  ;;  %v288_v9 = vld [vmem:[#allocation2 + $0x38] sm:$0x1]  ;;  %v440_v33 = vld [vmem:[#allocation2 + $0x30] sm:$0x80]  ;;  %v343_v60 = vld [vmem:[#allocation2 + $0x38] sm:$0x80] }
  0xa7   : > { %v464_v63 = vld [vmem:[#allocation2 + $0x70] sm:$0x80]  ;;  %v289_v34 = vsel %vm4194_vm2, 0, %v288_v9  ;;  %v441_v41 = vsel %vm4357_vm12, 0, %v440_v33  ;;  %v2774_v45 = vshll.u32 %v4914_v30, 16  ;;  %v344_v22 = vsel %vm4203_vm5, 0, %v343_v60 }
  0xa8   : > { %v1561_v36 = vpop.permute.xlu1 %1560  ;;  %v4879_v58 = vpop.permute.xlu0 %1544  ;;  %v465_v5 = vsel %vm4357_vm12, 0, %v464_v63  ;;  %290 = vst [vmem:[#allocation2 + $0x38] sm:$0x1] %v289_v34  ;;  %442 = vst [vmem:[#allocation2 + $0x30] sm:$0x80] %v441_v41  ;;  %v2720_v8 = vrot.slane %v2718_v20, 1 }
  0xa9   : > { %v1619_v52 = vsel %vm4861_vm8, %v1561_v36, %v1297_v40  ;;  %466 = vst [vmem:[#allocation2 + $0x70] sm:$0x80] %v465_v5  ;;  %345 = vst [vmem:[#allocation2 + $0x38] sm:$0x80] %v344_v22  ;;  %v4935_v40 = vld [vmem:[%s4215_s19 + $0x10] sm:$0xff]   ;;  %v777_v44 = vshll.u32 %v4892_v23, 16 }
  0xaa   : > { %1620 = vst [vmem:[#allocation2 + $0x40] sm:$0xff] %v1619_v52  ;;  %2053 = vrot.lane.b32.xlu1 %v1972_v59, %s4151_s24  ;;  %1768 = vrot.lane.b32.xlu0 %v4069_v31, %s4150_s23  ;;  %v390_v31 = vld [vmem:[#allocation2 + $0x30] sm:$0x1]  ;;  %v776_v62 = vrot.slane %v774_v18, 7  ;;  %v720_v2 = vrot.slane %v718_v43, 7  ;;  %v721_v48 = vshll.u32 %v4895_v54, 16  ;;  %v2721_v19 = vor.u32 %v2720_v8, %v2716_v16 }
  0xab   : > { %v391_v59 = vsel %vm4347_vm11, 0, %v390_v31  ;;  %v517_v7 = vld [vmem:[#allocation2 + $0x70] sm:$0x1]  ;;  %v2776_v38 = vrot.slane %v2774_v45, 1  ;;  %v2725_v23 = vshll.u32 %v4935_v40, 16  ;;  %v4084_v22 = vld [vmem:[%s4215_s19 + $0x60] sm:$0xff]  }
  0xac   : > { %v1563_v12 = vpop.permute.xlu1 %1562  ;;  %v1547_v25 = vpop.permute.xlu0 %1546  ;;  %392 = vst [vmem:[#allocation2 + $0x30] sm:$0x1] %v391_v59  ;;  %v529_v36 = vld [vmem:[#allocation2] sm:$0x80]  ;;  %v518_v53 = vsel %vm4411_vm14, 0, %v517_v7  ;;  %v4959_v26 = vld [vmem:[%s4215_s19 + $0x50] sm:$0xff]   ;;  %v779_v59 = vor.u32 %v777_v44, %v776_v62 }
  0xad   : > { %v1622_v14 = vsel %vm4861_vm8, %v1563_v12, %v1300_v37  ;;  %v1598_v1 = vsel %vm4861_vm8, %v1547_v25, %v1276_v56  ;;  %v530_v15 = vsel %vm4424_vm15, 0, %v529_v36  ;;  %519 = vst [vmem:[#allocation2 + $0x70] sm:$0x1] %v518_v53  ;;  %v4954_v12 = vld [vmem:[%s4215_s19 + $0x30] sm:$0xff]   ;;  %v2781_v34 = vshll.u32 %v4959_v26, 16 }
  0xae   : > { %1623 = vst [vmem:[#allocation2 + $0x48] sm:$0xff] %v1622_v14  ;;  %2356 = vrot.lane.b32.xlu1 %v2267_v10, %s4152_s25  ;;  %1599 = vst [vmem:[#allocation2 + $0x8] sm:$0xff] %v1598_v1  ;;  %2069 = vrot.lane.b32.xlu0 %v2028_v13, %s4151_s24  ;;  %v4079_v10 = vld [vmem:[%s4215_s19 + $0x58] sm:$0xff]   ;;  %v2772_v13 = vshrl.u32 %v4914_v30, 16  ;;  %v2723_v30 = vshrl.u32 %v4935_v40, 16  ;;  %v1976_v18 = vshll.u32 %v4954_v12, 16  ;;  %v723_v36 = vor.u32 %v721_v48, %v720_v2 }
  0xaf   : > { %531 = vst [vmem:[#allocation2] sm:$0x80] %v530_v15  ;;  %v393_v37 = vld [vmem:[#allocation2 + $0x38] sm:$0x1]  ;;  %v547_v14 = vld [vmem:[#allocation2 + $0x30] sm:$0x80] }
  0xb0   : > { %v1771_v47 = vpop.permute.xlu1 %1770  ;;  %v4928_v21 = vpop.permute.xlu0 %1754  ;;  %v571_v49 = vld [vmem:[#allocation2 + $0x70] sm:$0x80]  ;;  %v394_v25 = vsel %vm4347_vm11, 0, %v393_v37  ;;  %v548_v20 = vsel %vm4424_vm15, 0, %v547_v14  ;;  %v443_v5 = vld [vmem:[#allocation2 + $0x38] sm:$0x80]  ;;  %v2777_v33 = vor.u32 %v2776_v38, %v2772_v13 }
  0xb1   : > { %1811 = vst.msk [vmem:[#allocation2 + $0x40] sm:$0xff] %vm1802_vm9, %v1771_v47  ;;  %v572_v54 = vsel %vm4424_vm15, 0, %v571_v49  ;;  %395 = vst [vmem:[#allocation2 + $0x38] sm:$0x1] %v394_v25  ;;  %v444_v9 = vsel %vm4357_vm12, 0, %v443_v5  ;;  %v4974_v31 = vld [vmem:[%s4215_s19 + $0x70] sm:$0xff]  }
  0xb2   : > { %2358 = vrot.lane.b32.xlu1 %v2274_v28, %s4152_s25  ;;  %2372 = vrot.lane.b32.xlu0 %v2323_v42, %s4152_s25  ;;  %573 = vst [vmem:[#allocation2 + $0x70] sm:$0x80] %v572_v54  ;;  %v4080_v28 = vld [vmem:[%s4215_s19 + $0x20] sm:$0xff]   ;;  %549 = vst [vmem:[#allocation2 + $0x30] sm:$0x80] %v548_v20  ;;  %v2727_v42 = vrot.slane %v2725_v23, 1 }
  0xb3   : > { %v493_v56 = vld [vmem:[#allocation2 + $0x30] sm:$0x1]  ;;  %445 = vst [vmem:[#allocation2 + $0x38] sm:$0x80] %v444_v9  ;;  %v1974_v16 = vshrl.u32 %v4954_v12, 16  ;;  %v2779_v8 = vshrl.u32 %v4959_v26, 16 }
  0xb4   : > { %v1773_v52 = vpop.permute.xlu1 %1772  ;;  %v1757_v3 = vpop.permute.xlu0 %1756  ;;  %v494_v63 = vsel %vm4411_vm14, 0, %v493_v56  ;;  %v4979_v47 = vld [vmem:[%s4215_s19 + $0x70] sm:$0xff]   ;;  %v1223_v40 = vshll.u32 %v4974_v31, 16  ;;  %v1978_v44 = vrot.slane %v1976_v18, 1  ;;  %v4997_v15 = vld [vmem:[%s4215_s19 + $0x28] sm:$0xff]   ;;  %v1221_v13 = vshrl.u32 %v4974_v31, 16 }
  0xb5   : > { %1812 = vst.msk [vmem:[#allocation2 + $0x48] sm:$0xff] %vm1802_vm9, %v1773_v52  ;;  %1804 = vst.msk [vmem:[#allocation2 + $0x8] sm:$0xff] %vm1802_vm9, %v1757_v3  ;;  %v4984_v43 = vld [vmem:[%s4215_s19 + $0x30] sm:$0xff]   ;;  %v2783_v52 = vrot.slane %v2781_v34, 1  ;;  %v2032_v62 = vshll.u32 %v4979_v47, 16  ;;  %v5004_v3 = vld [vmem:[%s4215_s19 + $0x38] sm:$0xff]  }
  0xb6   : > { %2553 = vrot.lane.b32.xlu1 %v4074_v35, %s4153_s26  ;;  %2374 = vrot.lane.b32.xlu0 %v2330_v51, %s4152_s25  ;;  %495 = vst [vmem:[#allocation2 + $0x30] sm:$0x1] %v494_v63  ;;  %v1594_v35 = vld [vmem:[#allocation2] sm:$0xff]  ;;  %v2728_v51 = vor.u32 %v2727_v42, %v2723_v30  ;;  %v2030_v23 = vshrl.u32 %v4979_v47, 16  ;;  %v1979_v12 = vor.u32 %v1978_v44, %v1974_v16  ;;  %v2276_v56 = vshrl.u32 %v4997_v15, 16  ;;  %v4091_v14 = vld [vmem:[%s4215_s19 + $0x30] sm:$0xff]  }
  0xb7   : > { %v1595_v60 = vsel %vm4861_vm8, %v4879_v58, %v1594_v35  ;;  %v2784_v26 = vor.u32 %v2783_v52, %v2779_v8  ;;  %v2034_v63 = vrot.slane %v2032_v62, 1  ;;  %v4092_v20 = vld [vmem:[%s4215_s19 + $0x68] sm:$0xff]   ;;  %v728_v30 = vshll.u32 %v4984_v43, 16  ;;  %v1302_v31 = vld [vmem:[#allocation2 + $0x50] sm:$0xff] }
  0xb8   : > { %v983_v32 = vpop.permute.xlu1 %982  ;;  %v4965_v1 = vpop.permute.xlu0 %966  ;;  %1596 = vst [vmem:[#allocation2] sm:$0xff] %v1595_v60  ;;  %v496_v7 = vld [vmem:[#allocation2 + $0x38] sm:$0x1]  ;;  %v2278_v34 = vrot.slane %v2276_v56, 7  ;;  %v2283_v47 = vshrl.u32 %v4091_v14, 16  ;;  %v2332_v16 = vshrl.u32 %v4092_v20, 16 }
  0xb9   : > { %1803 = vst.msk [vmem:[#allocation2] sm:$0xff] %vm1802_vm9, %v4928_v21  ;;  %v845_v58 = vld [vmem:[#allocation2 + $0x70] sm:$0xff]  ;;  %v497_v53 = vsel %vm4411_vm14, 0, %v496_v7  ;;  %v2035_v35 = vor.u32 %v2034_v63, %v2030_v23  ;;  %v2335_v7 = vshll.u32 %v4092_v20, 16  ;;  %v4099_v20 = vld [vmem:[%s4215_s19 + $0x20] sm:$0xff]   ;;  %vm525_vm3 = vcmask 294144  }
  0xba   : > { %2820 = vrot.lane.b32.xlu1 %v2721_v19, %s4154_s27  ;;  %2569 = vrot.lane.b32.xlu0 %v4079_v10, %s4153_s26  ;;  %v846_v2 = vsel %vm4469_vm0, %v779_v59, %v845_v58  ;;  %v725_v10 = vshrl.u32 %v4984_v43, 16  ;;  %v1278_v21 = vld [vmem:[#allocation2 + $0x10] sm:$0xff]  ;;  %v1225_v19 = vrot.slane %v1223_v40, 1  ;;  %498 = vst [vmem:[#allocation2 + $0x38] sm:$0x1] %v497_v53  ;;  %v1981_v59 = vshrl.u32 %v5004_v3, 16 }
  0xbb   : > { %847 = vst [vmem:[#allocation2 + $0x70] sm:$0xff] %v846_v2  ;;  %v550_v37 = vld [vmem:[#allocation2 + $0x38] sm:$0x80]  ;;  %v4094_v60 = vld [vmem:[%s4215_s19 + $0x70] sm:$0xff]   ;;  %v2285_v62 = vrot.slane %v2283_v47, 7  ;;  %v4102_v47 = vld [vmem:[%s4215_s19 + $0x60] sm:$0xff]  }
  0xbc   : > { %v4981_v41 = vpop.permute.xlu1 %1249  ;;  %v4990_v45 = vpop.permute.xlu0 %1233  ;;  %1015 = vst.msk [vmem:[#allocation2 + $0x70] sm:$0xff] %vm315_vm1, %v983_v32  ;;  %v551_v25 = vsel %vm4424_vm15, 0, %v550_v37  ;;  %v1983_v32 = vshll.u32 %v5004_v3, 16  ;;  %v727_v5 = vrot.slane %v725_v10, 7  ;;  %v2339_v10 = vshrl.u32 %v4094_v60, 16 }
  0xbd   : > { %v821_v38 = vld [vmem:[#allocation2 + $0x30] sm:$0xff]  ;;  %552 = vst [vmem:[#allocation2 + $0x38] sm:$0x80] %v551_v25  ;;  %v2342_v37 = vshll.u32 %v4094_v60, 16  ;;  %v4103_v60 = vld [vmem:[%s4215_s19 + $0x78] sm:$0xff]  }
  0xbe   : > { %2555 = vrot.lane.b32.xlu1 %v4080_v28, %s4153_s26  ;;  %2836 = vrot.lane.b32.xlu0 %v2777_v33, %s4154_s27  ;;  %v822_v54 = vsel %vm4469_vm0, %v723_v36, %v821_v38  ;;  %v1279_v28 = vsel %vm4844_vm7, %v4803_v61, %v1278_v21  ;;  %v1281_v33 = vld [vmem:[#allocation2 + $0x18] sm:$0xff]  ;;  %v1226_v61 = vor.u32 %v1225_v19, %v1221_v13  ;;  %v1985_v43 = vrot.slane %v1983_v32, 1 }
  0xbf   : > { %823 = vst [vmem:[#allocation2 + $0x30] sm:$0xff] %v822_v54  ;;  %v730_v8 = vor.u32 %v728_v30, %v727_v5  ;;  %v1303_v36 = vsel %vm4844_vm7, %v4795_v57, %v1302_v31  ;;  %v2334_v57 = vrot.slane %v2332_v16, 7  ;;  %v1305_v13 = vld [vmem:[#allocation2 + $0x58] sm:$0xff]  ;;  %v2341_v56 = vrot.slane %v2339_v10, 7  ;;  %v4096_v31 = vld [vmem:[%s4215_s19 + $0x68] sm:$0xff]  }
  0xc0   : > { %v5008_v48 = vpop.permute.xlu1 %1235  ;;  %v5014_v49 = vpop.permute.xlu0 %968  ;;  %1007 = vst.msk [vmem:[#allocation2 + $0x30] sm:$0xff] %vm315_vm1, %v4965_v1  ;;  %v2279_v1 = vshll.u32 %v4997_v15, 16  ;;  %v2286_v15 = vshll.u32 %v4091_v14, 16  ;;  %v1986_v2 = vor.u32 %v1985_v43, %v1981_v59  ;;  %v1306_v53 = vsel %vm4844_vm7, %v4837_v27, %v1305_v13  ;;  %v4098_v14 = vld [vmem:[%s4215_s19 + $0x58] sm:$0xff]   ;;  %v4097_v43 = vld [vmem:[%s4215_s19 + $0x30] sm:$0xff]  }
  0xc1   : > { %v2337_v27 = vor.u32 %v2335_v7, %v2334_v57  ;;  %v2788_v5 = vshll.u32 %v4098_v14, 16  ;;  %v2737_v16 = vshrl.u32 %v4099_v20, 16  ;;  %v4106_v57 = vld [vmem:[%s4215_s19 + $0x40] sm:$0xff]  }
  0xc2   : > { %2822 = vrot.lane.b32.xlu1 %v2728_v51, %s4154_s27  ;;  %2571 = vrot.lane.b32.xlu0 %v4084_v22, %s4153_s26  ;;  %v1282_v22 = vsel %vm4844_vm7, %v4848_v50, %v1281_v33  ;;  %v2281_v52 = vor.u32 %v2279_v1, %v2278_v34  ;;  %v4095_v50 = vld [vmem:[%s4215_s19 + $0x18] sm:$0xff]   ;;  %v2288_v54 = vor.u32 %v2286_v15, %v2285_v62  ;;  %v2786_v33 = vshrl.u32 %v4098_v14, 16 }
  0xc3   : > { %v2730_v63 = vshrl.u32 %v4095_v50, 16  ;;  %v4101_v34 = vld [vmem:[%s4215_s19 + $0x38] sm:$0xff]   ;;  %v2790_v1 = vrot.slane %v2788_v5, 1 }
  0xc4   : > { %v1549_v9 = vpop.permute.xlu1 %1548  ;;  %v5036_v18 = vpop.permute.xlu0 %1251  ;;  %v824_v3 = vld [vmem:[#allocation2 + $0x38] sm:$0xff] }
  0xc5   : > { %v1601_v42 = vsel %vm4861_vm8, %v1549_v9, %v1279_v28  ;;  %v825_v21 = vsel %vm4469_vm0, %v730_v8, %v824_v3  ;;  %v2344_v28 = vor.u32 %v2342_v37, %v2341_v56  ;;  %v2290_v8 = vshrl.u32 %v4101_v34, 16  ;;  %v1308_v37 = vld [vmem:[#allocation2 + $0x60] sm:$0xff] }
  0xc6   : > { %1602 = vst [vmem:[#allocation2 + $0x10] sm:$0xff] %v1601_v42  ;;  %2055 = vrot.lane.b32.xlu1 %v1979_v12, %s4151_s24  ;;  %2838 = vrot.lane.b32.xlu0 %v2784_v26, %s4154_s27  ;;  %826 = vst [vmem:[#allocation2 + $0x38] sm:$0xff] %v825_v21  ;;  %v2732_v12 = vshll.u32 %v4095_v50, 16  ;;  %v2293_v3 = vshll.u32 %v4101_v34, 16  ;;  %v1309_v14 = vsel %vm4844_vm7, %v4981_v41, %v1308_v37  ;;  %v5122_v34 = vld [vmem:[%s4215_s19 + $0x68] sm:$0xff]  }
  0xc7   : > { %1008 = vst.msk [vmem:[#allocation2 + $0x38] sm:$0xff] %vm315_vm1, %v5014_v49  ;;  %v4093_v49 = vld [vmem:[%s4215_s19 + $0x28] sm:$0xff]   ;;  %v2292_v50 = vrot.slane %v2290_v8, 7 }
  0xc8   : > { %v1551_v40 = vpop.permute.xlu1 %1550  ;;  %v1565_v44 = vpop.permute.xlu0 %1564  ;;  %v2734_v32 = vrot.slane %v2732_v12, 1 }
  0xc9   : > { %v1604_v51 = vsel %vm4861_vm8, %v1551_v40, %v1282_v22  ;;  %v1625_v58 = vsel %vm4861_vm8, %v1565_v44, %v1303_v36  ;;  %v2791_v40 = vor.u32 %v2790_v1, %v2786_v33  ;;  %v2795_v36 = vshll.u32 %v4102_v47, 16 }
  0xca   : > { %1605 = vst [vmem:[#allocation2 + $0x18] sm:$0xff] %v1604_v51  ;;  %1255 = vrot.lane.b32.xlu1 %v1226_v61, %s4148_s21  ;;  %1626 = vst [vmem:[#allocation2 + $0x50] sm:$0xff] %v1625_v58  ;;  %2071 = vrot.lane.b32.xlu0 %v2035_v35, %s4151_s24  ;;  %v2735_v42 = vor.u32 %v2734_v32, %v2730_v63  ;;  %v2739_v61 = vshll.u32 %v4099_v20, 16  ;;  %v4104_v51 = vld [vmem:[%s4215_s19 + $0x78] sm:$0xff]   ;;  %v4100_v58 = vld [vmem:[%s4215_s19 + $0x70] sm:$0xff]  }
  0xcb   : > { %v2797_v7 = vrot.slane %v2795_v36, 1  ;;  %v2346_v10 = vshrl.u32 %v4104_v51, 16  ;;  %v2349_v56 = vshll.u32 %v4104_v51, 16  ;;  %v1311_v32 = vld [vmem:[#allocation2 + $0x68] sm:$0xff] }
  0xcc   : > { %v1759_v38 = vpop.permute.xlu1 %1758  ;;  %v1567_v19 = vpop.permute.xlu0 %1566  ;;  %v2741_v22 = vrot.slane %v2739_v61, 1  ;;  %v1312_v0 = vsel %vm4844_vm7, %v5036_v18, %v1311_v32  ;;  %v4115_v32 = vld [vmem:[%s4215_s19 + $0x78] sm:$0xff]  }
  0xcd   : > { %1805 = vst.msk [vmem:[#allocation2 + $0x10] sm:$0xff] %vm1802_vm9, %v1759_v38  ;;  %v1628_v23 = vsel %vm4861_vm8, %v1567_v19, %v1306_v53  ;;  %v1541_v53 = vshll.u32 %v4103_v60, 16  ;;  %v2295_v19 = vor.u32 %v2293_v3, %v2292_v50 }
  0xce   : > { %2360 = vrot.lane.b32.xlu1 %v2281_v52, %s4152_s25  ;;  %1629 = vst [vmem:[#allocation2 + $0x58] sm:$0xff] %v1628_v23  ;;  %2057 = vrot.lane.b32.xlu0 %v1986_v2, %s4151_s24  ;;  %v1538_v52 = vshrl.u32 %v4103_v60, 16  ;;  %v2742_v62 = vor.u32 %v2741_v22, %v2737_v16  ;;  %v2793_v2 = vshrl.u32 %v4102_v47, 16  ;;  %v2297_v23 = vshrl.u32 %v4106_v57, 16  ;;  %v4120_v60 = vld [vmem:[%s5557_s1 + $0x8] sm:$0xff]  }
  0xd0   : > { %v5069_v25 = vpop.permute.xlu1 %2043  ;;  %v1775_v26 = vpop.permute.xlu0 %1774  ;;  %v1540_v38 = vrot.slane %v1538_v52, 7  ;;  %v2798_v12 = vor.u32 %v2797_v7, %v2793_v2  ;;  %v2299_v33 = vrot.slane %v2297_v23, 7  ;;  %v2802_v52 = vshll.u32 %v5122_v34, 16  ;;  %v4114_v23 = vld [vmem:[%s4215_s19 + $0x70] sm:$0xff]  }
  0xd1   : > { %1813 = vst.msk [vmem:[#allocation2 + $0x50] sm:$0xff] %vm1802_vm9, %v1775_v26  ;;  %v1284_v26 = vld [vmem:[#allocation2 + $0x20] sm:$0xff]  ;;  %v2800_v7 = vshrl.u32 %v5122_v34, 16  ;;  %v2807_v34 = vshrl.u32 %v4114_v23, 16 }
  0xd2   : > { %2362 = vrot.lane.b32.xlu1 %v2288_v54, %s4152_s25  ;;  %2376 = vrot.lane.b32.xlu0 %v2337_v27, %s4152_s25  ;;  %v5106_v54 = vld [vmem:[%s4215_s19 + $0x28] sm:$0xff]   ;;  %v2348_v27 = vrot.slane %v2346_v10, 7  ;;  %v1285_v63 = vsel %vm4844_vm7, %v4990_v45, %v1284_v26  ;;  %v1543_v5 = vor.u32 %v1541_v53, %v1540_v38  ;;  %v4113_v38 = vld [vmem:[%s4215_s19 + $0x38] sm:$0xff]  }
  0xd3   : > { %v2746_v61 = vshll.u32 %v5106_v54, 16  ;;  %v2744_v36 = vshrl.u32 %v5106_v54, 16 }
  0xd4   : > { %v1761_v30 = vpop.permute.xlu1 %1760  ;;  %v5077_v9 = vpop.permute.xlu0 %2059  ;;  %v2351_v1 = vor.u32 %v2349_v56, %v2348_v27 }
  0xd5   : > { %1806 = vst.msk [vmem:[#allocation2 + $0x18] sm:$0xff] %vm1802_vm9, %v1761_v30  ;;  %v2300_v30 = vshll.u32 %v4106_v57, 16  ;;  %v2748_v51 = vrot.slane %v2746_v61, 1  ;;  %v4108_v57 = vld [vmem:[%s4215_s19 + $0x78] sm:$0xff]   ;;  %v4112_v61 = vld [vmem:[%s4215_s19 + $0x40] sm:$0xff]  }
  0xd6   : > { %2557 = vrot.lane.b32.xlu1 %v4093_v49, %s4153_s26  ;;  %2378 = vrot.lane.b32.xlu0 %v2344_v28, %s4152_s25 }
  0xd7   : > { %v2749_v2 = vor.u32 %v2748_v51, %v2744_v36 }
  0xd8   : > { %v5084_v35 = vpop.permute.xlu1 %2045  ;;  %v1777_v59 = vpop.permute.xlu0 %1776 }
  0xd9   : > { %1814 = vst.msk [vmem:[#allocation2 + $0x58] sm:$0xff] %vm1802_vm9, %v1777_v59  ;;  %v4119_v59 = vld [vmem:[%s5557_s1] sm:$0xff]  }
  0xda   : > { %2824 = vrot.lane.b32.xlu1 %v2735_v42, %s4154_s27  ;;  %2573 = vrot.lane.b32.xlu0 %v4096_v31, %s4153_s26  ;;  %v312_v42 = vld [vmem:[#allocation2 + $0x78] sm:$0x1]  ;;  %v367_v31 = vld [vmem:[#allocation2 + $0x78] sm:$0x80] }
  0xdb   : > { %v313_v45 = vsel %vm4194_vm2, 0, %v312_v42  ;;  %v368_v47 = vsel %vm4203_vm5, 0, %v367_v31  ;;  %3902 = vmatprep.subr.bf16.mxu0 %v4119_v59  ;;  %3940 = vmatprep.subr.bf16.mxu1 %v4119_v59  ;;  %vm2997_vm2 = vcmask 1041408   ;;  %vm471_vm5 = vcmask 228544  }
  0xdc   : > { %v5092_v44 = vpop.permute.xlu1 %1237  ;;  %v5094_v15 = vpop.permute.xlu0 %2061  ;;  %314 = vst [vmem:[#allocation2 + $0x78] sm:$0x1] %v313_v45  ;;  %369 = vst [vmem:[#allocation2 + $0x78] sm:$0x80] %v368_v47  ;;  %3903 = vmatpush3.bf16.msra.mxu0 %v4119_v59  ;;  %3943 = vmatpush3.bf16.msra.mxu1 %v4119_v59  ;;  %v2758_v31 = vshrl.u32 %v4113_v38, 16  ;;  %v4117_v47 = vld [vmem:[%s4215_s19 + $0x40] sm:$0xff]  }
  0xdd   : > { %3904 = vmatprep.subr.bf16.mxu0 %v4120_v60  ;;  %3941 = vmatprep.subr.bf16.mxu1 %v4120_v60  ;;  %vm5199_vm6 = vmand %vm471_vm5, %vm804_vm13 }
  0xde   : > { %2559 = vrot.lane.b32.xlu1 %v4097_v43, %s4153_s26  ;;  %2840 = vrot.lane.b32.xlu0 %v2791_v40, %s4154_s27  ;;  %v1287_v43 = vld [vmem:[#allocation2 + $0x28] sm:$0xff]  ;;  %v4105_v40 = vld [vmem:[%s4215_s19 + $0x38] sm:$0xff]   ;;  %vm5292_vm13 = vmand %vm525_vm3, %vm1273_vm4 }
  0xdf   : > { %v1288_v4 = vsel %vm4844_vm7, %v5008_v48, %v1287_v43  ;;  %v2302_v48 = vor.u32 %v2300_v30, %v2299_v33  ;;  %v2039_v33 = vshll.u32 %v4115_v32, 16  ;;  %v5405_v43 = vld [vmem:[%s5558_s2] ss:$0 sm:$0xff] }
  0xe0   : > { %v5100_v13 = vpop.permute.xlu1 %1239  ;;  %v5102_v21 = vpop.permute.xlu0 %1253  ;;  %3905 = vmatpush3.bf16.msra.mxu0 %v4120_v60  ;;  %3944 = vmatpush3.bf16.msra.mxu1 %v4120_v60 }
  0xe2   : > { %2826 = vrot.lane.b32.xlu1 %v2742_v62, %s4154_s27  ;;  %2575 = vrot.lane.b32.xlu0 %v4100_v58, %s4153_s26  ;;  %v4111_v58 = vld [vmem:[%s4215_s19 + $0x30] sm:$0xff]  }
  0xe3   : > { %v4121_v62 = vld [vmem:[%s5557_s1 + $0x10] ss:$0 sps:$4 sm:$0x33]   ;;  %v2753_v10 = vshll.u32 %v4111_v58, 16  ;;  %v417_v53 = vld [vmem:[#allocation2 + $0x78] sm:$0x1] }
  0xe4   : > { %v1569_v49 = vpop.permute.xlu1 %1568  ;;  %v1553_v28 = vpop.permute.xlu0 %1552  ;;  %v418_v54 = vsel %vm4347_vm11, 0, %v417_v53  ;;  %v467_v37 = vld [vmem:[#allocation2 + $0x78] sm:$0x80]  ;;  %3946 = vmatprep.subr.msk.bf16.mxu0 %vm2997_vm2, %v4121_v62  ;;  %3947 = vmatprep.subr.msk.bf16.mxu1 %vm2997_vm2, %v4121_v62  ;;  %v2751_v26 = vshrl.u32 %v4111_v58, 16  ;;  %vm5190_vm11 = vmand %vm2091_vm10, %vm1273_vm4 }
  0xe5   : > { %v1631_v20 = vsel %vm4861_vm8, %v1569_v49, %v1309_v14  ;;  %v1607_v41 = vsel %vm4861_vm8, %v1553_v28, %v1285_v63  ;;  %419 = vst [vmem:[#allocation2 + $0x78] sm:$0x1] %v418_v54  ;;  %v468_v56 = vsel %vm4357_vm12, 0, %v467_v37  ;;  %v2755_v49 = vrot.slane %v2753_v10, 1  ;;  %v4116_v28 = vld [vmem:[%s4215_s19 + $0x78] sm:$0xff]   ;;  %v2120_v10 = vld [vmem:[#allocation2 + $0x48] sm:$0xff] }
  0xe6   : > { %1632 = vst [vmem:[#allocation2 + $0x60] sm:$0xff] %v1631_v20  ;;  %2364 = vrot.lane.b32.xlu1 %v2295_v19, %s4152_s25  ;;  %1608 = vst [vmem:[#allocation2 + $0x20] sm:$0xff] %v1607_v41  ;;  %2842 = vrot.lane.b32.xlu0 %v2798_v12, %s4154_s27  ;;  %v2804_v19 = vrot.slane %v2802_v52, 1  ;;  %v2999_v12 = vsel %vm2997_vm2, %v4121_v62, 0  ;;  %v2760_v63 = vshll.u32 %v4113_v38, 16  ;;  %v2809_v20 = vshll.u32 %v4114_v23, 16 }
  0xe7   : > { %469 = vst [vmem:[#allocation2 + $0x78] sm:$0x80] %v468_v56  ;;  %3907 = vmatpush3.bf16.msra.mxu0 %v2999_v12  ;;  %3945 = vmatpush3.bf16.msra.mxu1 %v2999_v12  ;;  %v2756_v42 = vor.u32 %v2755_v49, %v2751_v26  ;;  %vm523_vm12 = vcmask 261344   ;;  %v2814_v51 = vshrl.u32 %v4116_v28, 16  ;;  %v2093_v52 = vld [vmem:[#allocation2] sm:$0xff]  ;;  %v2765_v38 = vshrl.u32 %v4117_v47, 16 }
  0xe8   : > { %v1571_v16 = vpop.permute.xlu1 %1570  ;;  %v1555_v8 = vpop.permute.xlu0 %1554  ;;  %472 = vst.msk [vmem:[#allocation2 + $0x78] sm:$0xff] %vm471_vm5, %v4147_v17  ;;  %v2805_v29 = vor.u32 %v2804_v19, %v2800_v7  ;;  %v2762_v41 = vrot.slane %v2760_v63, 1  ;;  %v2811_v45 = vrot.slane %v2809_v20, 1  ;;  %v2094_v6 = vsel %vm5190_vm11, %v5069_v25, %v2093_v52  ;;  %v4118_v7 = vld [vmem:[%s4215_s19 + $0x70] sm:$0xff]   ;;  %v2096_v19 = vld [vmem:[#allocation2 + $0x8] sm:$0xff] }
  0xe9   : > { %v1634_v22 = vsel %vm4861_vm8, %v1571_v16, %v1312_v0  ;;  %v1610_v18 = vsel %vm4861_vm8, %v1555_v8, %v1288_v4  ;;  %v2041_v8 = vrot.slane %v2039_v33, 1  ;;  %v2097_v54 = vsel %vm5190_vm11, %v5084_v35, %v2096_v19 }
  0xea   : > { %1635 = vst [vmem:[#allocation2 + $0x68] sm:$0xff] %v1634_v22  ;;  %1574 = vrot.lane.b32.xlu1 %v1543_v5, %s4149_s22  ;;  %1611 = vst [vmem:[#allocation2 + $0x28] sm:$0xff] %v1610_v18  ;;  %2380 = vrot.lane.b32.xlu0 %v2351_v1, %s4152_s25  ;;  %v2816_v1 = vshll.u32 %v4116_v28, 16  ;;  %v2763_v4 = vor.u32 %v2762_v41, %v2758_v31  ;;  %v2037_v22 = vshrl.u32 %v4115_v32, 16 }
  0xeb   : > { %v2812_v36 = vor.u32 %v2811_v45, %v2807_v34 }
  0xec   : > { %v1779_v50 = vpop.permute.xlu1 %1778  ;;  %v1763_v3 = vpop.permute.xlu0 %1762  ;;  %v2818_v58 = vrot.slane %v2816_v1, 1 }
  0xed   : > { %1815 = vst.msk [vmem:[#allocation2 + $0x60] sm:$0xff] %vm1802_vm9, %v1779_v50  ;;  %1807 = vst.msk [vmem:[#allocation2 + $0x20] sm:$0xff] %vm1802_vm9, %v1763_v3 }
  0xee   : > { %2561 = vrot.lane.b32.xlu1 %v4105_v40, %s4153_s26  ;;  %2366 = vrot.lane.b32.xlu0 %v2302_v48, %s4152_s25  ;;  %v2117_v40 = vld [vmem:[#allocation2 + $0x40] sm:$0xff]  ;;  %v2767_v48 = vshll.u32 %v4117_v47, 16  ;;  %v2819_v25 = vor.u32 %v2818_v58, %v2814_v51 }
  0xef   : > { %v520_v16 = vld [vmem:[#allocation2 + $0x78] sm:$0x1]  ;;  %v2118_v62 = vsel %vm5190_vm11, %v5077_v9, %v2117_v40  ;;  %v2042_v9 = vor.u32 %v2041_v8, %v2037_v22 }
  0xf0   : > { %v5166_v27 = vpop.permute.xlu1 %2063  ;;  %v5170_v14 = vpop.permute.xlu0 %2047  ;;  %v521_v18 = vsel %vm4411_vm14, 0, %v520_v16  ;;  %v2769_v53 = vrot.slane %v2767_v48, 1  ;;  %vm2948_vm14 = vcmask 293888  }
  0xf1   : > { %522 = vst [vmem:[#allocation2 + $0x78] sm:$0x1] %v521_v18 }
  0xf2   : > { %2828 = vrot.lane.b32.xlu1 %v2749_v2, %s4154_s27  ;;  %2577 = vrot.lane.b32.xlu0 %v4108_v57, %s4153_s26  ;;  %524 = vst.msk [vmem:[#allocation2 + $0x78] sm:$0xff] %vm523_vm12, %v4147_v17 }
  0xf3   : > { %526 = vst.msk [vmem:[#allocation2 + $0x78] sm:$0xff] %vm525_vm3, %v4147_v17  ;;  %v2121_v17 = vsel %vm5190_vm11, %v5094_v15, %v2120_v10  ;;  %v2770_v15 = vor.u32 %v2769_v53, %v2765_v38 }
  0xf4   : > { %v1781_v5 = vpop.permute.xlu1 %1780  ;;  %v1765_v30 = vpop.permute.xlu0 %1764 }
  0xf5   : > { %1816 = vst.msk [vmem:[#allocation2 + $0x68] sm:$0xff] %vm1802_vm9, %v1781_v5  ;;  %1808 = vst.msk [vmem:[#allocation2 + $0x28] sm:$0xff] %vm1802_vm9, %v1765_v30  ;;  %v1314_v30 = vld [vmem:[#allocation2 + $0x70] sm:$0xff] }
  0xf6   : > { %1784 = vrot.lane.b32.xlu1 %v4109_v24, %s4150_s23  ;;  %2844 = vrot.lane.b32.xlu0 %v2805_v29, %s4154_s27  ;;  %v781_v24 = vshrl.u32 %v4118_v7, 16  ;;  %v784_v29 = vshll.u32 %v4118_v7, 16  ;;  %v1315_v11 = vsel %vm4844_vm7, %v5102_v21, %v1314_v30  ;;  %v1293_v21 = vld [vmem:[#allocation2 + $0x38] sm:$0xff] }
  0xf7   : > { %v2126_v7 = vld [vmem:[#allocation2 + $0x58] sm:$0xff] }
  0xf8   : > { %v5186_v59 = vpop.permute.xlu1 %2065  ;;  %v5194_v0 = vpop.permute.xlu0 %2049  ;;  %v783_v32 = vrot.slane %v781_v24, 7 }
  0xfa   : > { %2830 = vrot.lane.b32.xlu1 %v2756_v42, %s4154_s27  ;;  %2563 = vrot.lane.b32.xlu0 %v4112_v61, %s4153_s26  ;;  %v574_v49 = vld [vmem:[#allocation2 + $0x78] sm:$0x80]  ;;  %v786_v5 = vor.u32 %v784_v29, %v783_v32  ;;  %v1290_v42 = vld [vmem:[#allocation2 + $0x30] sm:$0xff] }
  0xfb   : > { %v575_v63 = vsel %vm4424_vm15, 0, %v574_v49  ;;  %v1291_v41 = vsel %vm4844_vm7, %v5092_v44, %v1290_v42  ;;  %v1294_v44 = vsel %vm4844_vm7, %v5100_v13, %v1293_v21  ;;  %vm3399_vm15 = vcmask 257024  }
  0xfc   : > { %v2369_v50 = vpop.permute.xlu1 %2368  ;;  %v2353_v2 = vpop.permute.xlu0 %2352  ;;  %576 = vst [vmem:[#allocation2 + $0x78] sm:$0x80] %v575_v63 }
  0xfd   : > { %v2424_v3 = vsel %vm5199_vm6, %v2369_v50, %v2118_v62  ;;  %v2400_v57 = vsel %vm5199_vm6, %v2353_v2, %v2094_v6  ;;  %v2102_v62 = vld [vmem:[#allocation2 + $0x18] sm:$0xff]  ;;  %v2123_v50 = vld [vmem:[#allocation2 + $0x50] sm:$0xff] }
  0xfe   : > { %2425 = vst [vmem:[#allocation2 + $0x40] sm:$0xff] %v2424_v3  ;;  %2832 = vrot.lane.b32.xlu1 %v2763_v4, %s4154_s27  ;;  %2401 = vst [vmem:[#allocation2] sm:$0xff] %v2400_v57  ;;  %2846 = vrot.lane.b32.xlu0 %v2812_v36, %s4154_s27  ;;  %v2099_v36 = vld [vmem:[#allocation2 + $0x10] sm:$0xff]  ;;  %v2103_v6 = vsel %vm5190_vm11, %v5194_v0, %v2102_v62  ;;  %v2124_v2 = vsel %vm5190_vm11, %v5166_v27, %v2123_v50 }
  0xff   : > { %v2100_v51 = vsel %vm5190_vm11, %v5170_v14, %v2099_v36  ;;  %v2127_v0 = vsel %vm5190_vm11, %v5186_v59, %v2126_v7 }
 0x100   : > { %v2371_v23 = vpop.permute.xlu1 %2370  ;;  %v2355_v12 = vpop.permute.xlu0 %2354 }
 0x101   : > { %v2427_v37 = vsel %vm5199_vm6, %v2371_v23, %v2121_v17  ;;  %v2403_v56 = vsel %vm5199_vm6, %v2355_v12, %v2097_v54 }
 0x102   : > { %2428 = vst [vmem:[#allocation2 + $0x48] sm:$0xff] %v2427_v37  ;;  %2073 = vrot.lane.b32.xlu1 %v2042_v9, %s4151_s24  ;;  %2404 = vst [vmem:[#allocation2 + $0x8] sm:$0xff] %v2403_v56  ;;  %2848 = vrot.lane.b32.xlu0 %v2819_v25, %s4154_s27 }
 0x103   : > { %v848_v34 = vld [vmem:[#allocation2 + $0x78] sm:$0xff] }
 0x104   : > { %v2566_v26 = vpop.permute.xlu1 %2565  ;;  %v2550_v35 = vpop.permute.xlu0 %2549  ;;  %v849_v1 = vsel %vm4469_vm0, %v786_v5, %v848_v34 }
 0x105   : > { %2603 = vst.msk [vmem:[#allocation2 + $0x40] sm:$0xff] %vm523_vm12, %v2566_v26  ;;  %2595 = vst.msk [vmem:[#allocation2] sm:$0xff] %vm523_vm12, %v2550_v35 }
 0x106   : > { %2834 = vrot.lane.b32.xlu0 %v2770_v15, %s4154_s27  ;;  %850 = vst [vmem:[#allocation2 + $0x78] sm:$0xff] %v849_v1 }
 0x108   : > { %v2568_v20 = vpop.permute.xlu1 %2567  ;;  %v2552_v28 = vpop.permute.xlu0 %2551 }
 0x109   : > { %2604 = vst.msk [vmem:[#allocation2 + $0x48] sm:$0xff] %vm523_vm12, %v2568_v20  ;;  %2596 = vst.msk [vmem:[#allocation2 + $0x8] sm:$0xff] %vm523_vm12, %v2552_v28  ;;  %v2105_v28 = vld [vmem:[#allocation2 + $0x20] sm:$0xff] }
 0x10c   : > { %v1573_v31 = vpop.permute.xlu1 %1572  ;;  %v1557_v61 = vpop.permute.xlu0 %1556  ;;  %v2867_v19 = vld [vmem:[#allocation2] sm:$0xff] }
 0x10d   : > { %v1637_v33 = vsel %vm4861_vm8, %v1573_v31, %v1315_v11  ;;  %v1613_v45 = vsel %vm4861_vm8, %v1557_v61, %v1291_v41  ;;  %v2891_v37 = vld [vmem:[#allocation2 + $0x40] sm:$0xff]  ;;  %v2108_v31 = vld [vmem:[#allocation2 + $0x28] sm:$0xff] }
 0x10e   : > { %1638 = vst [vmem:[#allocation2 + $0x70] sm:$0xff] %v1637_v33  ;;  %1614 = vst [vmem:[#allocation2 + $0x30] sm:$0xff] %v1613_v45  ;;  %v2129_v41 = vld [vmem:[#allocation2 + $0x60] sm:$0xff] }
 0x110   : > { %v1767_v47 = vpop.permute.xlu1 %1766  ;;  %v1559_v16 = vpop.permute.xlu0 %1558  ;;  %v2870_v24 = vld [vmem:[#allocation2 + $0x8] sm:$0xff] }
 0x111   : > { %1809 = vst.msk [vmem:[#allocation2 + $0x30] sm:$0xff] %vm1802_vm9, %v1767_v47  ;;  %v1616_v4 = vsel %vm4861_vm8, %v1559_v16, %v1294_v44  ;;  %v2894_v63 = vld [vmem:[#allocation2 + $0x48] sm:$0xff] }
 0x112   : > { %1617 = vst [vmem:[#allocation2 + $0x38] sm:$0xff] %v1616_v4  ;;  %v2132_v47 = vld [vmem:[#allocation2 + $0x68] sm:$0xff] }
 0x114   : > { %v5260_v22 = vpop.permute.xlu1 %2051  ;;  %v1783_v8 = vpop.permute.xlu0 %1782 }
 0x115   : > { %1817 = vst.msk [vmem:[#allocation2 + $0x70] sm:$0xff] %vm1802_vm9, %v1783_v8  ;;  %v2106_v5 = vsel %vm5190_vm11, %v5260_v22, %v2105_v28 }
 0x118   : > { %v985_v55 = vpop.permute.xlu1 %984  ;;  %v5264_v18 = vpop.permute.xlu0 %2067 }
 0x119   : > { %1016 = vst.msk [vmem:[#allocation2 + $0x78] sm:$0xff] %vm315_vm1, %v985_v55  ;;  %v2130_v34 = vsel %vm5190_vm11, %v5264_v18, %v2129_v41 }
 0x11c   : > { %v5266_v40 = vpop.permute.xlu1 %2053  ;;  %v1769_v13 = vpop.permute.xlu0 %1768 }
 0x11d   : > { %1810 = vst.msk [vmem:[#allocation2 + $0x38] sm:$0xff] %vm1802_vm9, %v1769_v13  ;;  %v2109_v33 = vsel %vm5190_vm11, %v5266_v40, %v2108_v31 }
 0x120   : > { %v2357_v58 = vpop.permute.xlu1 %2356  ;;  %v5274_v52 = vpop.permute.xlu0 %2069 }
 0x121   : > { %v2406_v48 = vsel %vm5199_vm6, %v2357_v58, %v2100_v51  ;;  %v2133_v16 = vsel %vm5190_vm11, %v5274_v52, %v2132_v47 }
 0x122   : > { %2407 = vst [vmem:[#allocation2 + $0x10] sm:$0xff] %v2406_v48 }
 0x124   : > { %v2359_v3 = vpop.permute.xlu1 %2358  ;;  %v2373_v57 = vpop.permute.xlu0 %2372 }
 0x125   : > { %v2409_v14 = vsel %vm5199_vm6, %v2359_v3, %v2103_v6  ;;  %v2430_v9 = vsel %vm5199_vm6, %v2373_v57, %v2124_v2  ;;  %v2111_v6 = vld [vmem:[#allocation2 + $0x30] sm:$0xff] }
 0x126   : > { %2410 = vst [vmem:[#allocation2 + $0x18] sm:$0xff] %v2409_v14  ;;  %2431 = vst [vmem:[#allocation2 + $0x50] sm:$0xff] %v2430_v9 }
 0x128   : > { %v2554_v10 = vpop.permute.xlu1 %2553  ;;  %v2375_v25 = vpop.permute.xlu0 %2374 }
 0x129   : > { %2597 = vst.msk [vmem:[#allocation2 + $0x10] sm:$0xff] %vm523_vm12, %v2554_v10  ;;  %v2433_v38 = vsel %vm5199_vm6, %v2375_v25, %v2127_v0  ;;  %v1317_v10 = vld [vmem:[#allocation2 + $0x78] sm:$0xff]  ;;  %v2135_v25 = vld [vmem:[#allocation2 + $0x70] sm:$0xff] }
 0x12a   : > { %2434 = vst [vmem:[#allocation2 + $0x58] sm:$0xff] %v2433_v38 }
 0x12c   : > { %v2821_v53 = vpop.permute.xlu1 %2820  ;;  %v2570_v59 = vpop.permute.xlu0 %2569 }
 0x12d   : > { %v2868_v17 = vsel %vm5292_vm13, %v2821_v53, %v2867_v19  ;;  %2605 = vst.msk [vmem:[#allocation2 + $0x50] sm:$0xff] %vm523_vm12, %v2570_v59 }
 0x12e   : > { %2869 = vst [vmem:[#allocation2] sm:$0xff] %v2868_v17  ;;  %3908 = vmatprep.mubr.msk.bf16.mxu0 %vm2948_vm14, %v2868_v17 }
 0x130   : > { %v2556_v23 = vpop.permute.xlu1 %2555  ;;  %v2837_v54 = vpop.permute.xlu0 %2836  ;;  %v2873_v55 = vld [vmem:[#allocation2 + $0x10] sm:$0xff] }
 0x131   : > { %2598 = vst.msk [vmem:[#allocation2 + $0x18] sm:$0xff] %vm523_vm12, %v2556_v23  ;;  %v2892_v12 = vsel %vm5292_vm13, %v2837_v54, %v2891_v37  ;;  %v2114_v23 = vld [vmem:[#allocation2 + $0x38] sm:$0xff] }
 0x132   : > { %2893 = vst [vmem:[#allocation2 + $0x40] sm:$0xff] %v2892_v12  ;;  %3924 = vmatprep.mubr.msk.bf16.mxu1 %vm2948_vm14, %v2892_v12 }
 0x134   : > { %v2823_v56 = vpop.permute.xlu1 %2822  ;;  %v2572_v26 = vpop.permute.xlu0 %2571  ;;  %v2897_v51 = vld [vmem:[#allocation2 + $0x50] sm:$0xff] }
 0x135   : > { %v2871_v15 = vsel %vm5292_vm13, %v2823_v56, %v2870_v24  ;;  %2606 = vst.msk [vmem:[#allocation2 + $0x58] sm:$0xff] %vm523_vm12, %v2572_v26 }
 0x136   : > { %2872 = vst [vmem:[#allocation2 + $0x8] sm:$0xff] %v2871_v15  ;;  %3909 = vmatmul.mubr.msk.bf16.vlgmr.msra.gmra.mrb[0].mxu0 %vm2948_vm14, %v2871_v15 }
 0x138   : > { %v2056_v49 = vpop.permute.xlu1 %2055  ;;  %v2839_v35 = vpop.permute.xlu0 %2838  ;;  %v2876_v52 = vld [vmem:[#allocation2 + $0x18] sm:$0xff] }
 0x139   : > { %v2895_v32 = vsel %vm5292_vm13, %v2839_v35, %v2894_v63  ;;  %v2112_v3 = vsel %vm5190_vm11, %v2056_v49, %v2111_v6 }
 0x13a   : > { %2896 = vst [vmem:[#allocation2 + $0x48] sm:$0xff] %v2895_v32  ;;  %3925 = vmatmul.mubr.msk.bf16.vlgmr.msra.gmra.mrb[0].mxu1 %vm2948_vm14, %v2895_v32 }
 0x13c   : > { %v5313_v29 = vpop.permute.xlu1 %1255  ;;  %v5315_v20 = vpop.permute.xlu0 %2071  ;;  %v2900_v9 = vld [vmem:[#allocation2 + $0x58] sm:$0xff] }
 0x13d   : > { %v1318_v0 = vsel %vm4844_vm7, %v5313_v29, %v1317_v10  ;;  %v2136_v53 = vsel %vm5190_vm11, %v5315_v20, %v2135_v25 }
 0x140   : > { %v2361_v30 = vpop.permute.xlu1 %2360  ;;  %v5322_v11 = vpop.permute.xlu0 %2057 }
 0x141   : > { %v2412_v42 = vsel %vm5199_vm6, %v2361_v30, %v2106_v5  ;;  %v2115_v46 = vsel %vm5190_vm11, %v5322_v11, %v2114_v23 }
 0x142   : > { %2413 = vst [vmem:[#allocation2 + $0x20] sm:$0xff] %v2412_v42 }
 0x144   : > { %v2363_v61 = vpop.permute.xlu1 %2362  ;;  %v2377_v1 = vpop.permute.xlu0 %2376 }
 0x145   : > { %v2415_v45 = vsel %vm5199_vm6, %v2363_v61, %v2109_v33  ;;  %v2436_v21 = vsel %vm5199_vm6, %v2377_v1, %v2130_v34 }
 0x146   : > { %2416 = vst [vmem:[#allocation2 + $0x28] sm:$0xff] %v2415_v45  ;;  %2437 = vst [vmem:[#allocation2 + $0x60] sm:$0xff] %v2436_v21 }
 0x148   : > { %v2558_v44 = vpop.permute.xlu1 %2557  ;;  %v2379_v4 = vpop.permute.xlu0 %2378 }
 0x149   : > { %2599 = vst.msk [vmem:[#allocation2 + $0x20] sm:$0xff] %vm523_vm12, %v2558_v44  ;;  %v2439_v22 = vsel %vm5199_vm6, %v2379_v4, %v2133_v16  ;;  %v5410_v4 = vld [vmem:[%s5558_s2 + $0x1] ss:$0 sm:$0xff] }
 0x14a   : > { %2440 = vst [vmem:[#allocation2 + $0x68] sm:$0xff] %v2439_v22 }
 0x14c   : > { %v2825_v8 = vpop.permute.xlu1 %2824  ;;  %v2574_v40 = vpop.permute.xlu0 %2573 }
 0x14d   : > { %v2874_v18 = vsel %vm5292_vm13, %v2825_v8, %v2873_v55  ;;  %2607 = vst.msk [vmem:[#allocation2 + $0x60] sm:$0xff] %vm523_vm12, %v2574_v40 }
 0x14e   : > { %2875 = vst [vmem:[#allocation2 + $0x10] sm:$0xff] %v2874_v18  ;;  %3912 = vmatprep.mubr.msk.bf16.mxu0 %vm2948_vm14, %v2874_v18 }
 0x150   : > { %v2560_v13 = vpop.permute.xlu1 %2559  ;;  %v2841_v36 = vpop.permute.xlu0 %2840  ;;  %v2879_v56 = vld [vmem:[#allocation2 + $0x20] sm:$0xff] }
 0x151   : > { %2600 = vst.msk [vmem:[#allocation2 + $0x28] sm:$0xff] %vm523_vm12, %v2560_v13  ;;  %v2898_v58 = vsel %vm5292_vm13, %v2841_v36, %v2897_v51 }
 0x152   : > { %2899 = vst [vmem:[#allocation2 + $0x50] sm:$0xff] %v2898_v58  ;;  %3928 = vmatprep.mubr.msk.bf16.mxu1 %vm2948_vm14, %v2898_v58 }
 0x154   : > { %v2827_v48 = vpop.permute.xlu1 %2826  ;;  %v2576_v50 = vpop.permute.xlu0 %2575  ;;  %v2903_v35 = vld [vmem:[#allocation2 + $0x60] sm:$0xff] }
 0x155   : > { %v2877_v62 = vsel %vm5292_vm13, %v2827_v48, %v2876_v52  ;;  %2608 = vst.msk [vmem:[#allocation2 + $0x68] sm:$0xff] %vm523_vm12, %v2576_v50 }
 0x156   : > { %2878 = vst [vmem:[#allocation2 + $0x18] sm:$0xff] %v2877_v62  ;;  %3913 = vmatmul.mubr.msk.bf16.gmra.mrb[4].mxu0 %vm2948_vm14, %v2877_v62 }
 0x158   : > { %v2365_v2 = vpop.permute.xlu1 %2364  ;;  %v2843_v57 = vpop.permute.xlu0 %2842  ;;  %v2882_v32 = vld [vmem:[#allocation2 + $0x28] sm:$0xff] }
 0x159   : > { %v2418_v14 = vsel %vm5199_vm6, %v2365_v2, %v2112_v3  ;;  %v2901_v7 = vsel %vm5292_vm13, %v2843_v57, %v2900_v9 }
 0x15a   : > { %2419 = vst [vmem:[#allocation2 + $0x30] sm:$0xff] %v2418_v14  ;;  %2902 = vst [vmem:[#allocation2 + $0x58] sm:$0xff] %v2901_v7  ;;  %3929 = vmatmul.mubr.msk.bf16.gmra.mrb[4].mxu1 %vm2948_vm14, %v2901_v7 }
 0x15c   : > { %v1575_v38 = vpop.permute.xlu1 %1574  ;;  %v2381_v17 = vpop.permute.xlu0 %2380  ;;  %v2906_v11 = vld [vmem:[#allocation2 + $0x68] sm:$0xff] }
 0x15d   : > { %v1640_v19 = vsel %vm4861_vm8, %v1575_v38, %v1318_v0  ;;  %v2442_v59 = vsel %vm5199_vm6, %v2381_v17, %v2136_v53 }
 0x15e   : > { %1641 = vst [vmem:[#allocation2 + $0x78] sm:$0xff] %v1640_v19  ;;  %2443 = vst [vmem:[#allocation2 + $0x70] sm:$0xff] %v2442_v59 }
 0x160   : > { %v2562_v54 = vpop.permute.xlu1 %2561  ;;  %v2367_v37 = vpop.permute.xlu0 %2366 }
 0x161   : > { %2601 = vst.msk [vmem:[#allocation2 + $0x30] sm:$0xff] %vm523_vm12, %v2562_v54  ;;  %v2421_v12 = vsel %vm5199_vm6, %v2367_v37, %v2115_v46 }
 0x162   : > { %2422 = vst [vmem:[#allocation2 + $0x38] sm:$0xff] %v2421_v12 }
 0x164   : > { %v2829_v39 = vpop.permute.xlu1 %2828  ;;  %v2578_v15 = vpop.permute.xlu0 %2577 }
 0x165   : > { %v2880_v24 = vsel %vm5292_vm13, %v2829_v39, %v2879_v56  ;;  %2609 = vst.msk [vmem:[#allocation2 + $0x70] sm:$0xff] %vm523_vm12, %v2578_v15 }
 0x166   : > { %2881 = vst [vmem:[#allocation2 + $0x20] sm:$0xff] %v2880_v24  ;;  %3916 = vmatprep.mubr.msk.bf16.mxu0 %vm2948_vm14, %v2880_v24 }
 0x168   : > { %v1785_v26 = vpop.permute.xlu1 %1784  ;;  %v2845_v49 = vpop.permute.xlu0 %2844  ;;  %v2885_v5 = vld [vmem:[#allocation2 + $0x30] sm:$0xff] }
 0x169   : > { %1818 = vst.msk [vmem:[#allocation2 + $0x78] sm:$0xff] %vm1802_vm9, %v1785_v26  ;;  %v2904_v60 = vsel %vm5292_vm13, %v2845_v49, %v2903_v35 }
 0x16a   : > { %2905 = vst [vmem:[#allocation2 + $0x60] sm:$0xff] %v2904_v60  ;;  %3932 = vmatprep.mubr.msk.bf16.mxu1 %vm2948_vm14, %v2904_v60 }
 0x16c   : > { %v2831_v63 = vpop.permute.xlu1 %2830  ;;  %v2564_v20 = vpop.permute.xlu0 %2563  ;;  %v2909_v45 = vld [vmem:[#allocation2 + $0x70] sm:$0xff] }
 0x16d   : > { %v2883_v29 = vsel %vm5292_vm13, %v2831_v63, %v2882_v32  ;;  %2602 = vst.msk [vmem:[#allocation2 + $0x38] sm:$0xff] %vm523_vm12, %v2564_v20 }
 0x16e   : > { %2884 = vst [vmem:[#allocation2 + $0x28] sm:$0xff] %v2883_v29  ;;  %3917 = vmatmul.mubr.msk.bf16.gmra.mrb[8].mxu0 %vm2948_vm14, %v2883_v29 }
 0x170   : > { %v2833_v28 = vpop.permute.xlu1 %2832  ;;  %v2847_v42 = vpop.permute.xlu0 %2846  ;;  %v2138_v41 = vld [vmem:[#allocation2 + $0x78] sm:$0xff] }
 0x171   : > { %v2886_v30 = vsel %vm5292_vm13, %v2833_v28, %v2885_v5  ;;  %v2907_v31 = vsel %vm5292_vm13, %v2847_v42, %v2906_v11 }
 0x172   : > { %2887 = vst [vmem:[#allocation2 + $0x30] sm:$0xff] %v2886_v30  ;;  %3920 = vmatprep.mubr.msk.bf16.mxu0 %vm2948_vm14, %v2886_v30  ;;  %2908 = vst [vmem:[#allocation2 + $0x68] sm:$0xff] %v2907_v31  ;;  %3933 = vmatmul.mubr.msk.bf16.gmra.mrb[8].mxu1 %vm2948_vm14, %v2907_v31 }
 0x174   : > { %v2074_v33 = vpop.permute.xlu1 %2073  ;;  %v2849_v34 = vpop.permute.xlu0 %2848  ;;  %v2888_v47 = vld [vmem:[#allocation2 + $0x38] sm:$0xff] }
 0x175   : > { %v2139_v61 = vsel %vm5190_vm11, %v2074_v33, %v2138_v41  ;;  %v2910_v1 = vsel %vm5292_vm13, %v2849_v34, %v2909_v45 }
 0x176   : > { %2140 = vst [vmem:[#allocation2 + $0x78] sm:$0xff] %v2139_v61  ;;  %2911 = vst [vmem:[#allocation2 + $0x70] sm:$0xff] %v2910_v1  ;;  %3936 = vmatprep.mubr.msk.bf16.mxu1 %vm2948_vm14, %v2910_v1 }
 0x178   : > { %v2835_v21 = vpop.permute.xlu0 %2834 }
 0x179   : > { %v2889_v44 = vsel %vm5292_vm13, %v2835_v21, %v2888_v47 }
 0x17a   : > { %2890 = vst [vmem:[#allocation2 + $0x38] sm:$0xff] %v2889_v44  ;;  %3921 = vmatmul.mubr.msk.bf16.gmra.mrb[12].mxu0 %vm2948_vm14, %v2889_v44  ;;  %3937 = vmatmul.mubr.msk.bf16.gmra.mrb[12].mxu1 %vm2948_vm14, %v2139_v61 }
 0x209   : > { %v3910_v16 = vpop.f32.mrb[0].mxu0 }
 0x20a   : > { %v3172_v27 = vmul.f32 %v3910_v16, %v5405_v43  ;;  %v3035_v22 = vpop.f32.mrb[1].mxu0 }
 0x20b   : > { %v3170_v8 = vmul.f32 %v5405_v43, %v3035_v22  ;;  %v3911_v55 = vpop.f32.mrb[2].mxu0 }
 0x20c   : > { %v3209_v18 = vadd.f32 %v5410_v4, %v3172_v27  ;;  %v3173_v40 = vmul.f32 %v3911_v55, %v5405_v43  ;;  %v3038_v13 = vpop.f32.mrb[3].mxu0 }
 0x20d   : > { %v3207_v36 = vadd.f32 %v5410_v4, %v3170_v8  ;;  %v3171_v51 = vmul.f32 %v5405_v43, %v3038_v13  ;;  %v3926_v52 = vpop.f32.mrb[0].mxu1 }
 0x20e   : > { %v3241_v58 = vmax.f32 %v3209_v18, 0.0  ;;  %v3210_v48 = vadd.f32 %v5410_v4, %v3173_v40  ;;  %v3188_v6 = vmul.f32 %v3926_v52, %v5405_v43  ;;  %v3099_v3 = vpop.f32.mrb[1].mxu1 }
 0x20f   : > { %v3239_v62 = vmax.f32 %v3207_v36, 0.0  ;;  %v3208_v50 = vadd.f32 %v5410_v4, %v3171_v51  ;;  %v3186_v57 = vmul.f32 %v5405_v43, %v3099_v3  ;;  %v3927_v9 = vpop.f32.mrb[2].mxu1 }
 0x210   : > { %v3853_v2 = vpack.c.bf16 %v3241_v58, %v3241_v58  ;;  %v3242_v14 = vmax.f32 %v3210_v48, 0.0  ;;  %v3225_v0 = vadd.f32 %v5410_v4, %v3188_v6  ;;  %v3189_v25 = vmul.f32 %v3927_v9, %v5405_v43  ;;  %v3102_v38 = vpop.f32.mrb[3].mxu1 }
 0x211   : > { %v3851_v7 = vpack.c.bf16 %v3239_v62, %v3239_v62  ;;  %v3240_v10 = vmax.f32 %v3208_v50, 0.0  ;;  %v3223_v19 = vadd.f32 %v5410_v4, %v3186_v57  ;;  %v3187_v17 = vmul.f32 %v5405_v43, %v3102_v38 }
 0x212   : > { %3402 = vst.msk [vmem:[%s5424_s18 + $0x8] sm:$0xf] %vm3399_vm15, %v3853_v2  ;;  %v3854_v53 = vpack.c.bf16 %v3242_v14, %v3242_v14  ;;  %v3257_v23 = vmax.f32 %v3225_v0, 0.0  ;;  %v3226_v54 = vadd.f32 %v5410_v4, %v3189_v25 }
 0x213   : > { %3400 = vst.msk [vmem:[%s5424_s18] sm:$0xf] %vm3399_vm15, %v3851_v7  ;;  %v3852_v59 = vpack.c.bf16 %v3240_v10, %v3240_v10  ;;  %v3255_v46 = vmax.f32 %v3223_v19, 0.0  ;;  %v3224_v37 = vadd.f32 %v5410_v4, %v3187_v17 }
 0x214   : > { %3403 = vst.msk [vmem:[%s5424_s18 + $0xc] sm:$0xf] %vm3399_vm15, %v3854_v53  ;;  %v3869_v12 = vpack.c.bf16 %v3257_v23, %v3257_v23  ;;  %v3258_v39 = vmax.f32 %v3226_v54, 0.0 }
 0x215   : > { %3401 = vst.msk [vmem:[%s5424_s18 + $0x4] sm:$0xf] %vm3399_vm15, %v3852_v59  ;;  %v3867_v56 = vpack.c.bf16 %v3255_v46, %v3255_v46  ;;  %v3256_v24 = vmax.f32 %v3224_v37, 0.0 }
 0x216   : > { %3418 = vst.msk [vmem:[%s5424_s18 + $0x48] sm:$0xf] %vm3399_vm15, %v3869_v12  ;;  %v3870_v15 = vpack.c.bf16 %v3258_v39, %v3258_v39 }
 0x217   : > { %3416 = vst.msk [vmem:[%s5424_s18 + $0x40] sm:$0xf] %vm3399_vm15, %v3867_v56  ;;  %v3868_v26 = vpack.c.bf16 %v3256_v24, %v3256_v24 }
 0x218   : > { %3419 = vst.msk [vmem:[%s5424_s18 + $0x4c] sm:$0xf] %vm3399_vm15, %v3870_v15 }
 0x219   : > { %3417 = vst.msk [vmem:[%s5424_s18 + $0x44] sm:$0xf] %vm3399_vm15, %v3868_v26 }
 0x229   : > { %v3914_v49 = vpop.f32.mrb[4].mxu0 }
 0x22a   : > { %v3176_v35 = vmul.f32 %v3914_v49, %v5405_v43  ;;  %v3051_v60 = vpop.f32.mrb[5].mxu0 }
 0x22b   : > { %v3174_v63 = vmul.f32 %v5405_v43, %v3051_v60  ;;  %v3915_v32 = vpop.f32.mrb[6].mxu0 }
 0x22c   : > { %v3213_v29 = vadd.f32 %v5410_v4, %v3176_v35  ;;  %v3177_v20 = vmul.f32 %v3915_v32, %v5405_v43  ;;  %v3054_v28 = vpop.f32.mrb[7].mxu0 }
 0x22d   : > { %v3211_v5 = vadd.f32 %v5410_v4, %v3174_v63  ;;  %v3175_v30 = vmul.f32 %v5405_v43, %v3054_v28  ;;  %v3930_v31 = vpop.f32.mrb[4].mxu1 }
 0x22e   : > { %v3245_v42 = vmax.f32 %v3213_v29, 0.0  ;;  %v3214_v11 = vadd.f32 %v5410_v4, %v3177_v20  ;;  %v3192_v61 = vmul.f32 %v3930_v31, %v5405_v43  ;;  %v3115_v34 = vpop.f32.mrb[5].mxu1 }
 0x22f   : > { %v3243_v41 = vmax.f32 %v3211_v5, 0.0  ;;  %v3212_v33 = vadd.f32 %v5410_v4, %v3175_v30  ;;  %v3190_v21 = vmul.f32 %v5405_v43, %v3115_v34  ;;  %v3931_v47 = vpop.f32.mrb[6].mxu1 }
 0x230   : > { %v3857_v45 = vpack.c.bf16 %v3245_v42, %v3245_v42  ;;  %v3246_v1 = vmax.f32 %v3214_v11, 0.0  ;;  %v3229_v27 = vadd.f32 %v5410_v4, %v3192_v61  ;;  %v3193_v22 = vmul.f32 %v3931_v47, %v5405_v43  ;;  %v3118_v8 = vpop.f32.mrb[7].mxu1 }
 0x231   : > { %v3855_v44 = vpack.c.bf16 %v3243_v41, %v3243_v41  ;;  %v3244_v16 = vmax.f32 %v3212_v33, 0.0  ;;  %v3227_v18 = vadd.f32 %v5410_v4, %v3190_v21  ;;  %v3191_v40 = vmul.f32 %v5405_v43, %v3118_v8 }
 0x232   : > { %3406 = vst.msk [vmem:[%s5424_s18 + $0x18] sm:$0xf] %vm3399_vm15, %v3857_v45  ;;  %v3858_v55 = vpack.c.bf16 %v3246_v1, %v3246_v1  ;;  %v3261_v36 = vmax.f32 %v3229_v27, 0.0  ;;  %v3230_v51 = vadd.f32 %v5410_v4, %v3193_v22 }
 0x233   : > { %3404 = vst.msk [vmem:[%s5424_s18 + $0x10] sm:$0xf] %vm3399_vm15, %v3855_v44  ;;  %v3856_v13 = vpack.c.bf16 %v3244_v16, %v3244_v16  ;;  %v3259_v58 = vmax.f32 %v3227_v18, 0.0  ;;  %v3228_v48 = vadd.f32 %v5410_v4, %v3191_v40 }
 0x234   : > { %3407 = vst.msk [vmem:[%s5424_s18 + $0x1c] sm:$0xf] %vm3399_vm15, %v3858_v55  ;;  %v3873_v52 = vpack.c.bf16 %v3261_v36, %v3261_v36  ;;  %v3262_v62 = vmax.f32 %v3230_v51, 0.0 }
 0x235   : > { %3405 = vst.msk [vmem:[%s5424_s18 + $0x14] sm:$0xf] %vm3399_vm15, %v3856_v13  ;;  %v3871_v50 = vpack.c.bf16 %v3259_v58, %v3259_v58  ;;  %v3260_v6 = vmax.f32 %v3228_v48, 0.0 }
 0x236   : > { %3422 = vst.msk [vmem:[%s5424_s18 + $0x58] sm:$0xf] %vm3399_vm15, %v3873_v52  ;;  %v3874_v3 = vpack.c.bf16 %v3262_v62, %v3262_v62 }
 0x237   : > { %3420 = vst.msk [vmem:[%s5424_s18 + $0x50] sm:$0xf] %vm3399_vm15, %v3871_v50  ;;  %v3872_v2 = vpack.c.bf16 %v3260_v6, %v3260_v6 }
 0x238   : > { %3423 = vst.msk [vmem:[%s5424_s18 + $0x5c] sm:$0xf] %vm3399_vm15, %v3874_v3 }
 0x239   : > { %3421 = vst.msk [vmem:[%s5424_s18 + $0x54] sm:$0xf] %vm3399_vm15, %v3872_v2 }
 0x241   : > { %v3918_v14 = vpop.f32.mrb[8].mxu0 }
 0x242   : > { %v3180_v57 = vmul.f32 %v3918_v14, %v5405_v43  ;;  %v3067_v9 = vpop.f32.mrb[9].mxu0 }
 0x243   : > { %v3178_v7 = vmul.f32 %v5405_v43, %v3067_v9  ;;  %v3919_v10 = vpop.f32.mrb[10].mxu0 }
 0x244   : > { %v3217_v0 = vadd.f32 %v5410_v4, %v3180_v57  ;;  %v3181_v25 = vmul.f32 %v3919_v10, %v5405_v43  ;;  %v3070_v38 = vpop.f32.mrb[11].mxu0 }
 0x245   : > { %v3215_v53 = vadd.f32 %v5410_v4, %v3178_v7  ;;  %v3179_v19 = vmul.f32 %v5405_v43, %v3070_v38  ;;  %v3934_v23 = vpop.f32.mrb[8].mxu1 }
 0x246   : > { %v3249_v17 = vmax.f32 %v3217_v0, 0.0  ;;  %v3218_v59 = vadd.f32 %v5410_v4, %v3181_v25  ;;  %v3196_v37 = vmul.f32 %v3934_v23, %v5405_v43  ;;  %v3131_v12 = vpop.f32.mrb[9].mxu1 }
 0x247   : > { %v3247_v54 = vmax.f32 %v3215_v53, 0.0  ;;  %v3216_v46 = vadd.f32 %v5410_v4, %v3179_v19  ;;  %v3194_v24 = vmul.f32 %v5405_v43, %v3131_v12  ;;  %v3935_v15 = vpop.f32.mrb[10].mxu1 }
 0x248   : > { %v3861_v39 = vpack.c.bf16 %v3249_v17, %v3249_v17  ;;  %v3250_v56 = vmax.f32 %v3218_v59, 0.0  ;;  %v3233_v35 = vadd.f32 %v5410_v4, %v3196_v37  ;;  %v3197_v60 = vmul.f32 %v3935_v15, %v5405_v43  ;;  %v3134_v63 = vpop.f32.mrb[11].mxu1 }
 0x249   : > { %v3859_v26 = vpack.c.bf16 %v3247_v54, %v3247_v54  ;;  %v3248_v49 = vmax.f32 %v3216_v46, 0.0  ;;  %v3231_v29 = vadd.f32 %v5410_v4, %v3194_v24  ;;  %v3195_v20 = vmul.f32 %v5405_v43, %v3134_v63 }
 0x24a   : > { %3410 = vst.msk [vmem:[%s5424_s18 + $0x28] sm:$0xf] %vm3399_vm15, %v3861_v39  ;;  %v3862_v32 = vpack.c.bf16 %v3250_v56, %v3250_v56  ;;  %v3265_v5 = vmax.f32 %v3233_v35, 0.0  ;;  %v3234_v30 = vadd.f32 %v5410_v4, %v3197_v60 }
 0x24b   : > { %3408 = vst.msk [vmem:[%s5424_s18 + $0x20] sm:$0xf] %vm3399_vm15, %v3859_v26  ;;  %v3860_v28 = vpack.c.bf16 %v3248_v49, %v3248_v49  ;;  %v3263_v42 = vmax.f32 %v3231_v29, 0.0  ;;  %v3232_v11 = vadd.f32 %v5410_v4, %v3195_v20 }
 0x24c   : > { %3411 = vst.msk [vmem:[%s5424_s18 + $0x2c] sm:$0xf] %vm3399_vm15, %v3862_v32  ;;  %v3877_v31 = vpack.c.bf16 %v3265_v5, %v3265_v5  ;;  %v3266_v41 = vmax.f32 %v3234_v30, 0.0 }
 0x24d   : > { %3409 = vst.msk [vmem:[%s5424_s18 + $0x24] sm:$0xf] %vm3399_vm15, %v3860_v28  ;;  %v3875_v33 = vpack.c.bf16 %v3263_v42, %v3263_v42  ;;  %v3264_v61 = vmax.f32 %v3232_v11, 0.0  ;;  %v3922_v34 = vpop.f32.mrb[12].mxu0  ;;  %v3938_v45 = vpop.f32.mrb[12].mxu1 }
 0x24e   : > { %3426 = vst.msk [vmem:[%s5424_s18 + $0x68] sm:$0xf] %vm3399_vm15, %v3877_v31  ;;  %v3878_v1 = vpack.c.bf16 %v3266_v41, %v3266_v41  ;;  %v3184_v21 = vmul.f32 %v3922_v34, %v5405_v43  ;;  %v3200_v47 = vmul.f32 %v3938_v45, %v5405_v43  ;;  %v3083_v44 = vpop.f32.mrb[13].mxu0  ;;  %v3147_v16 = vpop.f32.mrb[13].mxu1 }
 0x24f   : > { %3424 = vst.msk [vmem:[%s5424_s18 + $0x60] sm:$0xf] %vm3399_vm15, %v3875_v33  ;;  %v3876_v27 = vpack.c.bf16 %v3264_v61, %v3264_v61  ;;  %v3182_v22 = vmul.f32 %v5405_v43, %v3083_v44  ;;  %v3198_v8 = vmul.f32 %v5405_v43, %v3147_v16  ;;  %v3923_v55 = vpop.f32.mrb[14].mxu0  ;;  %v3939_v18 = vpop.f32.mrb[14].mxu1 }
 0x250   : > { %3427 = vst.msk [vmem:[%s5424_s18 + $0x6c] sm:$0xf] %vm3399_vm15, %v3878_v1  ;;  %v3221_v40 = vadd.f32 %v5410_v4, %v3184_v21  ;;  %v3237_v13 = vadd.f32 %v5410_v4, %v3200_v47  ;;  %v3185_v36 = vmul.f32 %v3923_v55, %v5405_v43  ;;  %v3201_v51 = vmul.f32 %v3939_v18, %v5405_v43  ;;  %v3086_v58 = vpop.f32.mrb[15].mxu0  ;;  %v3150_v48 = vpop.f32.mrb[15].mxu1 }
 0x251   : > { %3425 = vst.msk [vmem:[%s5424_s18 + $0x64] sm:$0xf] %vm3399_vm15, %v3876_v27  ;;  %v3219_v52 = vadd.f32 %v5410_v4, %v3182_v22  ;;  %v3235_v62 = vadd.f32 %v5410_v4, %v3198_v8  ;;  %v3183_v50 = vmul.f32 %v5405_v43, %v3086_v58  ;;  %v3199_v6 = vmul.f32 %v5405_v43, %v3150_v48 }
 0x252   : > { %v3253_v3 = vmax.f32 %v3221_v40, 0.0  ;;  %v3269_v2 = vmax.f32 %v3237_v13, 0.0  ;;  %v3222_v14 = vadd.f32 %v5410_v4, %v3185_v36  ;;  %v3238_v57 = vadd.f32 %v5410_v4, %v3201_v51 }
 0x253   : > { %v3251_v9 = vmax.f32 %v3219_v52, 0.0  ;;  %v3267_v7 = vmax.f32 %v3235_v62, 0.0  ;;  %v3220_v10 = vadd.f32 %v5410_v4, %v3183_v50  ;;  %v3236_v0 = vadd.f32 %v5410_v4, %v3199_v6 }
 0x254   : > { %v3865_v25 = vpack.c.bf16 %v3253_v3, %v3253_v3  ;;  %v3881_v38 = vpack.c.bf16 %v3269_v2, %v3269_v2  ;;  %v3254_v43 = vmax.f32 %v3222_v14, 0.0  ;;  %v3270_v53 = vmax.f32 %v3238_v57, 0.0 }
 0x255   : > { %v3863_v19 = vpack.c.bf16 %v3251_v9, %v3251_v9  ;;  %v3879_v17 = vpack.c.bf16 %v3267_v7, %v3267_v7  ;;  %v3252_v59 = vmax.f32 %v3220_v10, 0.0  ;;  %v3268_v23 = vmax.f32 %v3236_v0, 0.0 }
 0x256   : > { %3414 = vst.msk [vmem:[%s5424_s18 + $0x38] sm:$0xf] %vm3399_vm15, %v3865_v25  ;;  %3430 = vst.msk [vmem:[%s5424_s18 + $0x78] sm:$0xf] %vm3399_vm15, %v3881_v38  ;;  %v3866_v54 = vpack.c.bf16 %v3254_v43, %v3254_v43  ;;  %v3882_v46 = vpack.c.bf16 %v3270_v53, %v3270_v53 }
 0x257   : > { %3412 = vst.msk [vmem:[%s5424_s18 + $0x30] sm:$0xf] %vm3399_vm15, %v3863_v19  ;;  %3428 = vst.msk [vmem:[%s5424_s18 + $0x70] sm:$0xf] %vm3399_vm15, %v3879_v17  ;;  %v3864_v4 = vpack.c.bf16 %v3252_v59, %v3252_v59  ;;  %v3880_v37 = vpack.c.bf16 %v3268_v23, %v3268_v23 }
 0x258   : > { %3415 = vst.msk [vmem:[%s5424_s18 + $0x3c] sm:$0xf] %vm3399_vm15, %v3866_v54  ;;  %3431 = vst.msk [vmem:[%s5424_s18 + $0x7c] sm:$0xf] %vm3399_vm15, %v3882_v46 }
 0x259   : > { %3413 = vst.msk [vmem:[%s5424_s18 + $0x34] sm:$0xf] %vm3399_vm15, %v3864_v4  ;;  %3429 = vst.msk [vmem:[%s5424_s18 + $0x74] sm:$0xf] %vm3399_vm15, %v3880_v37 }
 0x25a PF: > { %s13_s14 = sadd.s32 1, %s4144_s14   ;;  %s5584_s12 = smov %s4140_s13 }
 0x25b   : > { %p10_p5 = scmp.ge.s32.totalorder %s13_s14, 4   ;;  %s5585_s13 = smov %s5587_s15 }
 0x25d   :  { %12 = sbr.rel (!%p10_p5) target bundleno = 2 (0x2), region = 79 }

// kernel: conv_block_forward.3
= control target key start
LH: loop header
LB: loop body
LE: loop exit
PB: predicated region body
PF: predicated region fallthrough
CT: control target
= control target key end

     0   :  { %s4558_s12 = smov 0   ;;  %s4560_s13 = smov 0   ;;  %s5982_s0 = inlined_call_operand.vmem [shape: bf16[2,16,16,32], index: 0, kind: input, shape index: {}]   ;;  %s5983_s1 = inlined_call_operand.vmem [shape: bf16[1,288,32], index: 1, kind: input, shape index: {}]   ;;  %s5984_s2 = inlined_call_operand.vmem [shape: f32[2,32], index: 2, kind: input, shape index: {}]   ;;  %s5985_s3 = inlined_call_operand.vmem [shape: bf16[2,256,32], index: 3, kind: output, shape index: {}]  }
   0x1   :  { %s4562_s14 = smov 0  }
   0x2 LB: > { %s32_s15 = sadd.s32 1, %s4528_s13  ;;  %p3807_p0 = scmp.ge.s32.totalorder %s4532_s14, 1  ;;  %s4532_s14 = sphi %s4562_s14, %s13_s14   ;;  %s4528_s13 = sphi %s4560_s13, %s6013_s13   ;;  %s4524_s12 = sphi %s4558_s12, %s6012_s12  }
   0x3   : > { %p34_p1 = scmp.ge.s32.totalorder %s32_s15, 2  ;;  %p187_p2 = scmp.lt.s32.totalorder %s4532_s14, 3 }
   0x5   : > { %s6015_s15 = smov (%p34_p1, %s32_s15), 0  ;;  %p188_p3 = pnand %p3807_p0, %p187_p2 }
   0x6   : > { %p229_p4 = scmp.lt.s32.totalorder (!%p188_p3), %s4524_s12, 1  ;;  %vm264_vm0 = vcmask (!%p188_p3), 253952   ;;  %vm265_vm1 = vsmask.f32 (!%p188_p3), 256  ;;  %v303_v1 = vld [vmem:[#allocation2 + $0x120] sm:$0x1] (!%p188_p3) }
   0x7   : > { %191 = sbr.rel (%p188_p3) target bundleno = 555 (0x22b), region = 32  ;;  %vm4577_vm2 = vmand (!%p188_p3), %vm264_vm0, %vm265_vm1  ;;  %vm319_vm3 = vcmask (!%p188_p3), 785927   ;;  %vm320_vm4 = vsmask.f32 (!%p188_p3), 7966  ;;  %v358_v3 = vld [vmem:[#allocation2 + $0x120] sm:$0x80] (!%p188_p3) }
   0x8   : > { %v304_v2 = vsel (!%p188_p3), %vm4577_vm2, 0, %v303_v1  ;;  %vm4586_vm5 = vmand (!%p188_p3), %vm319_vm3, %vm320_vm4  ;;  %v270_v5 = vld [vmem:[#allocation2 + $0x18] sm:$0x1] (!%p188_p3)  ;;  %v4415_v6 = vld [vmem:[%s5983_s1 + $0x40] sm:$0xff] (!%p188_p3)   ;;  %vm262_vm6 = vcmask (!%p188_p3), 261120   ;;  %s4534_s24 = smov (!%p188_p3), 32  }
   0x9   : > { %305 = vst [vmem:[#allocation2 + $0x120] sm:$0x1] (!%p188_p3), %v304_v2  ;;  %v359_v7 = vsel (!%p188_p3), %vm4586_vm5, 0, %v358_v3  ;;  %v271_v8 = vsel (!%p188_p3), %vm4577_vm2, 0, %v270_v5  ;;  %v325_v9 = vld [vmem:[#allocation2 + $0x18] sm:$0x80] (!%p188_p3)  ;;  %4144 = vmatprep.subr.bf16.mxu0 (!%p188_p3), %v4415_v6  ;;  %4310 = vmatprep.subr.bf16.mxu1 (!%p188_p3), %v4415_v6 }
   0xa   : > { %v4418_v10 = vld [vmem:[%s5983_s1] sm:$0xff] (!%p188_p3)   ;;  %360 = vst [vmem:[#allocation2 + $0x120] sm:$0x80] (!%p188_p3), %v359_v7  ;;  %272 = vst [vmem:[#allocation2 + $0x18] sm:$0x1] (!%p188_p3), %v271_v8  ;;  %v326_v11 = vsel (!%p188_p3), %vm4586_vm5, 0, %v325_v9 }
   0xb   : > { %327 = vst [vmem:[#allocation2 + $0x18] sm:$0x80] (!%p188_p3), %v326_v11  ;;  %4145 = vmatpush3.bf16.msra.mxu0 (!%p188_p3), %v4418_v10  ;;  %4318 = vmatpush3.bf16.msra.mxu1 (!%p188_p3), %v4418_v10  ;;  %v4535_v16 = vmov (!%p188_p3), 0   ;;  %s4536_s25 = smov (!%p188_p3), 64   ;;  %s4537_s26 = smov (!%p188_p3), 96   ;;  %vm370_vm7 = vcmask (!%p188_p3), 1041152  }
   0xc   : > { %263 = vst.msk [vmem:[#allocation2] sm:$0xff] (!%p188_p3), %vm262_vm6, %v4535_v16  ;;  %524 = vst.msk [vmem:[#allocation2 + $0x178] sm:$0xff] (!%p188_p3), %vm262_vm6, %v4535_v16  ;;  %vm802_vm8 = vsmask.f32 (!%p188_p3), 7938  ;;  %vm420_vm9 = vcmask (!%p188_p3), 523527   ;;  %vm472_vm11 = vcmask (!%p188_p3), 778752  }
   0xd   : > { %vm4698_vm10 = vmand (!%p188_p3), %vm370_vm7, %vm265_vm1  ;;  %vm317_vm15 = vcmask (!%p188_p3), 785920   ;;  %vm315_vm0 = vcmask (!%p188_p3), 523520  }
   0xe   : > { %s6017_s12 = smov (!%p229_p4, %s4524_s12), 1  ;;  %vm4732_vm12 = vmand %vm262_vm6, %vm802_vm8 }
   0xf   : > { %s4110_s18 = sshll.u32 %s6017_s12, 7  ;;  %vm4745_vm13 = vmand %vm420_vm9, %vm320_vm4  ;;  %vm522_vm9 = vcmask 1048320  }
  0x10   : > { %s4606_s23 = scalar_lea.vmem %s5982_s0, %s4110_s18  ;;  %vm4762_vm14 = vmand %vm472_vm11, %vm265_vm1  ;;  %vm5986_vm1 = vsmask.f32 7424  ;;  %s5812_s21 = scalar_lea.vmem %s5985_s3, %s4110_s18 }
  0x11   : > { %v4354_v12 = vld [vmem:[%s4606_s23 + $0x58] sm:$0xff]   ;;  %v4355_v13 = vld [vmem:[%s4606_s23] sm:$0xff]   ;;  %v4360_v23 = vld [vmem:[%s4606_s23 + $0x8] sm:$0xff]  }
  0x12   : > { %976 = vrot.lane.b32.xlu0 %v4354_v12, %s4534_s24  ;;  %v4356_v14 = vld [vmem:[%s4606_s23 + $0x60] sm:$0xff]   ;;  %954 = vrot.lane.b32.xlu1 %v4355_v13, %s4534_s24  ;;  %v4359_v22 = vld [vmem:[%s4606_s23 + $0x58] sm:$0xff]   ;;  %v1905_v29 = vshrl.u32 %v4360_v23, 16  ;;  %v1907_v31 = vshll.u32 %v4360_v23, 16  ;;  %vm5007_vm3 = vmand %vm315_vm0, %vm5986_vm1 }
  0x13   : > { %v4357_v15 = vld [vmem:[%s4606_s23 + $0x60] sm:$0xff]   ;;  %v4361_v25 = vld [vmem:[%s4606_s23 + $0x8] sm:$0xff]   ;;  %v1198_v27 = vshrl.u32 %v4359_v22, 16  ;;  %v1200_v28 = vshll.u32 %v4359_v22, 16  ;;  %v4372_v3 = vld [vmem:[%s4606_s23 + $0x10] sm:$0xff]  }
  0x14   : > { %v4358_v17 = vld [vmem:[%s4606_s23] sm:$0xff]   ;;  %v1982_v18 = vshrl.u32 %v4357_v15, 16  ;;  %v1984_v19 = vshll.u32 %v4357_v15, 16  ;;  %v2214_v32 = vshrl.u32 %v4361_v25, 16  ;;  %v2217_v33 = vshll.u32 %v4361_v25, 16  ;;  %v4364_v41 = vld [vmem:[%s4606_s23 + $0x68] sm:$0xff]   ;;  %vm5019_vm7 = vmand %vm317_vm15, %vm802_vm8 }
  0x15   : > { %v1898_v20 = vshrl.u32 %v4358_v17, 16  ;;  %v1900_v21 = vshll.u32 %v4358_v17, 16  ;;  %v1202_v35 = vrot.slane %v1200_v28, 1  ;;  %v4363_v36 = vld [vmem:[%s4606_s23] sm:$0xff]   ;;  %v1909_v37 = vrot.slane %v1907_v31, 1  ;;  %v4366_v49 = vld [vmem:[%s4606_s23 + $0x68] sm:$0xff]   ;;  %vm5048_vm11 = vmand %vm522_vm9, %vm802_vm8 }
  0x16   : > { %978 = vrot.lane.b32.xlu0 %v4356_v14, %s4534_s24  ;;  %v1986_v24 = vrot.slane %v1984_v19, 1  ;;  %v2216_v38 = vrot.slane %v2214_v32, 7  ;;  %v1123_v40 = vshll.u32 %v4363_v36, 16  ;;  %v4365_v42 = vld [vmem:[%s4606_s23] sm:$0xff]   ;;  %v1121_v44 = vshrl.u32 %v4363_v36, 16  ;;  %v4362_v50 = vld [vmem:[%s4606_s23 + $0x8] sm:$0xff]   ;;  %vm5111_vm8 = vmand %vm317_vm15, %vm5986_vm1 }
  0x17   : > { %v1902_v26 = vrot.slane %v1900_v21, 1  ;;  %v1203_v39 = vor.u32 %v1202_v35, %v1198_v27  ;;  %v1910_v43 = vor.u32 %v1909_v37, %v1905_v29  ;;  %v1991_v46 = vshll.u32 %v4364_v41, 16  ;;  %v4369_v57 = vld [vmem:[%s4606_s23 + $0x60] sm:$0xff]   ;;  %v4367_v5 = vld [vmem:[%s4606_s23 + $0x8] sm:$0xff]   ;;  %v4373_v8 = vld [vmem:[%s4606_s23 + $0x10] sm:$0xff]  }
  0x18   : > { %v1987_v30 = vor.u32 %v1986_v24, %v1982_v18  ;;  %v1125_v45 = vrot.slane %v1123_v40, 1  ;;  %v2219_v47 = vor.u32 %v2217_v33, %v2216_v38  ;;  %v1431_v48 = vshrl.u32 %v4365_v42, 16  ;;  %v4370_v61 = vld [vmem:[%s4606_s23 + $0x60] sm:$0xff]   ;;  %v4368_v9 = vld [vmem:[%s4606_s23 + $0x68] sm:$0xff]   ;;  %v4378_v28 = vld [vmem:[%s4606_s23 + $0x70] sm:$0xff]  }
  0x19   : > { %v1903_v34 = vor.u32 %v1902_v26, %v1898_v20  ;;  %v1989_v51 = vshrl.u32 %v4364_v41, 16  ;;  %v1993_v52 = vrot.slane %v1991_v46, 1  ;;  %v2298_v53 = vshrl.u32 %v4366_v49, 16  ;;  %v4375_v13 = vld [vmem:[%s4606_s23 + $0x8] sm:$0xff]   ;;  %v4376_v20 = vld [vmem:[%s4606_s23 + $0x70] sm:$0xff]  }
  0x1a   : > { %2033 = vrot.lane.b32.xlu1 %v1987_v30, %s4534_s24  ;;  %v1434_v54 = vshll.u32 %v4365_v42, 16  ;;  %v1126_v55 = vor.u32 %v1125_v45, %v1121_v44  ;;  %v1433_v56 = vrot.slane %v1431_v48, 7  ;;  %v2301_v60 = vshll.u32 %v4366_v49, 16  ;;  %v4371_v22 = vld [vmem:[%s4606_s23 + $0x68] sm:$0xff]   ;;  %v4374_v29 = vld [vmem:[%s4606_s23 + $0x10] sm:$0xff]   ;;  %v4384_v49 = vld [vmem:[%s4606_s23 + $0x18] sm:$0xff]  }
  0x1b   : > { %2009 = vrot.lane.b32.xlu0 %v1903_v34, %s4534_s24  ;;  %v1994_v58 = vor.u32 %v1993_v52, %v1989_v51  ;;  %v2300_v59 = vrot.slane %v2298_v53, 7  ;;  %v1207_v63 = vshll.u32 %v4369_v57, 16  ;;  %v1515_v2 = vshrl.u32 %v4370_v61, 16  ;;  %v4377_v25 = vld [vmem:[%s4606_s23 + $0x8] sm:$0xff]   ;;  %v4385_v53 = vld [vmem:[%s4606_s23 + $0x18] sm:$0xff]  }
  0x1c   : > { %v1436_v62 = vor.u32 %v1434_v54, %v1433_v56  ;;  %v1205_v6 = vshrl.u32 %v4369_v57, 16  ;;  %v1518_v11 = vshll.u32 %v4370_v61, 16  ;;  %v1914_v12 = vshll.u32 %v4372_v3, 16  ;;  %v4381_v40 = vld [vmem:[%s4606_s23 + $0x68] sm:$0xff]   ;;  %v4380_v54 = vld [vmem:[%s4606_s23 + $0x70] sm:$0xff]  }
  0x1d   : > { %v2303_v1 = vor.u32 %v2301_v60, %v2300_v59  ;;  %v1209_v7 = vrot.slane %v1207_v63, 1  ;;  %v1517_v10 = vrot.slane %v1515_v2, 7  ;;  %v1912_v15 = vshrl.u32 %v4372_v3, 16  ;;  %v4382_v44 = vld [vmem:[%s4606_s23 + $0x68] sm:$0xff]   ;;  %v4389_v3 = vld [vmem:[%s4606_s23 + $0x78] sm:$0xff]  }
  0x1e   : > { %1247 = vrot.lane.b32.xlu1 %v1203_v39, %s4536_s25  ;;  %v2221_v17 = vshrl.u32 %v4373_v8, 16  ;;  %v1916_v19 = vrot.slane %v1914_v12, 1  ;;  %v1130_v21 = vshll.u32 %v4375_v13, 16  ;;  %v2224_v24 = vshll.u32 %v4373_v8, 16 }
  0x1f   : > { %2011 = vrot.lane.b32.xlu0 %v1910_v43, %s4534_s24  ;;  %v1210_v14 = vor.u32 %v1209_v7, %v1205_v6  ;;  %v1520_v18 = vor.u32 %v1518_v11, %v1517_v10  ;;  %v1998_v27 = vshll.u32 %v4376_v20, 16  ;;  %v1128_v30 = vshrl.u32 %v4375_v13, 16  ;;  %v4383_v6 = vld [vmem:[%s4606_s23 + $0x70] sm:$0xff]  }
  0x20   : > { %v2223_v23 = vrot.slane %v2221_v17, 7  ;;  %v1917_v26 = vor.u32 %v1916_v19, %v1912_v15  ;;  %v1132_v31 = vrot.slane %v1130_v21, 1  ;;  %v1996_v33 = vshrl.u32 %v4376_v20, 16  ;;  %v4682_v13 = vld [vmem:[%s4606_s23 + $0x70] sm:$0xff]   ;;  %v4686_v17 = vld [vmem:[%s4606_s23 + $0x20] sm:$0xff]   ;;  %v4386_v20 = vld [vmem:[%s4606_s23 + $0x18] sm:$0xff]  }
  0x21   : > { %v1438_v34 = vshrl.u32 %v4377_v25, 16  ;;  %v2000_v35 = vrot.slane %v1998_v27, 1  ;;  %v2305_v36 = vshrl.u32 %v4378_v28, 16  ;;  %v1441_v37 = vshll.u32 %v4377_v25, 16 }
  0x22   : > { %2318 = vrot.lane.b32.xlu1 %v2219_v47, %s4536_s25  ;;  %v2226_v32 = vor.u32 %v2224_v24, %v2223_v23  ;;  %v1133_v38 = vor.u32 %v1132_v31, %v1128_v30  ;;  %v2308_v43 = vshll.u32 %v4378_v28, 16  ;;  %v1214_v46 = vshll.u32 %v4381_v40, 16 }
  0x23   : > { %956 = vrot.lane.b32.xlu0 %v4362_v50, %s4534_s24  ;;  %v1440_v39 = vrot.slane %v1438_v34, 7  ;;  %v2001_v41 = vor.u32 %v2000_v35, %v1996_v33  ;;  %v2307_v42 = vrot.slane %v2305_v36, 7  ;;  %v1522_v48 = vshrl.u32 %v4382_v44, 16  ;;  %v4379_v50 = vld [vmem:[%s4606_s23 + $0x10] sm:$0xff]   ;;  %v4707_v33 = vld [vmem:[%s4606_s23 + $0x18] sm:$0xff]  }
  0x24   : > { %v1212_v51 = vshrl.u32 %v4381_v40, 16  ;;  %v1216_v52 = vrot.slane %v1214_v46, 1  ;;  %v1525_v56 = vshll.u32 %v4382_v44, 16  ;;  %v1921_v57 = vshll.u32 %v4384_v49, 16  ;;  %v408_v34 = vld [vmem:[#allocation2 + $0x120] sm:$0x1] }
  0x25   : > { %v1443_v45 = vor.u32 %v1441_v37, %v1440_v39  ;;  %v2310_v47 = vor.u32 %v2308_v43, %v2307_v42  ;;  %v1919_v60 = vshrl.u32 %v4384_v49, 16  ;;  %v2228_v61 = vshrl.u32 %v4385_v53, 16  ;;  %v4711_v36 = vld [vmem:[%s4606_s23 + $0x18] sm:$0xff]  }
  0x26   : > { %1225 = vrot.lane.b32.xlu1 %v1126_v55, %s4536_s25  ;;  %v1524_v55 = vrot.slane %v1522_v48, 7  ;;  %v1217_v59 = vor.u32 %v1216_v52, %v1212_v51  ;;  %v1923_v63 = vrot.slane %v1921_v57, 1  ;;  %v2231_v8 = vshll.u32 %v4385_v53, 16  ;;  %v4411_v39 = vld [vmem:[%s4606_s23 + $0x58] sm:$0xff]   ;;  %v4414_v48 = vld [vmem:[%s4606_s23] sm:$0xff]  }
  0x27   : > { %2035 = vrot.lane.b32.xlu0 %v1994_v58, %s4534_s24  ;;  %v4387_v58 = vld [vmem:[%s4606_s23 + $0x10] sm:$0xff]   ;;  %v2230_v7 = vrot.slane %v2228_v61, 7  ;;  %v2315_v23 = vshll.u32 %v4389_v3, 16  ;;  %v1529_v25 = vshrl.u32 %v4682_v13, 16  ;;  %v1928_v30 = vshll.u32 %v4686_v17, 16  ;;  %v4390_v40 = vld [vmem:[%s4606_s23 + $0x18] sm:$0xff]  }
  0x28   : > { %v1137_v2 = vshll.u32 %v4387_v58, 16  ;;  %v1135_v10 = vshrl.u32 %v4387_v58, 16  ;;  %v409_v37 = vsel %vm4698_vm10, 0, %v408_v34  ;;  %v761_v46 = vshll.u32 %v4411_v39, 16  ;;  %v361_v61 = vld [vmem:[#allocation2 + $0x138] sm:$0x80] }
  0x29   : > { %v2233_v19 = vor.u32 %v2231_v8, %v2230_v7  ;;  %410 = vst [vmem:[#allocation2 + $0x120] sm:$0x1] %v409_v37  ;;  %v1930_v44 = vrot.slane %v1928_v30, 1  ;;  %v1144_v51 = vshll.u32 %v4707_v33, 16  ;;  %v1452_v53 = vshrl.u32 %v4711_v36, 16  ;;  %v4751_v8 = vld [vmem:[%s4606_s23 + $0x78] sm:$0xff]  }
  0x2a   : > { %1542 = vrot.lane.b32.xlu1 %v1436_v62, %s4537_s26  ;;  %v1527_v62 = vor.u32 %v1525_v56, %v1524_v55  ;;  %v1139_v12 = vrot.slane %v1137_v2, 1  ;;  %v681_v57 = vshrl.u32 %v4414_v48, 16  ;;  %v4783_v37 = vld [vmem:[%s4606_s23 + $0x28] sm:$0xff]   ;;  %vm525_vm1 = vcmask 261127  }
  0x2b   : > { %2342 = vrot.lane.b32.xlu0 %v2303_v1, %s4536_s25  ;;  %v4388_v1 = vld [vmem:[%s4606_s23 + $0x10] sm:$0xff]   ;;  %v1146_v7 = vrot.slane %v1144_v51, 1 }
  0x2c   : > { %v1445_v11 = vshrl.u32 %v4388_v1, 16  ;;  %v1140_v31 = vor.u32 %v1139_v12, %v1135_v10  ;;  %v683_v2 = vrot.slane %v681_v57, 7  ;;  %v362_v10 = vsel %vm4586_vm5, 0, %v361_v61  ;;  %v425_v61 = vld [vmem:[#allocation2 + $0x20] sm:$0x80] }
  0x2d   : > { %363 = vst [vmem:[#allocation2 + $0x138] sm:$0x80] %v362_v10 }
  0x2e   : > { %2514 = vrot.lane.b32.xlu1 %v4367_v5, %s4537_s26  ;;  %v4676_v5 = vld [vmem:[%s4606_s23 + $0x70] sm:$0xff]   ;;  %v1447_v21 = vrot.slane %v1445_v11, 7  ;;  %v4393_v11 = vld [vmem:[%s4606_s23 + $0x78] sm:$0xff]  }
  0x2f   : > { %980 = vrot.lane.b32.xlu0 %v4368_v9, %s4534_s24  ;;  %v1924_v9 = vor.u32 %v1923_v63, %v1919_v60  ;;  %v1221_v15 = vshll.u32 %v4676_v5, 16  ;;  %v1219_v24 = vshrl.u32 %v4676_v5, 16  ;;  %v306_v60 = vld [vmem:[#allocation2 + $0x138] sm:$0x1]  ;;  %v1455_v63 = vshll.u32 %v4711_v36, 16 }
  0x31   : > { %v1223_v28 = vrot.slane %v1221_v15, 1 }
  0x32   : > { %1249 = vrot.lane.b32.xlu1 %v1210_v14, %s4536_s25  ;;  %v2312_v14 = vshrl.u32 %v4389_v3, 16  ;;  %v307_v3 = vsel %vm4577_vm2, 0, %v306_v60 }
  0x33   : > { %1566 = vrot.lane.b32.xlu0 %v1520_v18, %s4537_s26  ;;  %v4689_v18 = vld [vmem:[%s4606_s23 + $0x20] sm:$0xff]   ;;  %v1224_v58 = vor.u32 %v1223_v28, %v1219_v24  ;;  %308 = vst [vmem:[#allocation2 + $0x138] sm:$0x1] %v307_v3  ;;  %v1539_v28 = vshll.u32 %v4751_v8, 16  ;;  %v4833_v3 = vld [vmem:[%s4606_s23 + $0x30] sm:$0xff]  }
  0x34   : > { %v2314_v27 = vrot.slane %v2312_v14, 7  ;;  %v2238_v42 = vshll.u32 %v4689_v18, 16 }
  0x36   : > { %2538 = vrot.lane.b32.xlu1 %v4371_v22, %s4537_s26  ;;  %v1448_v22 = vshll.u32 %v4388_v1, 16  ;;  %v2317_v43 = vor.u32 %v2315_v23, %v2314_v27  ;;  %v1536_v27 = vshrl.u32 %v4751_v8, 16 }
  0x37   : > { %2013 = vrot.lane.b32.xlu0 %v1917_v26, %s4534_s24 }
  0x38   : > { %v1450_v35 = vor.u32 %v1448_v22, %v1447_v21  ;;  %v1454_v22 = vrot.slane %v1452_v53, 7  ;;  %v4424_v53 = vld [vmem:[%s5983_s1 + $0x8] sm:$0xff]  }
  0x3a   : > { %2320 = vrot.lane.b32.xlu1 %v2226_v32, %s4536_s25  ;;  %v2235_v32 = vshrl.u32 %v4689_v18, 16  ;;  %v474_v18 = vld [vmem:[#allocation2 + $0x8] sm:$0x1] }
  0x3b   : > { %958 = vrot.lane.b32.xlu0 %v4374_v29, %s4534_s24  ;;  %v1532_v29 = vshll.u32 %v4682_v13, 16 }
  0x3c   : > { %v2237_v49 = vrot.slane %v2235_v32, 7  ;;  %v4396_v32 = vld [vmem:[%s4606_s23 + $0x20] sm:$0xff]  }
  0x3e   : > { %1227 = vrot.lane.b32.xlu1 %v1133_v38, %s4536_s25  ;;  %v1531_v38 = vrot.slane %v1529_v25, 7 }
  0x3f   : > { %2037 = vrot.lane.b32.xlu0 %v2001_v41, %s4534_s24  ;;  %v1926_v41 = vshrl.u32 %v4686_v17, 16 }
  0x41   : > { %v1931_v21 = vor.u32 %v1930_v44, %v1926_v41  ;;  %v422_v44 = vld [vmem:[#allocation2 + $0x8] sm:$0x80] }
  0x42   : > { %1544 = vrot.lane.b32.xlu1 %v1443_v45, %s4537_s26  ;;  %v758_v45 = vshrl.u32 %v4411_v39, 16  ;;  %v2240_v39 = vor.u32 %v2238_v42, %v2237_v49  ;;  %v475_v42 = vsel %vm4762_vm14, 0, %v474_v18  ;;  %v4802_v49 = vld [vmem:[%s4606_s23 + $0x20] sm:$0xff]  }
  0x43   : > { %2344 = vrot.lane.b32.xlu0 %v2310_v47, %s4536_s25  ;;  %v375_v47 = vld [vmem:[#allocation2 + $0x18] sm:$0x1]  ;;  %476 = vst [vmem:[#allocation2 + $0x8] sm:$0x1] %v475_v42  ;;  %v1151_v36 = vshll.u32 %v4802_v49, 16 }
  0x44   : > { %v376_v52 = vsel %vm4698_vm10, 0, %v375_v47  ;;  %v760_v56 = vrot.slane %v758_v45, 7  ;;  %v4422_v47 = vld [vmem:[%s4606_s23] sm:$0xff]  }
  0x45   : > { %377 = vst [vmem:[#allocation2 + $0x18] sm:$0x1] %v376_v52 }
  0x46   : > { %2516 = vrot.lane.b32.xlu1 %v4379_v50, %s4537_s26  ;;  %v1142_v50 = vshrl.u32 %v4707_v33, 16  ;;  %v763_v1 = vor.u32 %v761_v46, %v760_v56  ;;  %v423_v46 = vsel %vm4745_vm13, 0, %v422_v44  ;;  %v1457_v56 = vor.u32 %v1455_v63, %v1454_v22  ;;  %v4854_v22 = vld [vmem:[%s4606_s23 + $0x28] sm:$0xff]  }
  0x47   : > { %982 = vrot.lane.b32.xlu0 %v4380_v54, %s4534_s24  ;;  %v4728_v54 = vld [vmem:[%s4606_s23 + $0x78] sm:$0xff]   ;;  %424 = vst [vmem:[#allocation2 + $0x8] sm:$0x80] %v423_v46  ;;  %v2242_v33 = vshrl.u32 %v4783_v37, 16  ;;  %v426_v63 = vsel %vm4745_vm13, 0, %v425_v61  ;;  %v1158_v44 = vshll.u32 %v4854_v22, 16 }
  0x48   : > { %v2005_v14 = vshll.u32 %v4728_v54, 16  ;;  %v2003_v23 = vshrl.u32 %v4728_v54, 16  ;;  %v1147_v51 = vor.u32 %v1146_v7, %v1142_v50  ;;  %1769 = vst.msk [vmem:[#allocation2 + $0x8] sm:$0xff] %vm262_vm6, %v4422_v47  ;;  %v4818_v50 = vld [vmem:[%s4606_s23 + $0x20] sm:$0xff]   ;;  %427 = vst [vmem:[#allocation2 + $0x20] sm:$0x80] %v426_v63 }
  0x49   : > { %v4429_v54 = vld [vmem:[%s5983_s1 + $0x10] sm:$0xff]   ;;  %v1462_v8 = vshll.u32 %v4818_v50, 16 }
  0x4a   : > { %1251 = vrot.lane.b32.xlu1 %v1217_v59, %s4536_s25  ;;  %v684_v59 = vshll.u32 %v4414_v48, 16  ;;  %v2007_v34 = vrot.slane %v2005_v14, 1  ;;  %v1538_v48 = vrot.slane %v1536_v27, 7  ;;  %v2244_v14 = vrot.slane %v2242_v33, 7  ;;  %v273_v27 = vld [vmem:[#allocation2 + $0x30] sm:$0x1] }
  0x4b   : > { %1568 = vrot.lane.b32.xlu0 %v1527_v62, %s4537_s26  ;;  %v4737_v62 = vld [vmem:[%s4606_s23 + $0x60] sm:$0xff]   ;;  %v4407_v33 = vld [vmem:[%s4606_s23 + $0x28] sm:$0xff]  }
  0x4c   : > { %v686_v13 = vor.u32 %v684_v59, %v683_v2  ;;  %v765_v15 = vshrl.u32 %v4737_v62, 16  ;;  %v804_v24 = vld [vmem:[#allocation2 + $0x18] sm:$0xff]  ;;  %v4399_v59 = vld [vmem:[%s4606_s23 + $0x20] sm:$0xff]   ;;  %v4427_v2 = vld [vmem:[%s4606_s23 + $0x8] sm:$0xff]   ;;  %v2008_v7 = vor.u32 %v2007_v34, %v2003_v23 }
  0x4e   : > { %2540 = vrot.lane.b32.xlu1 %v4383_v6, %s4537_s26  ;;  %v1534_v6 = vor.u32 %v1532_v29, %v1531_v38  ;;  %v805_v29 = vsel %vm4732_vm12, %v686_v13, %v804_v24  ;;  %v768_v38 = vshll.u32 %v4737_v62, 16  ;;  %v767_v41 = vrot.slane %v765_v15, 7  ;;  %v4826_v62 = vld [vmem:[%s4606_s23 + $0x30] sm:$0xff]  }
  0x4f   : > { %2015 = vrot.lane.b32.xlu0 %v1924_v9, %s4534_s24  ;;  %v837_v9 = vld [vmem:[#allocation2 + $0x120] sm:$0xff]  ;;  %806 = vst [vmem:[#allocation2 + $0x18] sm:$0xff] %v805_v29  ;;  %v1149_v15 = vshrl.u32 %v4802_v49, 16  ;;  %v2249_v24 = vshrl.u32 %v4833_v3, 16  ;;  %v1940_v34 = vshrl.u32 %v4826_v62, 16 }
  0x50   : > { %v838_v12 = vsel %vm4732_vm12, %v763_v1, %v837_v9  ;;  %v770_v60 = vor.u32 %v768_v38, %v767_v41  ;;  %v477_v1 = vld [vmem:[#allocation2 + $0x20] sm:$0x1]  ;;  %v4434_v41 = vld [vmem:[%s5983_s1 + $0x18] sm:$0xff]   ;;  %v461_v49 = vld [vmem:[#allocation2 + $0x140] sm:$0x80] }
  0x51   : > { %839 = vst [vmem:[#allocation2 + $0x120] sm:$0xff] %v838_v12  ;;  %v1459_v12 = vshrl.u32 %v4818_v50, 16  ;;  %v4892_v50 = vld [vmem:[%s4606_s23 + $0x38] sm:$0xff]  }
  0x52   : > { %2322 = vrot.lane.b32.xlu1 %v2233_v19, %s4536_s25  ;;  %v458_v19 = vld [vmem:[#allocation2 + $0x128] sm:$0x80] }
  0x53   : > { %960 = vrot.lane.b32.xlu0 %v4386_v20, %s4534_s24  ;;  %v510_v20 = vld [vmem:[#allocation2 + $0x128] sm:$0x1]  ;;  %v459_v25 = vsel %vm4745_vm13, 0, %v458_v19  ;;  %v1153_v19 = vrot.slane %v1151_v36, 1  ;;  %v1461_v29 = vrot.slane %v1459_v12, 7  ;;  %v4916_v12 = vld [vmem:[%s4606_s23 + $0x30] sm:$0xff]  }
  0x54   : > { %460 = vst [vmem:[#allocation2 + $0x128] sm:$0x80] %v459_v25  ;;  %v511_v30 = vsel %vm4762_vm14, 0, %v510_v20  ;;  %v1541_v20 = vor.u32 %v1539_v28, %v1538_v48  ;;  %v4431_v25 = vld [vmem:[%s5983_s1 + $0x58] sm:$0xff]   ;;  %v4863_v28 = vld [vmem:[%s4606_s23 + $0x28] sm:$0xff]   ;;  %v4436_v48 = vld [vmem:[%s5983_s1 + $0x60] sm:$0xff]  }
  0x55   : > { %512 = vst [vmem:[#allocation2 + $0x128] sm:$0x1] %v511_v30  ;;  %v274_v30 = vsel %vm4577_vm2, 0, %v273_v27  ;;  %v1466_v46 = vshrl.u32 %v4863_v28, 16  ;;  %v1154_v18 = vor.u32 %v1153_v19, %v1149_v15  ;;  %v1469_v42 = vshll.u32 %v4863_v28, 16  ;;  %v4443_v15 = vld [vmem:[%s5983_s1 + $0x28] sm:$0xff]  }
  0x56   : > { %1229 = vrot.lane.b32.xlu1 %v1140_v31, %s4536_s25  ;;  %v4420_v31 = vld [vmem:[%s4606_s23 + $0x60] sm:$0xff]   ;;  %275 = vst [vmem:[#allocation2 + $0x30] sm:$0x1] %v274_v30  ;;  %v4445_v19 = vld [vmem:[%s5983_s1 + $0x70] sm:$0xff]  }
  0x57   : > { %1546 = vrot.lane.b32.xlu0 %v1450_v35, %s4537_s26  ;;  %v4780_v35 = vld [vmem:[%s4606_s23 + $0x28] sm:$0xff]   ;;  %1781 = vst.msk [vmem:[#allocation2 + $0x128] sm:$0xff] %vm262_vm6, %v4420_v31  ;;  %v328_v31 = vld [vmem:[#allocation2 + $0x30] sm:$0x80] }
  0x58   : > { %v1933_v52 = vshrl.u32 %v4780_v35, 16  ;;  %v1935_v57 = vshll.u32 %v4780_v35, 16  ;;  %v329_v35 = vsel %vm4586_vm5, 0, %v328_v31 }
  0x59   : > { %330 = vst [vmem:[#allocation2 + $0x30] sm:$0x80] %v329_v35 }
  0x5a   : > { %2346 = vrot.lane.b32.xlu1 %v2317_v43, %s4536_s25  ;;  %v4421_v43 = vld [vmem:[%s5983_s1 + $0x48] sm:$0xff]   ;;  %v1937_v9 = vrot.slane %v1935_v57, 1  ;;  %v513_v57 = vld [vmem:[#allocation2 + $0x140] sm:$0x1] }
  0x5b   : > { %2518 = vrot.lane.b32.xlu0 %v4390_v40, %s4537_s26  ;;  %v411_v40 = vld [vmem:[#allocation2 + $0x138] sm:$0x1]  ;;  %4146 = vmatprep.subr.bf16.mxu0 %v4421_v43 }
  0x5c   : > { %v412_v45 = vsel %vm4698_vm10, 0, %v411_v40  ;;  %4311 = vmatprep.subr.bf16.mxu1 %v4421_v43  ;;  %4147 = vmatpush3.bf16.msra.mxu0 %v4424_v53  ;;  %v1938_v23 = vor.u32 %v1937_v9, %v1933_v52  ;;  %v4432_v40 = vld [vmem:[%s4606_s23 + $0x8] sm:$0xff]   ;;  %v2251_v43 = vrot.slane %v2249_v24, 7  ;;  %v1464_v52 = vor.u32 %v1462_v8, %v1461_v29  ;;  %v309_v29 = vld [vmem:[#allocation2 + $0x150] sm:$0x1] }
  0x5d   : > { %413 = vst [vmem:[#allocation2 + $0x138] sm:$0x1] %v412_v45  ;;  %4319 = vmatpush3.bf16.msra.mxu1 %v4424_v53  ;;  %v1156_v45 = vshrl.u32 %v4854_v22, 16  ;;  %v688_v47 = vshrl.u32 %v4432_v40, 16  ;;  %v1160_v53 = vrot.slane %v1158_v44, 1  ;;  %v691_v61 = vshll.u32 %v4432_v40, 16 }
  0x5e   : > { %1253 = vrot.lane.b32.xlu1 %v1224_v58, %s4536_s25  ;;  %v4426_v58 = vld [vmem:[%s5983_s1 + $0x50] sm:$0xff]   ;;  %v4441_v9 = vld [vmem:[%s5983_s1 + $0x68] sm:$0xff]   ;;  %v4961_v44 = vld [vmem:[%s4606_s23 + $0x40] sm:$0xff]  }
  0x5f   : > { %1570 = vrot.lane.b32.xlu0 %v1534_v6, %s4537_s26  ;;  %4148 = vmatprep.subr.bf16.mxu0 %v4426_v58  ;;  %v478_v6 = vsel %vm4762_vm14, 0, %v477_v1  ;;  %v690_v36 = vrot.slane %v688_v47, 7  ;;  %v1468_v1 = vrot.slane %v1466_v46, 7  ;;  %v4953_v40 = vld [vmem:[%s4606_s23 + $0x68] sm:$0xff]   ;;  %v4450_v46 = vld [vmem:[%s5983_s1 + $0x78] sm:$0xff]  }
  0x60   : > { %4312 = vmatprep.subr.bf16.mxu1 %v4426_v58  ;;  %479 = vst [vmem:[#allocation2 + $0x20] sm:$0x1] %v478_v6  ;;  %4149 = vmatpush3.bf16.msra.mxu0 %v4429_v54  ;;  %v378_v58 = vld [vmem:[#allocation2 + $0x30] sm:$0x1] }
  0x61   : > { %1770 = vst.msk [vmem:[#allocation2 + $0x20] sm:$0xff] %vm262_vm6, %v4427_v2  ;;  %4320 = vmatpush3.bf16.msra.mxu1 %v4429_v54  ;;  %4150 = vmatprep.subr.bf16.mxu0 %v4431_v25  ;;  %v4905_v2 = vld [vmem:[%s4606_s23 + $0x38] sm:$0xff]   ;;  %v4410_v6 = vld [vmem:[%s4606_s23 + $0x30] sm:$0xff]   ;;  %v1161_v54 = vor.u32 %v1160_v53, %v1156_v45  ;;  %v1471_v30 = vor.u32 %v1469_v42, %v1468_v1  ;;  %v772_v53 = vshrl.u32 %v4953_v40, 16 }
  0x62   : > { %2542 = vrot.lane.b32.xlu1 %v4393_v11, %s4537_s26  ;;  %v2245_v11 = vshll.u32 %v4783_v37, 16  ;;  %4313 = vmatprep.subr.bf16.mxu1 %v4431_v25  ;;  %v2259_v24 = vshll.u32 %v4905_v2, 16  ;;  %v1165_v25 = vshll.u32 %v4916_v12, 16 }
  0x63   : > { %2017 = vrot.lane.b32.xlu0 %v1931_v21, %s4534_s24  ;;  %v1942_v21 = vshll.u32 %v4826_v62, 16  ;;  %v4439_v62 = vld [vmem:[%s5983_s1 + $0x20] sm:$0xff]  }
  0x64   : > { %v840_v10 = vld [vmem:[#allocation2 + $0x138] sm:$0xff]  ;;  %v2247_v37 = vor.u32 %v2245_v11, %v2244_v14  ;;  %4151 = vmatpush3.bf16.msra.mxu0 %v4434_v41  ;;  %v1949_v11 = vshll.u32 %v4892_v50, 16  ;;  %v2256_v14 = vshrl.u32 %v4905_v2, 16  ;;  %v1167_v45 = vrot.slane %v1165_v25, 1 }
  0x65   : > { %v841_v13 = vsel %vm4732_vm12, %v770_v60, %v840_v10  ;;  %v1944_v38 = vrot.slane %v1942_v21, 1  ;;  %4321 = vmatpush3.bf16.msra.mxu1 %v4434_v41  ;;  %4152 = vmatprep.subr.bf16.mxu0 %v4436_v48  ;;  %v379_v60 = vsel %vm4698_vm10, 0, %v378_v58  ;;  %v4932_v21 = vld [vmem:[%s4606_s23 + $0x30] sm:$0xff]   ;;  %v774_v2 = vrot.slane %v772_v53, 7  ;;  %v5058_v53 = vld [vmem:[%s4606_s23 + $0x40] sm:$0xff]  }
  0x66   : > { %2324 = vrot.lane.b32.xlu1 %v2240_v39, %s4536_s25  ;;  %842 = vst [vmem:[#allocation2 + $0x138] sm:$0xff] %v841_v13  ;;  %v2252_v39 = vshll.u32 %v4833_v3, 16  ;;  %4314 = vmatprep.subr.bf16.mxu1 %v4436_v48  ;;  %380 = vst [vmem:[#allocation2 + $0x30] sm:$0x1] %v379_v60  ;;  %v267_v3 = vld [vmem:[#allocation2] sm:$0x1]  ;;  %v693_v13 = vor.u32 %v691_v61, %v690_v36 }
  0x67   : > { %962 = vrot.lane.b32.xlu0 %v4396_v32, %s4534_s24  ;;  %v4404_v32 = vld [vmem:[%s4606_s23 + $0x28] sm:$0xff]   ;;  %v1945_v63 = vor.u32 %v1944_v38, %v1940_v34  ;;  %v2258_v31 = vrot.slane %v2256_v14, 7  ;;  %v364_v34 = vld [vmem:[#allocation2 + $0x150] sm:$0x80]  ;;  %v1163_v38 = vshrl.u32 %v4916_v12, 16  ;;  %v2263_v60 = vshrl.u32 %v4961_v44, 16 }
  0x68   : > { %4153 = vmatpush3.bf16.msra.mxu0 %v4439_v62  ;;  %v2254_v10 = vor.u32 %v2252_v39, %v2251_v43  ;;  %v4948_v39 = vld [vmem:[%s4606_s23 + $0x40] sm:$0xff]   ;;  %v365_v28 = vsel %vm4586_vm5, 0, %v364_v34  ;;  %v4448_v41 = vld [vmem:[%s5983_s1 + $0x30] sm:$0xff]   ;;  %v1473_v43 = vshrl.u32 %v4932_v21, 16  ;;  %v4985_v61 = vld [vmem:[%s4606_s23 + $0x38] sm:$0xff]  }
  0x69   : > { %4322 = vmatpush3.bf16.msra.mxu1 %v4439_v62  ;;  %4154 = vmatprep.subr.bf16.mxu0 %v4441_v9  ;;  %366 = vst [vmem:[#allocation2 + $0x150] sm:$0x80] %v365_v28  ;;  %v1954_v58 = vshrl.u32 %v4948_v39, 16  ;;  %v4454_v12 = vld [vmem:[%s4606_s23 + $0x10] sm:$0xff]   ;;  %v5026_v34 = vld [vmem:[%s4606_s23 + $0x48] sm:$0xff]   ;;  %v1170_v28 = vshrl.u32 %v4985_v61, 16 }
  0x6a   : > { %1231 = vrot.lane.b32.xlu1 %v1147_v51, %s4536_s25  ;;  %v4437_v51 = vld [vmem:[%s4606_s23 + $0x68] sm:$0xff]   ;;  %4315 = vmatprep.subr.bf16.mxu1 %v4441_v9  ;;  %v1168_v9 = vor.u32 %v1167_v45, %v1163_v38  ;;  %v4440_v45 = vld [vmem:[%s4606_s23 + $0x40] sm:$0xff]  }
  0x6b   : > { %1548 = vrot.lane.b32.xlu0 %v1457_v56, %s4537_s26  ;;  %v462_v56 = vsel %vm4745_vm13, 0, %v461_v49  ;;  %v1476_v49 = vshll.u32 %v4932_v21, 16 }
  0x6c   : > { %463 = vst [vmem:[#allocation2 + $0x140] sm:$0x80] %v462_v56  ;;  %4155 = vmatpush3.bf16.msra.mxu0 %v4443_v15  ;;  %v4425_v56 = vld [vmem:[%s4606_s23 + $0x38] sm:$0xff]  }
  0x6d   : > { %v807_v22 = vld [vmem:[#allocation2 + $0x30] sm:$0xff]  ;;  %4323 = vmatpush3.bf16.msra.mxu1 %v4443_v15  ;;  %4156 = vmatprep.subr.bf16.mxu0 %v4445_v19 }
  0x6e   : > { %2520 = vrot.lane.b32.xlu1 %v4399_v59, %s4537_s26  ;;  %v514_v59 = vsel %vm4762_vm14, 0, %v513_v57  ;;  %v808_v27 = vsel %vm4732_vm12, %v693_v13, %v807_v22  ;;  %4316 = vmatprep.subr.bf16.mxu1 %v4445_v19  ;;  %v1475_v57 = vrot.slane %v1473_v43, 7  ;;  %v2059_v19 = vld [vmem:[#allocation2 + $0x8] sm:$0xff] }
  0x6f   : > { %2039 = vrot.lane.b32.xlu0 %v2008_v7, %s4534_s24  ;;  %515 = vst [vmem:[#allocation2 + $0x140] sm:$0x1] %v514_v59  ;;  %v268_v7 = vsel %vm4577_vm2, 0, %v267_v3  ;;  %809 = vst [vmem:[#allocation2 + $0x30] sm:$0xff] %v808_v27  ;;  %v1956_v59 = vshll.u32 %v4948_v39, 16  ;;  %v775_v3 = vshll.u32 %v4953_v40, 16 }
  0x70   : > { %1782 = vst.msk [vmem:[#allocation2 + $0x140] sm:$0xff] %vm262_vm6, %v4437_v51  ;;  %269 = vst [vmem:[#allocation2] sm:$0x1] %v268_v7  ;;  %4157 = vmatpush3.bf16.msra.mxu0 %v4448_v41  ;;  %v428_v7 = vld [vmem:[#allocation2 + $0x38] sm:$0x80]  ;;  %v1478_v13 = vor.u32 %v1476_v49, %v1475_v57 }
  0x71   : > { %316 = vst.msk [vmem:[#allocation2] sm:$0xff] %vm315_vm0, %v4535_v16  ;;  %4324 = vmatpush3.bf16.msra.mxu1 %v4448_v41  ;;  %4158 = vmatprep.subr.bf16.mxu0 %v4450_v46  ;;  %v1958_v14 = vrot.slane %v1956_v59, 1  ;;  %v777_v25 = vor.u32 %v775_v3, %v774_v2  ;;  %v5036_v41 = vld [vmem:[%s4606_s23 + $0x48] sm:$0xff]   ;;  %v516_v57 = vld [vmem:[#allocation2 + $0x158] sm:$0x1]  ;;  %v4460_v2 = vld [vmem:[%s4606_s23 + $0x70] sm:$0xff]  }
  0x72   : > { %1572 = vrot.lane.b32.xlu1 %v1541_v20, %s4537_s26  ;;  %318 = vst.msk [vmem:[#allocation2] sm:$0xff] %vm317_vm15, %v4535_v16  ;;  %v1947_v20 = vshrl.u32 %v4892_v50, 16  ;;  %4317 = vmatprep.subr.bf16.mxu1 %v4450_v46  ;;  %v2261_v50 = vor.u32 %v2259_v24, %v2258_v31  ;;  %v1172_v24 = vshll.u32 %v4985_v61, 16  ;;  %v331_v31 = vld [vmem:[#allocation2 + $0x48] sm:$0x80] }
  0x73   : > { %2019 = vrot.lane.b32.xlu0 %v1938_v23, %s4534_s24  ;;  %v1951_v23 = vrot.slane %v1949_v11, 1  ;;  %v480_v11 = vld [vmem:[#allocation2 + $0x38] sm:$0x1] }
  0x74   : > { %v481_v15 = vsel %vm4762_vm14, 0, %v480_v11  ;;  %v1174_v46 = vrot.slane %v1172_v24, 1  ;;  %v1179_v11 = vshll.u32 %v5058_v53, 16 }
  0x75   : > { %v1952_v42 = vor.u32 %v1951_v23, %v1947_v20  ;;  %v4433_v20 = vld [vmem:[%s4606_s23 + $0x38] sm:$0xff]   ;;  %482 = vst [vmem:[#allocation2 + $0x38] sm:$0x1] %v481_v15  ;;  %v2266_v23 = vshll.u32 %v4961_v44, 16 }
  0x76   : > { %2326 = vrot.lane.b32.xlu1 %v2247_v37, %s4536_s25  ;;  %v4417_v37 = vld [vmem:[%s4606_s23 + $0x30] sm:$0xff]   ;;  %v1175_v3 = vor.u32 %v1174_v46, %v1170_v28 }
  0x77   : > { %964 = vrot.lane.b32.xlu0 %v4404_v32, %s4534_s24  ;;  %v310_v32 = vsel %vm4577_vm2, 0, %v309_v29  ;;  %v2265_v29 = vrot.slane %v2263_v60, 7  ;;  %v517_v60 = vsel %vm4762_vm14, 0, %v516_v57 }
  0x78   : > { %311 = vst [vmem:[#allocation2 + $0x150] sm:$0x1] %v310_v32  ;;  %v1959_v32 = vor.u32 %v1958_v14, %v1954_v58  ;;  %518 = vst [vmem:[#allocation2 + $0x158] sm:$0x1] %v517_v60  ;;  %v4447_v14 = vld [vmem:[%s4606_s23 + $0x40] sm:$0xff]   ;;  %v5136_v60 = vld [vmem:[%s4606_s23 + $0x48] sm:$0xff]  }
  0x79   : > { %v322_v47 = vld [vmem:[#allocation2] sm:$0x80]  ;;  %v372_v48 = vld [vmem:[#allocation2] sm:$0x1] }
  0x7a   : > { %1233 = vrot.lane.b32.xlu1 %v1154_v18, %s4536_s25  ;;  %v323_v51 = vsel %vm4586_vm5, 0, %v322_v47 }
  0x7b   : > { %1550 = vrot.lane.b32.xlu0 %v1464_v52, %s4537_s26  ;;  %v373_v52 = vsel %vm4698_vm10, 0, %v372_v48  ;;  %324 = vst [vmem:[#allocation2] sm:$0x80] %v323_v51  ;;  %v2268_v48 = vor.u32 %v2266_v23, %v2265_v29  ;;  %v5092_v29 = vld [vmem:[%s4606_s23 + $0x50] sm:$0xff]  }
  0x7c   : > { %374 = vst [vmem:[#allocation2] sm:$0x1] %v373_v52  ;;  %v1963_v52 = vshll.u32 %v5026_v34, 16 }
  0x7e   : > { %2522 = vrot.lane.b32.xlu1 %v4407_v33, %s4537_s26  ;;  %v4452_v33 = vld [vmem:[%s5983_s1 + $0x38] sm:$0xff]  }
  0x7f   : > { %2021 = vrot.lane.b32.xlu0 %v1945_v63, %s4534_s24  ;;  %v414_v36 = vld [vmem:[#allocation2 + $0x150] sm:$0x1]  ;;  %4159 = vmatpush3.bf16.msra.mxu0 %v4452_v33  ;;  %v4990_v63 = vld [vmem:[%s4606_s23 + $0x38] sm:$0xff]  }
  0x80   : > { %v415_v1 = vsel %vm4698_vm10, 0, %v414_v36  ;;  %4325 = vmatpush3.bf16.msra.mxu1 %v4452_v33  ;;  %v1483_v51 = vshll.u32 %v4990_v63, 16  ;;  %v2095_v33 = vld [vmem:[#allocation2 + $0x128] sm:$0xff]  ;;  %v2270_v36 = vshrl.u32 %v5036_v41, 16 }
  0x81   : > { %416 = vst [vmem:[#allocation2 + $0x150] sm:$0x1] %v415_v1 }
  0x82   : > { %2328 = vrot.lane.b32.xlu1 %v2254_v10, %s4536_s25  ;;  %v429_v10 = vsel %vm4745_vm13, 0, %v428_v7  ;;  %v1961_v7 = vshrl.u32 %v5026_v34, 16 }
  0x83   : > { %966 = vrot.lane.b32.xlu0 %v4410_v6, %s4534_s24  ;;  %430 = vst [vmem:[#allocation2 + $0x38] sm:$0x80] %v429_v10  ;;  %v1592_v58 = vld [vmem:[#allocation2] sm:$0xff]  ;;  %v2273_v10 = vshll.u32 %v5036_v41, 16 }
  0x84   : > { %v977_v8 = vpop.permute.xlu0 %976  ;;  %v955_v35 = vpop.permute.xlu1 %954  ;;  %1771 = vst.msk [vmem:[#allocation2 + $0x38] sm:$0xff] %vm262_vm6, %v4454_v12 }
  0x85   : > { %1011 = vst.msk [vmem:[#allocation2 + $0x120] sm:$0xff] %vm315_vm0, %v977_v8  ;;  %1000 = vst.msk [vmem:[#allocation2 + $0x18] sm:$0xff] %vm315_vm0, %v955_v35  ;;  %v1480_v8 = vshrl.u32 %v4990_v63, 16  ;;  %v5070_v63 = vld [vmem:[%s4606_s23 + $0x40] sm:$0xff]  }
  0x86   : > { %1235 = vrot.lane.b32.xlu1 %v1161_v54, %s4536_s25 }
  0x87   : > { %1552 = vrot.lane.b32.xlu0 %v1471_v30, %s4537_s26  ;;  %v276_v30 = vld [vmem:[#allocation2 + $0x48] sm:$0x1]  ;;  %v1482_v49 = vrot.slane %v1480_v8, 7 }
  0x88   : > { %v979_v18 = vpop.permute.xlu0 %978  ;;  %v277_v35 = vsel %vm4577_vm2, 0, %v276_v30  ;;  %v843_v40 = vld [vmem:[#allocation2 + $0x150] sm:$0xff]  ;;  %v2272_v30 = vrot.slane %v2270_v36, 7 }
  0x89   : > { %1012 = vst.msk [vmem:[#allocation2 + $0x138] sm:$0xff] %vm315_vm0, %v979_v18  ;;  %278 = vst [vmem:[#allocation2 + $0x48] sm:$0x1] %v277_v35  ;;  %v844_v18 = vsel %vm4732_vm12, %v777_v25, %v843_v40  ;;  %v312_v35 = vld [vmem:[#allocation2 + $0x168] sm:$0x1] }
  0x8a   : > { %2524 = vrot.lane.b32.xlu1 %v4417_v37, %s4537_s26  ;;  %v332_v37 = vsel %vm4586_vm5, 0, %v331_v31  ;;  %845 = vst [vmem:[#allocation2 + $0x150] sm:$0xff] %v844_v18  ;;  %v5100_v31 = vld [vmem:[%s4606_s23 + $0x50] sm:$0xff]   ;;  %v313_v28 = vsel %vm4577_vm2, 0, %v312_v35  ;;  %v1970_v18 = vshll.u32 %v5092_v29, 16 }
  0x8b   : > { %2023 = vrot.lane.b32.xlu0 %v1952_v42, %s4534_s24  ;;  %333 = vst [vmem:[#allocation2 + $0x48] sm:$0x80] %v332_v37  ;;  %v5044_v42 = vld [vmem:[%s4606_s23 + $0x10] sm:$0xff]   ;;  %v367_v37 = vld [vmem:[#allocation2 + $0x168] sm:$0x80] }
  0x8c   : > { %v4987_v62 = vpop.permute.xlu1 %2033  ;;  %v695_v1 = vshrl.u32 %v5044_v42, 16  ;;  %v1306_v41 = vld [vmem:[#allocation2 + $0x120] sm:$0xff]  ;;  %314 = vst [vmem:[#allocation2 + $0x168] sm:$0x1] %v313_v28  ;;  %v5173_v28 = vld [vmem:[%s4606_s23 + $0x50] sm:$0xff]  }
  0x8d   : > { %v2010_v6 = vpop.permute.xlu0 %2009 }
  0x8e   : > { %2330 = vrot.lane.b32.xlu1 %v2261_v50, %s4536_s25  ;;  %v2060_v38 = vsel %vm5007_vm3, %v2010_v6, %v2059_v19  ;;  %v1485_v6 = vor.u32 %v1483_v51, %v1482_v49  ;;  %v698_v19 = vshll.u32 %v5044_v42, 16  ;;  %v697_v25 = vrot.slane %v695_v1, 7 }
  0x8f   : > { %968 = vrot.lane.b32.xlu0 %v4425_v56, %s4534_s24  ;;  %v464_v56 = vld [vmem:[#allocation2 + $0x158] sm:$0x80]  ;;  %v368_v42 = vsel %vm4586_vm5, 0, %v367_v37  ;;  %v2275_v49 = vor.u32 %v2273_v10, %v2272_v30  ;;  %v1490_v51 = vshll.u32 %v5070_v63, 16  ;;  %v431_v10 = vld [vmem:[#allocation2 + $0x50] sm:$0x80] }
  0x90   : > { %v5002_v54 = vpop.permute.xlu1 %1247  ;;  %v465_v59 = vsel %vm4745_vm13, 0, %v464_v56  ;;  %v381_v12 = vld [vmem:[#allocation2 + $0x48] sm:$0x1]  ;;  %v700_v46 = vor.u32 %v698_v19, %v697_v25  ;;  %369 = vst [vmem:[#allocation2 + $0x168] sm:$0x80] %v368_v42  ;;  %v5155_v19 = vld [vmem:[%s4606_s23 + $0x58] sm:$0xff]  }
  0x91   : > { %v5011_v22 = vpop.permute.xlu0 %2011  ;;  %466 = vst [vmem:[#allocation2 + $0x158] sm:$0x80] %v465_v59  ;;  %v382_v15 = vsel %vm4698_vm10, 0, %v381_v12  ;;  %v1307_v57 = vsel %vm5111_vm8, %v5002_v54, %v1306_v41  ;;  %v1968_v59 = vshrl.u32 %v5092_v29, 16  ;;  %v2062_v12 = vld [vmem:[#allocation2 + $0x20] sm:$0xff]  ;;  %v1494_v30 = vshrl.u32 %v5136_v60, 16 }
  0x92   : > { %1237 = vrot.lane.b32.xlu1 %v1168_v9, %s4536_s25  ;;  %v1965_v9 = vrot.slane %v1963_v52, 1  ;;  %1783 = vst.msk [vmem:[#allocation2 + $0x158] sm:$0xff] %vm262_vm6, %v4460_v2  ;;  %383 = vst [vmem:[#allocation2 + $0x48] sm:$0x1] %v382_v15  ;;  %v2277_v52 = vshrl.u32 %v5100_v31, 16  ;;  %v1972_v2 = vrot.slane %v1970_v18, 1 }
  0x93   : > { %1554 = vrot.lane.b32.xlu0 %v1478_v13, %s4537_s26  ;;  %v5152_v15 = vld [vmem:[%s4606_s23 + $0x58] sm:$0xff]   ;;  %v2284_v18 = vshrl.u32 %v5155_v19, 16 }
  0x94   : > { %v2319_v39 = vpop.permute.xlu1 %2318  ;;  %v1966_v34 = vor.u32 %v1965_v9, %v1961_v7  ;;  %v2280_v7 = vshll.u32 %v5100_v31, 16  ;;  %v5162_v31 = vld [vmem:[%s4606_s23 + $0x50] sm:$0xff]   ;;  %v1973_v41 = vor.u32 %v1972_v2, %v1968_v59  ;;  %v5197_v59 = vld [vmem:[%s4606_s23 + $0x18] sm:$0xff]  }
  0x95   : > { %v2365_v43 = vsel %vm5019_vm7, %v2319_v39, %v2060_v38  ;;  %v957_v44 = vpop.permute.xlu0 %956  ;;  %v1177_v39 = vshrl.u32 %v5058_v53, 16  ;;  %v1193_v42 = vshll.u32 %v5162_v31, 16 }
  0x96   : > { %2366 = vst [vmem:[#allocation2 + $0x8] sm:$0xff] %v2365_v43  ;;  %1001 = vst.msk [vmem:[#allocation2 + $0x30] sm:$0xff] %vm315_vm0, %v957_v44  ;;  %2526 = vrot.lane.b32.xlu1 %v4433_v20, %s4537_s26  ;;  %v2096_v20 = vsel %vm5007_vm3, %v4987_v62, %v2095_v33  ;;  %v1487_v62 = vshrl.u32 %v5070_v63, 16  ;;  %v4453_v44 = vld [vmem:[%s4606_s23 + $0x48] sm:$0xff]  }
  0x97   : > { %2025 = vrot.lane.b32.xlu0 %v1959_v32, %s4534_s24  ;;  %v5103_v32 = vld [vmem:[%s4606_s23 + $0x48] sm:$0xff]  }
  0x98   : > { %v5060_v50 = vpop.permute.xlu1 %1225  ;;  %v1489_v53 = vrot.slane %v1487_v62, 7  ;;  %v1186_v56 = vshll.u32 %v5103_v32, 16  ;;  %v1184_v9 = vshrl.u32 %v5103_v32, 16  ;;  %v417_v62 = vld [vmem:[#allocation2 + $0x168] sm:$0x1]  ;;  %v1504_v32 = vshll.u32 %v5173_v28, 16 }
  0x99   : > { %v5066_v61 = vpop.permute.xlu0 %2035  ;;  %v418_v37 = vsel %vm4698_vm10, 0, %v417_v62 }
  0x9a   : > { %2332 = vrot.lane.b32.xlu1 %v2268_v48, %s4536_s25  ;;  %v5121_v48 = vld [vmem:[%s4606_s23 + $0x70] sm:$0xff]   ;;  %419 = vst [vmem:[#allocation2 + $0x168] sm:$0x1] %v418_v37  ;;  %v486_v37 = vld [vmem:[#allocation2 + $0x68] sm:$0x1] }
  0x9b   : > { %970 = vrot.lane.b32.xlu0 %v4440_v45, %s4534_s24  ;;  %v1181_v45 = vrot.slane %v1179_v11, 1  ;;  %v4470_v11 = vld [vmem:[%s4606_s23 + $0x18] sm:$0xff]  }
  0x9c   : > { %v1543_v13 = vpop.permute.xlu1 %1542 }
  0x9d   : > { %v5089_v23 = vsel %vm5048_vm11, %v1543_v13, %v1592_v58  ;;  %v2343_v24 = vpop.permute.xlu0 %2342  ;;  %v810_v58 = vld [vmem:[#allocation2 + $0x48] sm:$0xff]  ;;  %v1182_v63 = vor.u32 %v1181_v45, %v1177_v39  ;;  %v1492_v13 = vor.u32 %v1490_v51, %v1489_v53  ;;  %v782_v39 = vshll.u32 %v5121_v48, 16 }
  0x9e   : > { %1594 = vst [vmem:[#allocation2] sm:$0xff] %v5089_v23  ;;  %v2401_v8 = vsel %vm5019_vm7, %v2343_v24, %v2096_v20  ;;  %1239 = vrot.lane.b32.xlu1 %v1175_v3, %s4536_s25  ;;  %v811_v1 = vsel %vm4732_vm12, %v700_v46, %v810_v58  ;;  %v779_v3 = vshrl.u32 %v5121_v48, 16  ;;  %v432_v20 = vsel %vm4745_vm13, 0, %v431_v10  ;;  %v483_v24 = vld [vmem:[#allocation2 + $0x50] sm:$0x1]  ;;  %v1273_v10 = vld [vmem:[#allocation2 + $0x18] sm:$0xff] }
  0x9f   : > { %2402 = vst [vmem:[#allocation2 + $0x128] sm:$0xff] %v2401_v8  ;;  %1556 = vrot.lane.b32.xlu0 %v1485_v6, %s4537_s26  ;;  %812 = vst [vmem:[#allocation2 + $0x48] sm:$0xff] %v811_v1  ;;  %v2279_v6 = vrot.slane %v2277_v52, 7  ;;  %v4458_v8 = vld [vmem:[%s4606_s23 + $0x48] sm:$0xff]   ;;  %v2063_v45 = vsel %vm5007_vm3, %v5011_v22, %v2062_v12  ;;  %v334_v48 = vld [vmem:[#allocation2 + $0x60] sm:$0x80] }
  0xa0   : > { %v2515_v38 = vpop.permute.xlu1 %2514  ;;  %433 = vst [vmem:[#allocation2 + $0x50] sm:$0x80] %v432_v20  ;;  %v4462_v52 = vld [vmem:[%s4606_s23 + $0x50] sm:$0xff]   ;;  %v335_v22 = vsel %vm4586_vm5, 0, %v334_v48  ;;  %v1501_v58 = vshrl.u32 %v5173_v28, 16 }
  0xa1   : > { %2560 = vst.msk [vmem:[#allocation2 + $0x8] sm:$0xff] %vm522_vm9, %v2515_v38  ;;  %v981_v43 = vpop.permute.xlu0 %980  ;;  %v781_v38 = vrot.slane %v779_v3, 7  ;;  %336 = vst [vmem:[#allocation2 + $0x60] sm:$0x80] %v335_v22  ;;  %v1975_v3 = vshrl.u32 %v5152_v15, 16 }
  0xa2   : > { %1013 = vst.msk [vmem:[#allocation2 + $0x150] sm:$0xff] %vm315_vm0, %v981_v43  ;;  %2528 = vrot.lane.b32.xlu1 %v4447_v14, %s4537_s26  ;;  %v1188_v14 = vrot.slane %v1186_v56, 1  ;;  %v1497_v43 = vshll.u32 %v5136_v60, 16  ;;  %v2282_v56 = vor.u32 %v2280_v7, %v2279_v6  ;;  %v1496_v60 = vrot.slane %v1494_v30, 7  ;;  %v337_v22 = vld [vmem:[#allocation2 + $0x78] sm:$0x80] }
  0xa3   : > { %2027 = vrot.lane.b32.xlu0 %v1966_v34, %s4534_s24  ;;  %v484_v34 = vsel %vm4762_vm14, 0, %v483_v24  ;;  %v2287_v6 = vshll.u32 %v5155_v19, 16  ;;  %v1191_v7 = vshrl.u32 %v5162_v31, 16  ;;  %v2286_v24 = vrot.slane %v2284_v18, 7  ;;  %v285_v19 = vld [vmem:[#allocation2 + $0x90] sm:$0x1] }
  0xa4   : > { %v5132_v33 = vpop.permute.xlu1 %1249  ;;  %485 = vst [vmem:[#allocation2 + $0x50] sm:$0x1] %v484_v34  ;;  %v1189_v12 = vor.u32 %v1188_v14, %v1184_v9  ;;  %v434_v9 = vld [vmem:[#allocation2 + $0x68] sm:$0x80]  ;;  %v4477_v14 = vld [vmem:[%s4606_s23 + $0x20] sm:$0xff]   ;;  %v1499_v30 = vor.u32 %v1497_v43, %v1496_v60  ;;  %v5224_v34 = vld [vmem:[%s4606_s23 + $0x58] sm:$0xff]  }
  0xa5   : > { %v1567_v36 = vpop.permute.xlu0 %1566  ;;  %1772 = vst.msk [vmem:[#allocation2 + $0x50] sm:$0xff] %vm262_vm6, %v4470_v11  ;;  %v487_v43 = vsel %vm4762_vm14, 0, %v486_v37  ;;  %v440_v28 = vld [vmem:[#allocation2 + $0x98] sm:$0x80] }
  0xa6   : > { %v5143_v54 = vsel %vm5048_vm11, %v1567_v36, %v1307_v57  ;;  %2334 = vrot.lane.b32.xlu1 %v2275_v49, %s4536_s25  ;;  %v784_v57 = vor.u32 %v782_v39, %v781_v38  ;;  %v5201_v36 = vld [vmem:[%s4606_s23 + $0x60] sm:$0xff]   ;;  %v1274_v39 = vsel %vm5111_vm8, %v5060_v50, %v1273_v10  ;;  %488 = vst [vmem:[#allocation2 + $0x68] sm:$0x1] %v487_v43 }
  0xa7   : > { %1630 = vst [vmem:[#allocation2 + $0x120] sm:$0xff] %v5143_v54  ;;  %972 = vrot.lane.b32.xlu0 %v4453_v44, %s4534_s24  ;;  %v1977_v44 = vshll.u32 %v5152_v15, 16  ;;  %v2291_v62 = vshrl.u32 %v5201_v36, 16  ;;  %v5229_v38 = vld [vmem:[%s4606_s23 + $0x20] sm:$0xff]   ;;  %v2294_v50 = vshll.u32 %v5201_v36, 16 }
  0xa8   : > { %v2539_v25 = vpop.permute.xlu1 %2538  ;;  %v2847_v29 = vld [vmem:[#allocation2 + $0x8] sm:$0xff]  ;;  %v437_v10 = vld [vmem:[#allocation2 + $0x80] sm:$0x80] }
  0xa9   : > { %2572 = vst.msk [vmem:[#allocation2 + $0x128] sm:$0xff] %vm522_vm9, %v2539_v25  ;;  %3118 = vmatprep.mubr.bf16.mxu0 %v2847_v29  ;;  %v5167_v35 = vpop.permute.xlu0 %2013  ;;  %v1979_v20 = vrot.slane %v1977_v44, 1  ;;  %v702_v25 = vshrl.u32 %v5197_v59, 16  ;;  %v1195_v29 = vrot.slane %v1193_v42, 1  ;;  %v4466_v44 = vld [vmem:[%s4606_s23 + $0x50] sm:$0xff]  }
  0xaa   : > { %1241 = vrot.lane.b32.xlu1 %v1182_v63, %s4536_s25  ;;  %3119 = vmatmul.mubr.bf16.vlgmr.msra.gmra.mrb[0].mxu0 %v5089_v23  ;;  %v279_v23 = vld [vmem:[#allocation2 + $0x60] sm:$0x1] }
  0xab   : > { %1558 = vrot.lane.b32.xlu0 %v1492_v13, %s4537_s26  ;;  %v280_v53 = vsel %vm4577_vm2, 0, %v279_v23  ;;  %v2098_v63 = vld [vmem:[#allocation2 + $0x140] sm:$0xff]  ;;  %v846_v13 = vld [vmem:[#allocation2 + $0x168] sm:$0xff]  ;;  %v704_v48 = vrot.slane %v702_v25, 7  ;;  %v2289_v25 = vor.u32 %v2287_v6, %v2286_v24  ;;  %v340_v6 = vld [vmem:[#allocation2 + $0x90] sm:$0x80] }
  0xac   : > { %v2321_v46 = vpop.permute.xlu1 %2320  ;;  %281 = vst [vmem:[#allocation2 + $0x60] sm:$0x1] %v280_v53  ;;  %v847_v15 = vsel %vm4732_vm12, %v784_v57, %v846_v13  ;;  %v1508_v57 = vshrl.u32 %v5224_v34, 16  ;;  %v4480_v13 = vld [vmem:[%s4606_s23 + $0x28] sm:$0xff]   ;;  %v341_v31 = vsel %vm4586_vm5, 0, %v340_v6 }
  0xad   : > { %v2368_v49 = vsel %vm5019_vm7, %v2321_v46, %v2063_v45  ;;  %v959_v51 = vpop.permute.xlu0 %958  ;;  %848 = vst [vmem:[#allocation2 + $0x168] sm:$0xff] %v847_v15  ;;  %v705_v45 = vshll.u32 %v5197_v59, 16  ;;  %v2099_v46 = vsel %vm5007_vm3, %v5066_v61, %v2098_v63  ;;  %v1980_v61 = vor.u32 %v1979_v20, %v1975_v3  ;;  %v467_v63 = vld [vmem:[#allocation2 + $0x170] sm:$0x80]  ;;  %v1309_v20 = vld [vmem:[#allocation2 + $0x138] sm:$0xff] }
  0xae   : > { %2369 = vst [vmem:[#allocation2 + $0x20] sm:$0xff] %v2368_v49  ;;  %1002 = vst.msk [vmem:[#allocation2 + $0x48] sm:$0xff] %vm315_vm0, %v959_v51  ;;  %2530 = vrot.lane.b32.xlu1 %v4458_v8, %s4537_s26  ;;  %v5217_v8 = vrot.slane %v1501_v58, 7  ;;  %v282_v49 = vld [vmem:[#allocation2 + $0x78] sm:$0x1]  ;;  %v338_v58 = vsel %vm4586_vm5, 0, %v337_v22 }
  0xaf   : > { %2029 = vrot.lane.b32.xlu0 %v1973_v41, %s4534_s24  ;;  %v283_v53 = vsel %vm4577_vm2, 0, %v282_v49  ;;  %v709_v59 = vshrl.u32 %v5229_v38, 16  ;;  %339 = vst [vmem:[#allocation2 + $0x78] sm:$0x80] %v338_v58  ;;  %v468_v3 = vsel %vm4745_vm13, 0, %v467_v63  ;;  %v438_v15 = vsel %vm4745_vm13, 0, %v437_v10 }
  0xb0   : > { %v5203_v1 = vpop.permute.xlu1 %1227  ;;  %v2883_v2 = vld [vmem:[#allocation2 + $0x128] sm:$0xff]  ;;  %284 = vst [vmem:[#allocation2 + $0x78] sm:$0x1] %v283_v53  ;;  %469 = vst [vmem:[#allocation2 + $0x170] sm:$0x80] %v468_v3  ;;  %v1506_v43 = vor.u32 %v1504_v32, %v5217_v8  ;;  %v712_v53 = vshll.u32 %v5229_v38, 16 }
  0xb1   : > { %3214 = vmatprep.mubr.bf16.mxu1 %v2883_v2  ;;  %v5208_v11 = vpop.permute.xlu0 %2037  ;;  %471 = vst.msk [vmem:[#allocation2 + $0x170] sm:$0xff] %vm317_vm15, %v4535_v16  ;;  %439 = vst [vmem:[#allocation2 + $0x80] sm:$0x80] %v438_v15  ;;  %v492_v8 = vld [vmem:[#allocation2 + $0x98] sm:$0x1]  ;;  %v4484_v32 = vld [vmem:[%s5983_s1 + $0x88] sm:$0xff]  }
  0xb2   : > { %2336 = vrot.lane.b32.xlu1 %v2282_v56, %s4536_s25  ;;  %3215 = vmatmul.mubr.bf16.vlgmr.msra.gmra.mrb[0].mxu1 %v5143_v54  ;;  %v435_v54 = vsel %vm4745_vm13, 0, %v434_v9  ;;  %v5256_v56 = vrot.slane %v2291_v62, 7  ;;  %v286_v62 = vsel %vm4577_vm2, 0, %v285_v19  ;;  %342 = vst [vmem:[#allocation2 + $0x90] sm:$0x80] %v341_v31  ;;  %v441_v22 = vsel %vm4745_vm13, 0, %v440_v28  ;;  %vm5323_vm15 = vmand %vm525_vm1, %vm320_vm4 }
  0xb3   : > { %974 = vrot.lane.b32.xlu0 %v4462_v52, %s4534_s24  ;;  %436 = vst [vmem:[#allocation2 + $0x68] sm:$0x80] %v435_v54  ;;  %v384_v23 = vld [vmem:[#allocation2 + $0x60] sm:$0x1]  ;;  %v5287_v54 = vld [vmem:[%s4606_s23 + $0x28] sm:$0xff]   ;;  %v5355_v31 = vld [vmem:[%s4606_s23 + $0x30] sm:$0xff]  }
  0xb4   : > { %v1545_v41 = vpop.permute.xlu1 %1544  ;;  %v385_v52 = vsel %vm4698_vm10, 0, %v384_v23  ;;  %1773 = vst.msk [vmem:[#allocation2 + $0x68] sm:$0xff] %vm262_vm6, %v4477_v14  ;;  %v1196_v14 = vor.u32 %v1195_v29, %v1191_v7  ;;  %v4482_v7 = vld [vmem:[%s5983_s1 + $0x80] sm:$0xff]   ;;  %v1310_v29 = vsel %vm5111_vm8, %v5132_v33, %v1309_v20  ;;  %287 = vst [vmem:[#allocation2 + $0x90] sm:$0x1] %v286_v62  ;;  %v711_v33 = vrot.slane %v709_v59, 7 }
  0xb5   : > { %v5243_v18 = vsel %vm5048_vm11, %v1545_v41, %v1274_v39  ;;  %v2345_v42 = vpop.permute.xlu0 %2344  ;;  %386 = vst [vmem:[#allocation2 + $0x60] sm:$0x1] %v385_v52  ;;  %v4472_v39 = vld [vmem:[%s4606_s23 + $0x58] sm:$0xff]   ;;  %v1510_v41 = vrot.slane %v1508_v57, 7  ;;  %v716_v23 = vshrl.u32 %v5287_v54, 16  ;;  %4274 = vmatprep.subr.bf16.mxu1 %v4482_v7  ;;  %v493_v57 = vsel %vm4762_vm14, 0, %v492_v8 }
  0xb6   : > { %1597 = vst [vmem:[#allocation2 + $0x18] sm:$0xff] %v5243_v18  ;;  %v2404_v51 = vsel %vm5019_vm7, %v2345_v42, %v2099_v46  ;;  %1243 = vrot.lane.b32.xlu1 %v1189_v12, %s4536_s25  ;;  %v489_v12 = vld [vmem:[#allocation2 + $0x80] sm:$0x1]  ;;  %4275 = vmatpush3.bf16.msra.mxu1 %v4482_v7  ;;  %v719_v38 = vshll.u32 %v5287_v54, 16  ;;  %442 = vst [vmem:[#allocation2 + $0x98] sm:$0x80] %v441_v22  ;;  %v2296_v63 = vor.u32 %v2294_v50, %v5256_v56 }
  0xb7   : > { %2405 = vst [vmem:[#allocation2 + $0x140] sm:$0xff] %v2404_v51  ;;  %1560 = vrot.lane.b32.xlu0 %v1499_v30, %s4537_s26  ;;  %v490_v9 = vsel %vm4762_vm14, 0, %v489_v12  ;;  %v707_v30 = vor.u32 %v705_v45, %v704_v48  ;;  %v387_v42 = vld [vmem:[#allocation2 + $0x78] sm:$0x1]  ;;  %v4483_v48 = vld [vmem:[%s4606_s23 + $0x30] sm:$0xff]   ;;  %4276 = vmatprep.subr.bf16.mxu1 %v4484_v32  ;;  %v4476_v56 = vld [vmem:[%s4606_s23 + $0x60] sm:$0xff]  }
  0xb8   : > { %v2517_v60 = vpop.permute.xlu1 %2516  ;;  %491 = vst [vmem:[#allocation2 + $0x80] sm:$0x1] %v490_v9  ;;  %v388_v51 = vsel %vm4698_vm10, 0, %v387_v42  ;;  %494 = vst [vmem:[#allocation2 + $0x98] sm:$0x1] %v493_v57  ;;  %v1276_v7 = vld [vmem:[#allocation2 + $0x30] sm:$0xff] }
  0xb9   : > { %2561 = vst.msk [vmem:[#allocation2 + $0x20] sm:$0xff] %vm522_vm9, %v2517_v60  ;;  %v983_v2 = vpop.permute.xlu0 %982  ;;  %389 = vst [vmem:[#allocation2 + $0x78] sm:$0x1] %v388_v51  ;;  %v4479_v60 = vld [vmem:[%s4606_s23 + $0x78] sm:$0xff]   ;;  %v527_v3 = vld [vmem:[#allocation2 + $0x10] sm:$0x80] }
  0xba   : > { %1014 = vst.msk [vmem:[#allocation2 + $0x168] sm:$0xff] %vm315_vm0, %v983_v2  ;;  %2532 = vrot.lane.b32.xlu1 %v4466_v44, %s4537_s26  ;;  %v1511_v44 = vshll.u32 %v5224_v34, 16  ;;  %v2065_v34 = vld [vmem:[#allocation2 + $0x38] sm:$0xff]  ;;  %v519_v2 = vld [vmem:[#allocation2 + $0x170] sm:$0x1]  ;;  %4277 = vmatpush3.bf16.msra.mxu1 %v4484_v32  ;;  %v528_v20 = vsel %vm5323_vm15, 0, %v527_v3 }
  0xbb   : > { %2031 = vrot.lane.b32.xlu0 %v1980_v61, %s4534_s24  ;;  %1774 = vst.msk [vmem:[#allocation2 + $0x80] sm:$0xff] %vm262_vm6, %v4480_v13  ;;  %1775 = vst.msk [vmem:[#allocation2 + $0x98] sm:$0xff] %vm262_vm6, %v4483_v48  ;;  %v520_v12 = vsel %vm4762_vm14, 0, %v519_v2  ;;  %v718_v13 = vrot.slane %v716_v23, 7  ;;  %v2066_v36 = vsel %vm5007_vm3, %v5167_v35, %v2065_v34  ;;  %v390_v15 = vld [vmem:[#allocation2 + $0x90] sm:$0x1]  ;;  %v1277_v23 = vsel %vm5111_vm8, %v5203_v1, %v1276_v7 }
  0xbc   : > { %v5279_v24 = vpop.permute.xlu1 %1251  ;;  %v813_v46 = vld [vmem:[#allocation2 + $0x60] sm:$0xff]  ;;  %v1513_v10 = vor.u32 %v1511_v44, %v1510_v41  ;;  %521 = vst [vmem:[#allocation2 + $0x170] sm:$0x1] %v520_v12  ;;  %529 = vst [vmem:[#allocation2 + $0x10] sm:$0x80] %v528_v20  ;;  %v391_v19 = vsel %vm4698_vm10, 0, %v390_v15 }
  0xbd   : > { %v1569_v37 = vpop.permute.xlu0 %1568  ;;  %v814_v49 = vsel %vm4732_vm12, %v707_v30, %v813_v46  ;;  %v288_v9 = vld [vmem:[#allocation2 + $0xa8] sm:$0x1]  ;;  %523 = vst.msk [vmem:[#allocation2 + $0x170] sm:$0xff] %vm522_vm9, %v4535_v16  ;;  %v343_v35 = vld [vmem:[#allocation2 + $0xa8] sm:$0x80]  ;;  %v723_v51 = vshrl.u32 %v5355_v31, 16 }
  0xbe   : > { %v5299_v45 = vsel %vm5048_vm11, %v1569_v37, %v1310_v29  ;;  %2338 = vrot.lane.b32.xlu1 %v2289_v25, %s4536_s25  ;;  %815 = vst [vmem:[#allocation2 + $0x60] sm:$0xff] %v814_v49  ;;  %v714_v25 = vor.u32 %v712_v53, %v711_v33  ;;  %1784 = vst.msk [vmem:[#allocation2 + $0x170] sm:$0xff] %vm262_vm6, %v4479_v60  ;;  %v289_v16 = vsel %vm4577_vm2, 0, %v288_v9  ;;  %v344_v29 = vsel %vm4586_vm5, 0, %v343_v35  ;;  %v2101_v37 = vld [vmem:[#allocation2 + $0x158] sm:$0xff]  ;;  %v4487_v8 = vld [vmem:[%s4606_s23 + $0x10] sm:$0xff]  }
  0xbf   : > { %1633 = vst [vmem:[#allocation2 + $0x138] sm:$0xff] %v5299_v45  ;;  %1245 = vrot.lane.b32.xlu0 %v1196_v14, %s4536_s25  ;;  %392 = vst [vmem:[#allocation2 + $0x90] sm:$0x1] %v391_v19  ;;  %v530_v44 = vld [vmem:[#allocation2 + $0x28] sm:$0x80]  ;;  %v726_v28 = vshll.u32 %v5355_v31, 16  ;;  %v2102_v22 = vsel %vm5007_vm3, %v5208_v11, %v2101_v37 }
  0xc0   : > { %v2541_v61 = vpop.permute.xlu1 %2540  ;;  %v2850_v52 = vld [vmem:[#allocation2 + $0x20] sm:$0xff]  ;;  %290 = vst [vmem:[#allocation2 + $0xa8] sm:$0x1] %v289_v16  ;;  %345 = vst [vmem:[#allocation2 + $0xa8] sm:$0x80] %v344_v29  ;;  %v531_v33 = vsel %vm5323_vm15, 0, %v530_v44 }
  0xc1   : > { %2573 = vst.msk [vmem:[#allocation2 + $0x140] sm:$0xff] %vm522_vm9, %v2541_v61  ;;  %3126 = vmatprep.mubr.bf16.mxu0 %v2850_v52  ;;  %v5328_v59 = vpop.permute.xlu0 %2015  ;;  %vm6009_vm4 = vsmask.f32 7424  ;;  %532 = vst [vmem:[#allocation2 + $0x28] sm:$0x80] %v531_v33  ;;  %v721_v61 = vor.u32 %v719_v38, %v718_v13  ;;  %v4488_v53 = vld [vmem:[%s4606_s23 + $0x18] sm:$0xff]  }
  0xc2   : > { %1562 = vrot.lane.b32.xlu1 %v1506_v43, %s4537_s26  ;;  %3127 = vmatmul.mubr.bf16.gmra.mrb[4].mxu0 %v5243_v18  ;;  %v4485_v18 = vld [vmem:[%s4606_s23 + $0x8] sm:$0xff]   ;;  %vm5376_vm1 = vmand %vm262_vm6, %vm6009_vm4  ;;  %v533_v32 = vld [vmem:[#allocation2 + $0x40] sm:$0x80]  ;;  %v2688_v60 = vshrl.u32 %v4487_v8, 16  ;;  %v2695_v38 = vshrl.u32 %v4488_v53, 16 }
  0xc3   : > { %2534 = vrot.lane.b32.xlu0 %v4472_v39, %s4537_s26  ;;  %v2681_v6 = vshrl.u32 %v4485_v18, 16  ;;  %v2683_v62 = vshll.u32 %v4485_v18, 16  ;;  %v816_v39 = vld [vmem:[#allocation2 + $0x78] sm:$0xff]  ;;  %v534_v52 = vsel %vm5323_vm15, 0, %v533_v32  ;;  %v2801_v57 = vld [vmem:[#allocation2 + $0x10] sm:$0xff]  ;;  %v4490_v11 = vld [vmem:[%s4606_s23 + $0x20] sm:$0xff]  }
  0xc4   : > { %v2323_v50 = vpop.permute.xlu1 %2322  ;;  %v817_v42 = vsel %vm4732_vm12, %v714_v25, %v816_v39  ;;  %535 = vst [vmem:[#allocation2 + $0x40] sm:$0x80] %v534_v52  ;;  %v4489_v2 = vld [vmem:[%s4606_s23 + $0x38] sm:$0xff]   ;;  %v495_v13 = vld [vmem:[#allocation2 + $0xb0] sm:$0x1]  ;;  %v2702_v19 = vshrl.u32 %v4490_v11, 16 }
  0xc5   : > { %v2371_v14 = vsel %vm5019_vm7, %v2323_v50, %v2066_v36  ;;  %v961_v30 = vpop.permute.xlu0 %960  ;;  %v2685_v41 = vrot.slane %v2683_v62, 1  ;;  %818 = vst [vmem:[#allocation2 + $0x78] sm:$0xff] %v817_v42  ;;  %v725_v50 = vrot.slane %v723_v51, 7  ;;  %v496_v25 = vsel %vm4762_vm14, 0, %v495_v13  ;;  %v1312_v15 = vld [vmem:[#allocation2 + $0x150] sm:$0xff]  ;;  %v4492_v32 = vld [vmem:[%s4606_s23 + $0x28] sm:$0xff]  }
  0xc6   : > { %2372 = vst [vmem:[#allocation2 + $0x38] sm:$0xff] %v2371_v14  ;;  %1003 = vst.msk [vmem:[#allocation2 + $0x60] sm:$0xff] %vm315_vm0, %v961_v30  ;;  %2340 = vrot.lane.b32.xlu1 %v2296_v63, %s4536_s25  ;;  %v2690_v63 = vshll.u32 %v4487_v8, 16  ;;  %v819_v36 = vld [vmem:[#allocation2 + $0x90] sm:$0xff]  ;;  %v536_v35 = vld [vmem:[#allocation2 + $0x58] sm:$0x80] }
  0xc7   : > { %1564 = vrot.lane.b32.xlu0 %v1513_v10, %s4537_s26  ;;  %v2686_v34 = vor.u32 %v2685_v41, %v2681_v6  ;;  %v2697_v10 = vshll.u32 %v4488_v53, 16  ;;  %v820_v9 = vsel %vm4732_vm12, %v721_v61, %v819_v36  ;;  %v393_v14 = vld [vmem:[#allocation2 + $0xa8] sm:$0x1]  ;;  %497 = vst [vmem:[#allocation2 + $0xb0] sm:$0x1] %v496_v25  ;;  %v2704_v7 = vshll.u32 %v4490_v11, 16 }
  0xc8   : > { %v5365_v43 = vpop.permute.xlu1 %1229  ;;  %v2886_v46 = vld [vmem:[#allocation2 + $0x140] sm:$0xff]  ;;  %821 = vst [vmem:[#allocation2 + $0x90] sm:$0xff] %v820_v9  ;;  %v394_v6 = vsel %vm4698_vm10, 0, %v393_v14  ;;  %v2804_v29 = vld [vmem:[#allocation2 + $0x28] sm:$0xff]  ;;  %v537_v39 = vsel %vm5323_vm15, 0, %v536_v35  ;;  %v1313_v41 = vsel %vm5111_vm8, %v5279_v24, %v1312_v15  ;;  %v2068_v61 = vld [vmem:[#allocation2 + $0x50] sm:$0xff] }
  0xc9   : > { %3222 = vmatprep.mubr.bf16.mxu1 %v2886_v46  ;;  %v1547_v48 = vpop.permute.xlu0 %1546  ;;  %v5401_v54 = vsel %vm5376_vm1, %v2686_v34, %v2801_v57  ;;  %v2699_v30 = vrot.slane %v2697_v10, 1  ;;  %395 = vst [vmem:[#allocation2 + $0xa8] sm:$0x1] %v394_v6  ;;  %538 = vst [vmem:[#allocation2 + $0x58] sm:$0x80] %v537_v39  ;;  %v2706_v42 = vrot.slane %v2704_v7, 1  ;;  %v728_v57 = vor.u32 %v726_v28, %v725_v50 }
  0xca   : > { %v5385_v1 = vsel %vm5048_vm11, %v1547_v48, %v1277_v23  ;;  %3223 = vmatmul.mubr.bf16.gmra.mrb[4].mxu1 %v5299_v45  ;;  %2536 = vrot.lane.b32.xlu1 %v4476_v56, %s4537_s26  ;;  %v443_v45 = vld [vmem:[#allocation2 + $0xb0] sm:$0x80]  ;;  %2803 = vst [vmem:[#allocation2 + $0x10] sm:$0xff] %v5401_v54  ;;  %v2692_v56 = vrot.slane %v2690_v63, 1  ;;  %v291_v33 = vld [vmem:[#allocation2 + $0xc0] sm:$0x1] }
  0xcb   : > { %1600 = vst [vmem:[#allocation2 + $0x30] sm:$0xff] %v5385_v1  ;;  %v444_v12 = vsel %vm4745_vm13, 0, %v443_v45  ;;  %v2700_v37 = vor.u32 %v2699_v30, %v2695_v38  ;;  %v346_v23 = vld [vmem:[#allocation2 + $0xc0] sm:$0x80]  ;;  %v5429_v48 = vld [vmem:[%s4606_s23 + $0x38] sm:$0xff]   ;;  %v292_v24 = vsel %vm4577_vm2, 0, %v291_v33 }
  0xcc   : > { %v2347_v3 = vpop.permute.xlu1 %2346  ;;  %445 = vst [vmem:[#allocation2 + $0xb0] sm:$0x80] %v444_v12  ;;  %v2693_v62 = vor.u32 %v2692_v56, %v2688_v60  ;;  %v2807_v51 = vld [vmem:[#allocation2 + $0x40] sm:$0xff]  ;;  %v347_v8 = vsel %vm4586_vm5, 0, %v346_v23  ;;  %293 = vst [vmem:[#allocation2 + $0xc0] sm:$0x1] %v292_v24  ;;  %v2069_v56 = vsel %vm5007_vm3, %v5328_v59, %v2068_v61 }
  0xcd   : > { %v2407_v20 = vsel %vm5019_vm7, %v2347_v3, %v2102_v22  ;;  %v2519_v18 = vpop.permute.xlu0 %2518  ;;  %1776 = vst.msk [vmem:[#allocation2 + $0xb0] sm:$0xff] %vm262_vm6, %v4489_v2  ;;  %v5444_v52 = vsel %vm5376_vm1, %v2700_v37, %v2807_v51  ;;  %348 = vst [vmem:[#allocation2 + $0xc0] sm:$0x80] %v347_v8  ;;  %v539_v53 = vld [vmem:[#allocation2 + $0x70] sm:$0x80]  ;;  %v730_v60 = vshrl.u32 %v5429_v48, 16  ;;  %v2707_v3 = vor.u32 %v2706_v42, %v2702_v19 }
  0xce   : > { %2408 = vst [vmem:[#allocation2 + $0x158] sm:$0xff] %v2407_v20  ;;  %2562 = vst.msk [vmem:[#allocation2 + $0x38] sm:$0xff] %vm522_vm9, %v2519_v18  ;;  %v5426_v46 = vsel %vm5376_vm1, %v2693_v62, %v2804_v29  ;;  %v540_v63 = vsel %vm5323_vm15, 0, %v539_v53  ;;  %v2709_v38 = vshrl.u32 %v4492_v32, 16  ;;  %v2711_v10 = vshll.u32 %v4492_v32, 16  ;;  %v4493_v13 = vld [vmem:[%s4606_s23 + $0x30] sm:$0xff]  }
  0xcf   : > { %2806 = vst [vmem:[#allocation2 + $0x28] sm:$0xff] %v5426_v46  ;;  %2809 = vst [vmem:[#allocation2 + $0x40] sm:$0xff] %v5444_v52  ;;  %v542_v12 = vld [vmem:[#allocation2 + $0x88] sm:$0x80]  ;;  %v733_v31 = vshll.u32 %v5429_v48, 16  ;;  %v2716_v18 = vshrl.u32 %v4493_v13, 16 }
  0xd0   : > { %v5417_v16 = vpop.permute.xlu1 %1253  ;;  %541 = vst [vmem:[#allocation2 + $0x70] sm:$0x80] %v540_v63  ;;  %v543_v28 = vsel %vm5323_vm15, 0, %v542_v12  ;;  %v822_v11 = vld [vmem:[#allocation2 + $0xa8] sm:$0xff]  ;;  %v2713_v20 = vrot.slane %v2711_v10, 1  ;;  %v2718_v36 = vshll.u32 %v4493_v13, 16 }
  0xd1   : > { %v1571_v44 = vpop.permute.xlu0 %1570  ;;  %544 = vst [vmem:[#allocation2 + $0x88] sm:$0x80] %v543_v28  ;;  %v446_v50 = vld [vmem:[#allocation2 + $0xc8] sm:$0x80]  ;;  %v823_v15 = vsel %vm4732_vm12, %v728_v57, %v822_v11  ;;  %v2810_v9 = vld [vmem:[#allocation2 + $0x58] sm:$0xff]  ;;  %v4494_v35 = vld [vmem:[%s4606_s23 + $0x40] sm:$0xff]  }
  0xd2   : > { %v5433_v34 = vsel %vm5048_vm11, %v1571_v44, %v1313_v41  ;;  %v447_v14 = vsel %vm4745_vm13, 0, %v446_v50  ;;  %824 = vst [vmem:[#allocation2 + $0xa8] sm:$0xff] %v823_v15  ;;  %v5471_v6 = vsel %vm5376_vm1, %v2707_v3, %v2810_v9  ;;  %v2714_v62 = vor.u32 %v2713_v20, %v2709_v38  ;;  %v545_v7 = vld [vmem:[#allocation2 + $0xa0] sm:$0x80]  ;;  %v1279_v29 = vld [vmem:[#allocation2 + $0x48] sm:$0xff]  ;;  %v4495_v33 = vld [vmem:[%s4606_s23 + $0x38] sm:$0xff]  }
  0xd3   : > { %1636 = vst [vmem:[#allocation2 + $0x150] sm:$0xff] %v5433_v34  ;;  %v2720_v59 = vrot.slane %v2718_v36, 1  ;;  %448 = vst [vmem:[#allocation2 + $0xc8] sm:$0x80] %v447_v14  ;;  %v396_v37 = vld [vmem:[#allocation2 + $0xc0] sm:$0x1] }
  0xd4   : > { %v2543_v22 = vpop.permute.xlu1 %2542  ;;  %2812 = vst [vmem:[#allocation2 + $0x58] sm:$0xff] %v5471_v6  ;;  %v546_v41 = vsel %vm5323_vm15, 0, %v545_v7  ;;  %v397_v44 = vsel %vm4698_vm10, 0, %v396_v37  ;;  %v294_v23 = vld [vmem:[#allocation2 + $0xd8] sm:$0x1]  ;;  %v732_v8 = vrot.slane %v730_v60, 7 }
  0xd5   : > { %2574 = vst.msk [vmem:[#allocation2 + $0x158] sm:$0xff] %vm522_vm9, %v2543_v22  ;;  %v5453_v45 = vpop.permute.xlu0 %2017  ;;  %v2853_v2 = vld [vmem:[#allocation2 + $0x38] sm:$0xff]  ;;  %v2721_v42 = vor.u32 %v2720_v59, %v2716_v18  ;;  %547 = vst [vmem:[#allocation2 + $0xa0] sm:$0x80] %v546_v41  ;;  %v295_v61 = vsel %vm4577_vm2, 0, %v294_v23  ;;  %v1280_v22 = vsel %vm5111_vm8, %v5365_v43, %v1279_v29  ;;  %v2104_v63 = vld [vmem:[#allocation2 + $0x170] sm:$0xff] }
  0xd6   : > { %3134 = vmatprep.mubr.bf16.mxu0 %v2853_v2  ;;  %398 = vst [vmem:[#allocation2 + $0xc0] sm:$0x1] %v397_v44  ;;  %v349_v53 = vld [vmem:[#allocation2 + $0xd8] sm:$0x80]  ;;  %v2723_v60 = vshrl.u32 %v4495_v33, 16  ;;  %v2725_v3 = vshll.u32 %v4495_v33, 16  ;;  %v735_v18 = vor.u32 %v733_v31, %v732_v8 }
  0xd7   : > { %3135 = vmatmul.mubr.bf16.gmra.mrb[8].mxu0 %v5385_v1  ;;  %v498_v1 = vld [vmem:[#allocation2 + $0xc8] sm:$0x1]  ;;  %v2813_v32 = vld [vmem:[#allocation2 + $0x70] sm:$0xff]  ;;  %296 = vst [vmem:[#allocation2 + $0xd8] sm:$0x1] %v295_v61  ;;  %v350_v10 = vsel %vm4586_vm5, 0, %v349_v53 }
  0xd8   : > { %v2325_v25 = vpop.permute.xlu1 %2324  ;;  %v499_v39 = vsel %vm4762_vm14, 0, %v498_v1  ;;  %v5493_v2 = vsel %vm5376_vm1, %v2714_v62, %v2813_v32  ;;  %v2816_v43 = vld [vmem:[#allocation2 + $0x88] sm:$0xff]  ;;  %v5504_v12 = vld [vmem:[%s4606_s23 + $0x40] sm:$0xff]   ;;  %v548_v13 = vld [vmem:[#allocation2 + $0xb8] sm:$0x80]  ;;  %v2727_v11 = vrot.slane %v2725_v3, 1 }
  0xd9   : > { %v2374_v30 = vsel %vm5019_vm7, %v2325_v25, %v2069_v56  ;;  %v963_v19 = vpop.permute.xlu0 %962  ;;  %500 = vst [vmem:[#allocation2 + $0xc8] sm:$0x1] %v499_v39  ;;  %2815 = vst [vmem:[#allocation2 + $0x70] sm:$0xff] %v5493_v2  ;;  %v5509_v28 = vsel %vm5376_vm1, %v2721_v42, %v2816_v43  ;;  %v737_v36 = vshrl.u32 %v5504_v12, 16  ;;  %v4497_v50 = vld [vmem:[%s4606_s23 + $0x40] sm:$0xff]   ;;  %v4498_v25 = vld [vmem:[%s4606_s23 + $0x48] sm:$0xff]  }
  0xda   : > { %2375 = vst [vmem:[#allocation2 + $0x50] sm:$0xff] %v2374_v30  ;;  %1004 = vst.msk [vmem:[#allocation2 + $0x78] sm:$0xff] %vm315_vm0, %v963_v19  ;;  %v551_v56 = vld [vmem:[#allocation2 + $0xd0] sm:$0x80]  ;;  %v2728_v9 = vor.u32 %v2727_v11, %v2723_v60  ;;  %v740_v14 = vshll.u32 %v5504_v12, 16  ;;  %v2730_v19 = vshrl.u32 %v4497_v50, 16 }
  0xdb   : > { %1777 = vst.msk [vmem:[#allocation2 + $0xc8] sm:$0xff] %vm262_vm6, %v4494_v35  ;;  %351 = vst [vmem:[#allocation2 + $0xd8] sm:$0x80] %v350_v10  ;;  %v552_v1 = vsel %vm5323_vm15, 0, %v551_v56  ;;  %v5525_v30 = vrot.slane %v737_v36, 7  ;;  %v2732_v62 = vshll.u32 %v4497_v50, 16 }
  0xdc   : > { %v5483_v51 = vpop.permute.xlu1 %1231  ;;  %v2889_v24 = vld [vmem:[#allocation2 + $0x158] sm:$0xff]  ;;  %2818 = vst [vmem:[#allocation2 + $0x88] sm:$0xff] %v5509_v28  ;;  %v2819_v31 = vld [vmem:[#allocation2 + $0xa0] sm:$0xff]  ;;  %553 = vst [vmem:[#allocation2 + $0xd0] sm:$0x80] %v552_v1  ;;  %v2737_v37 = vshrl.u32 %v4498_v25, 16 }
  0xdd   : > { %3230 = vmatprep.mubr.bf16.mxu1 %v2889_v24  ;;  %v1549_v57 = vpop.permute.xlu0 %1548  ;;  %v449_v59 = vld [vmem:[#allocation2 + $0xe0] sm:$0x80]  ;;  %v1315_v35 = vld [vmem:[#allocation2 + $0x168] sm:$0xff]  ;;  %v5529_v29 = vsel %vm5376_vm1, %v2728_v9, %v2819_v31  ;;  %v2739_v39 = vshll.u32 %v4498_v25, 16  ;;  %v2734_v8 = vrot.slane %v2732_v62, 1  ;;  %v4500_v61 = vld [vmem:[%s4606_s23 + $0x50] sm:$0xff]  }
  0xde   : > { %v5497_v38 = vsel %vm5048_vm11, %v1549_v57, %v1280_v22  ;;  %3231 = vmatmul.mubr.bf16.gmra.mrb[8].mxu1 %v5433_v34  ;;  %v549_v34 = vsel %vm5323_vm15, 0, %v548_v13  ;;  %v825_v7 = vld [vmem:[#allocation2 + $0xc0] sm:$0xff]  ;;  %v450_v41 = vsel %vm4745_vm13, 0, %v449_v59  ;;  %v4499_v44 = vld [vmem:[%s4606_s23 + $0x48] sm:$0xff]   ;;  %v1316_v42 = vsel %vm5111_vm8, %v5417_v16, %v1315_v35  ;;  %2821 = vst [vmem:[#allocation2 + $0xa0] sm:$0xff] %v5529_v29 }
  0xdf   : > { %1603 = vst [vmem:[#allocation2 + $0x48] sm:$0xff] %v5497_v38  ;;  %550 = vst [vmem:[#allocation2 + $0xb8] sm:$0x80] %v549_v34  ;;  %v826_v23 = vsel %vm4732_vm12, %v735_v18, %v825_v7  ;;  %v399_v24 = vld [vmem:[#allocation2 + $0xd8] sm:$0x1]  ;;  %v2071_v53 = vld [vmem:[#allocation2 + $0x68] sm:$0xff]  ;;  %v2735_v3 = vor.u32 %v2734_v8, %v2730_v19  ;;  %v742_v59 = vor.u32 %v740_v14, %v5525_v30 }
  0xe0   : > { %v2521_v20 = vpop.permute.xlu1 %2520  ;;  %451 = vst [vmem:[#allocation2 + $0xe0] sm:$0x80] %v450_v41  ;;  %v501_v32 = vld [vmem:[#allocation2 + $0xe0] sm:$0x1]  ;;  %827 = vst [vmem:[#allocation2 + $0xc0] sm:$0xff] %v826_v23  ;;  %v400_v16 = vsel %vm4698_vm10, 0, %v399_v24  ;;  %v2072_v18 = vsel %vm5007_vm3, %v5453_v45, %v2071_v53 }
  0xe1   : > { %2563 = vst.msk [vmem:[#allocation2 + $0x50] sm:$0xff] %vm522_vm9, %v2521_v20  ;;  %v2040_v15 = vpop.permute.xlu0 %2039  ;;  %v502_v60 = vsel %vm4762_vm14, 0, %v501_v32  ;;  %401 = vst [vmem:[#allocation2 + $0xd8] sm:$0x1] %v400_v16  ;;  %v554_v43 = vld [vmem:[#allocation2 + $0xe8] sm:$0x80] }
  0xe2   : > { %v2105_v48 = vsel %vm5007_vm3, %v2040_v15, %v2104_v63  ;;  %v2741_v63 = vrot.slane %v2739_v39, 1  ;;  %503 = vst [vmem:[#allocation2 + $0xe0] sm:$0x1] %v502_v60  ;;  %v555_v11 = vsel %vm5323_vm15, 0, %v554_v43  ;;  %v2746_v34 = vshll.u32 %v4500_v61, 16  ;;  %v5555_v20 = vld [vmem:[%s4606_s23 + $0x48] sm:$0xff]  }
  0xe3   : > { %2106 = vst [vmem:[#allocation2 + $0x170] sm:$0xff] %v2105_v48  ;;  %3238 = vmatprep.mubr.bf16.mxu1 %v2105_v48  ;;  %1778 = vst.msk [vmem:[#allocation2 + $0xe0] sm:$0xff] %vm262_vm6, %v4499_v44  ;;  %v297_v25 = vld [vmem:[#allocation2 + $0xf0] sm:$0x1]  ;;  %v352_v15 = vld [vmem:[#allocation2 + $0xf0] sm:$0x80] }
  0xe4   : > { %v1573_v33 = vpop.permute.xlu1 %1572  ;;  %v2742_v13 = vor.u32 %v2741_v63, %v2737_v37  ;;  %556 = vst [vmem:[#allocation2 + $0xe8] sm:$0x80] %v555_v11  ;;  %v2825_v48 = vld [vmem:[#allocation2 + $0xd0] sm:$0xff]  ;;  %v2748_v45 = vrot.slane %v2746_v34, 1  ;;  %v298_v31 = vsel %vm4577_vm2, 0, %v297_v25  ;;  %v353_v19 = vsel %vm4586_vm5, 0, %v352_v15 }
  0xe5   : > { %v1638_v22 = vsel %vm5048_vm11, %v1573_v33, %v1316_v42  ;;  %v5543_v57 = vpop.permute.xlu0 %2019  ;;  %v1282_v62 = vld [vmem:[#allocation2 + $0x60] sm:$0xff]  ;;  %299 = vst [vmem:[#allocation2 + $0xf0] sm:$0x1] %v298_v31  ;;  %354 = vst [vmem:[#allocation2 + $0xf0] sm:$0x80] %v353_v19  ;;  %v4502_v39 = vld [vmem:[%s4606_s23 + $0x58] sm:$0xff]  }
  0xe6   : > { %1639 = vst [vmem:[#allocation2 + $0x168] sm:$0xff] %v1638_v22  ;;  %3239 = vmatmul.mubr.bf16.gmra.mrb[12].mxu1 %v1638_v22  ;;  %v2822_v10 = vld [vmem:[#allocation2 + $0xb8] sm:$0xff]  ;;  %v5578_v35 = vsel %vm5376_vm1, %v2742_v13, %v2825_v48  ;;  %v557_v7 = vld [vmem:[#allocation2 + $0x100] sm:$0x80]  ;;  %v744_v42 = vshrl.u32 %v5555_v20, 16  ;;  %v2751_v33 = vshrl.u32 %v4502_v39, 16 }
  0xe7   : > { %4278 = vmatprep.mubr.msk.bf16.mxu1 %vm262_vm6, %v5401_v54  ;;  %v5562_v56 = vsel %vm5376_vm1, %v2735_v3, %v2822_v10  ;;  %v2744_v54 = vshrl.u32 %v4500_v61, 16  ;;  %2827 = vst [vmem:[#allocation2 + $0xd0] sm:$0xff] %v5578_v35  ;;  %v558_v37 = vsel %vm5323_vm15, 0, %v557_v7  ;;  %v560_v30 = vld [vmem:[#allocation2 + $0x118] sm:$0x80]  ;;  %v2753_v23 = vshll.u32 %v4502_v39, 16 }
  0xe8   : > { %v2327_v36 = vpop.permute.xlu1 %2326  ;;  %v2856_v50 = vld [vmem:[#allocation2 + $0x50] sm:$0xff]  ;;  %2824 = vst [vmem:[#allocation2 + $0xb8] sm:$0xff] %v5562_v56  ;;  %559 = vst [vmem:[#allocation2 + $0x100] sm:$0x80] %v558_v37  ;;  %v828_v44 = vld [vmem:[#allocation2 + $0xd8] sm:$0xff]  ;;  %v561_v24 = vsel %vm5323_vm15, 0, %v560_v30 }
  0xe9   : > { %v2377_v9 = vsel %vm5019_vm7, %v2327_v36, %v2072_v18  ;;  %3142 = vmatprep.mubr.bf16.mxu0 %v2856_v50  ;;  %v965_v1 = vpop.permute.xlu0 %964  ;;  %v2749_v14 = vor.u32 %v2748_v45, %v2744_v54  ;;  %v4503_v8 = vld [vmem:[%s4606_s23 + $0x60] sm:$0xff]   ;;  %v829_v32 = vsel %vm4732_vm12, %v742_v59, %v828_v44  ;;  %562 = vst [vmem:[#allocation2 + $0x118] sm:$0x80] %v561_v24  ;;  %v452_v61 = vld [vmem:[#allocation2 + $0xf8] sm:$0x80]  ;;  %v4504_v22 = vld [vmem:[%s4606_s23 + $0x50] sm:$0xff]  }
  0xea   : > { %2378 = vst [vmem:[#allocation2 + $0x68] sm:$0xff] %v2377_v9  ;;  %1005 = vst.msk [vmem:[#allocation2 + $0x90] sm:$0xff] %vm315_vm0, %v965_v1  ;;  %3143 = vmatmul.mubr.bf16.gmra.mrb[12].mxu0 %v5497_v38  ;;  %v1283_v38 = vsel %vm5111_vm8, %v5483_v51, %v1282_v62  ;;  %v504_v53 = vld [vmem:[#allocation2 + $0xf8] sm:$0x1]  ;;  %v2755_v63 = vrot.slane %v2753_v23, 1  ;;  %v2758_v60 = vshrl.u32 %v4503_v8, 16 }
  0xeb   : > { %830 = vst [vmem:[#allocation2 + $0xd8] sm:$0xff] %v829_v32  ;;  %v2828_v16 = vld [vmem:[#allocation2 + $0xe8] sm:$0xff]  ;;  %v2760_v3 = vshll.u32 %v4503_v8, 16  ;;  %v2074_v10 = vld [vmem:[#allocation2 + $0x80] sm:$0xff]  ;;  %v505_v34 = vsel %vm4762_vm14, 0, %v504_v53  ;;  %v746_v36 = vrot.slane %v744_v42, 7 }
  0xec   : > { %v5587_v12 = vpop.permute.xlu1 %1233  ;;  %v4505_v43 = vld [vmem:[%s4606_s23 + $0x68] sm:$0xff]   ;;  %v5610_v11 = vsel %vm5376_vm1, %v2749_v14, %v2828_v16  ;;  %v402_v18 = vld [vmem:[#allocation2 + $0xf0] sm:$0x1]  ;;  %v2756_v50 = vor.u32 %v2755_v63, %v2751_v33  ;;  %506 = vst [vmem:[#allocation2 + $0xf8] sm:$0x1] %v505_v34  ;;  %v747_v1 = vshll.u32 %v5555_v20, 16  ;;  %v2075_v59 = vsel %vm5007_vm3, %v5543_v57, %v2074_v10 }
  0xed   : > { %v1551_v41 = vpop.permute.xlu0 %1550  ;;  %2830 = vst [vmem:[#allocation2 + $0xe8] sm:$0xff] %v5610_v11  ;;  %v2762_v54 = vrot.slane %v2760_v3, 1  ;;  %v563_v25 = vld [vmem:[#allocation2 + $0x130] sm:$0x80]  ;;  %v403_v15 = vsel %vm4698_vm10, 0, %v402_v18  ;;  %v2765_v31 = vshrl.u32 %v4505_v43, 16 }
  0xee   : > { %v5595_v51 = vsel %vm5048_vm11, %v1551_v41, %v1283_v38  ;;  %4279 = vmatmul.mubr.msk.bf16.vlgmr.msra.gmra.mrb[16].mxu1 %vm262_vm6, %v5426_v46  ;;  %v453_v46 = vsel %vm4745_vm13, 0, %v452_v61  ;;  %v564_v9 = vsel %vm5323_vm15, 0, %v563_v25  ;;  %404 = vst [vmem:[#allocation2 + $0xf0] sm:$0x1] %v403_v15  ;;  %v2767_v19 = vshll.u32 %v4505_v43, 16  ;;  %v5639_v44 = vld [vmem:[%s4606_s23 + $0x50] sm:$0xff]  }
  0xef   : > { %1606 = vst [vmem:[#allocation2 + $0x60] sm:$0xff] %v5595_v51  ;;  %4282 = vmatprep.mubr.msk.bf16.mxu1 %vm262_vm6, %v5444_v52  ;;  %454 = vst [vmem:[#allocation2 + $0xf8] sm:$0x80] %v453_v46  ;;  %v2831_v48 = vld [vmem:[#allocation2 + $0x100] sm:$0xff]  ;;  %v2763_v45 = vor.u32 %v2762_v54, %v2758_v60  ;;  %v300_v62 = vld [vmem:[#allocation2 + $0x108] sm:$0x1]  ;;  %v749_v4 = vor.u32 %v747_v1, %v746_v36 }
  0xf0   : > { %v2523_v13 = vpop.permute.xlu1 %2522  ;;  %1779 = vst.msk [vmem:[#allocation2 + $0xf8] sm:$0xff] %vm262_vm6, %v4504_v22  ;;  %565 = vst [vmem:[#allocation2 + $0x130] sm:$0x80] %v564_v9  ;;  %v5629_v37 = vsel %vm5376_vm1, %v2756_v50, %v2831_v48  ;;  %v301_v39 = vsel %vm4577_vm2, 0, %v300_v62  ;;  %v355_v20 = vld [vmem:[#allocation2 + $0x108] sm:$0x80] }
  0xf1   : > { %2564 = vst.msk [vmem:[#allocation2 + $0x68] sm:$0xff] %vm522_vm9, %v2523_v13  ;;  %v5615_v52 = vpop.permute.xlu0 %2021  ;;  %2833 = vst [vmem:[#allocation2 + $0x100] sm:$0xff] %v5629_v37  ;;  %v2834_v30 = vld [vmem:[#allocation2 + $0x118] sm:$0xff]  ;;  %v2769_v41 = vrot.slane %v2767_v19, 1  ;;  %v356_v57 = vsel %vm4586_vm5, 0, %v355_v20  ;;  %v4507_v8 = vld [vmem:[%s4606_s23 + $0x70] sm:$0xff]  }
  0xf2   : > { %302 = vst [vmem:[#allocation2 + $0x108] sm:$0x1] %v301_v39  ;;  %v1285_v42 = vld [vmem:[#allocation2 + $0x78] sm:$0xff]  ;;  %v5646_v0 = vsel %vm5376_vm1, %v2763_v45, %v2834_v30  ;;  %357 = vst [vmem:[#allocation2 + $0x108] sm:$0x80] %v356_v57  ;;  %v751_v63 = vshrl.u32 %v5639_v44, 16 }
  0xf3   : > { %v566_v33 = vld [vmem:[#allocation2 + $0x148] sm:$0x80]  ;;  %2836 = vst [vmem:[#allocation2 + $0x118] sm:$0xff] %v5646_v0  ;;  %v2770_v23 = vor.u32 %v2769_v41, %v2765_v31  ;;  %v569_v32 = vld [vmem:[#allocation2 + $0x160] sm:$0x80]  ;;  %v4508_v22 = vld [vmem:[%s4606_s23 + $0x78] sm:$0xff]  }
  0xf4   : > { %v2329_v7 = vpop.permute.xlu1 %2328  ;;  %v567_v24 = vsel %vm5323_vm15, 0, %v566_v33  ;;  %v570_v53 = vsel %vm5323_vm15, 0, %v569_v32  ;;  %v2772_v60 = vshrl.u32 %v4507_v8, 16  ;;  %v2774_v3 = vshll.u32 %v4507_v8, 16  ;;  %v455_v46 = vld [vmem:[#allocation2 + $0x110] sm:$0x80] }
  0xf5   : > { %v2380_v38 = vsel %vm5019_vm7, %v2329_v7, %v2075_v59  ;;  %v967_v14 = vpop.permute.xlu0 %966  ;;  %568 = vst [vmem:[#allocation2 + $0x148] sm:$0x80] %v567_v24  ;;  %571 = vst [vmem:[#allocation2 + $0x160] sm:$0x80] %v570_v53  ;;  %v831_v10 = vld [vmem:[#allocation2 + $0xf0] sm:$0xff]  ;;  %v2779_v34 = vshrl.u32 %v4508_v22, 16 }
  0xf6   : > { %2381 = vst [vmem:[#allocation2 + $0x80] sm:$0xff] %v2380_v38  ;;  %1006 = vst.msk [vmem:[#allocation2 + $0xa8] sm:$0xff] %vm315_vm0, %v967_v14  ;;  %4283 = vmatmul.mubr.msk.bf16.gmra.mrb[20].mxu1 %vm262_vm6, %v5471_v6  ;;  %v2781_v18 = vshll.u32 %v4508_v22, 16  ;;  %v4509_v36 = vld [vmem:[%s4606_s23 + $0x58] sm:$0xff]   ;;  %v832_v50 = vsel %vm4732_vm12, %v749_v4, %v831_v10  ;;  %v2776_v25 = vrot.slane %v2774_v3, 1  ;;  %v753_v59 = vrot.slane %v751_v63, 7 }
  0xf7   : > { %4286 = vmatprep.mubr.msk.bf16.mxu1 %vm262_vm6, %v5493_v2  ;;  %v1286_v2 = vsel %vm5111_vm8, %v5587_v12, %v1285_v42  ;;  %v2837_v13 = vld [vmem:[#allocation2 + $0x130] sm:$0xff]  ;;  %v456_v12 = vsel %vm4745_vm13, 0, %v455_v46  ;;  %833 = vst [vmem:[#allocation2 + $0xf0] sm:$0xff] %v832_v50  ;;  %v2077_v48 = vld [vmem:[#allocation2 + $0x98] sm:$0xff]  ;;  %v754_v7 = vshll.u32 %v5639_v44, 16  ;;  %v2083_v3 = vld [vmem:[#allocation2 + $0xc8] sm:$0xff] }
  0xf8   : > { %v5654_v61 = vpop.permute.xlu1 %1235  ;;  %v2859_v6 = vld [vmem:[#allocation2 + $0x68] sm:$0xff]  ;;  %v5673_v54 = vsel %vm5376_vm1, %v2770_v23, %v2837_v13  ;;  %457 = vst [vmem:[#allocation2 + $0x110] sm:$0x80] %v456_v12  ;;  %v507_v15 = vld [vmem:[#allocation2 + $0x110] sm:$0x1]  ;;  %v2783_v1 = vrot.slane %v2781_v18, 1  ;;  %v2777_v19 = vor.u32 %v2776_v25, %v2772_v60  ;;  %v2078_v20 = vsel %vm5007_vm3, %v5615_v52, %v2077_v48 }
  0xf9   : > { %3150 = vmatprep.mubr.bf16.mxu0 %v2859_v6  ;;  %v1553_v16 = vpop.permute.xlu0 %1552  ;;  %2839 = vst [vmem:[#allocation2 + $0x130] sm:$0xff] %v5673_v54  ;;  %v405_v9 = vld [vmem:[#allocation2 + $0x108] sm:$0x1]  ;;  %v508_v5 = vsel %vm4762_vm14, 0, %v507_v15  ;;  %v572_v62 = vld [vmem:[#allocation2 + $0x178] sm:$0x80]  ;;  %v756_v41 = vor.u32 %v754_v7, %v753_v59 }
  0xfa   : > { %v1608_v43 = vsel %vm5048_vm11, %v1553_v16, %v1286_v2  ;;  %3151 = vmatmul.mubr.bf16.gmra.mrb[16].mxu0 %v5595_v51  ;;  %v406_v31 = vsel %vm4698_vm10, 0, %v405_v9  ;;  %509 = vst [vmem:[#allocation2 + $0x110] sm:$0x1] %v508_v5  ;;  %v2784_v39 = vor.u32 %v2783_v1, %v2779_v34  ;;  %v573_v17 = vsel %vm5323_vm15, 0, %v572_v62  ;;  %v1288_v52 = vld [vmem:[#allocation2 + $0x90] sm:$0xff] }
  0xfb   : > { %1609 = vst [vmem:[#allocation2 + $0x78] sm:$0xff] %v1608_v43  ;;  %407 = vst [vmem:[#allocation2 + $0x108] sm:$0x1] %v406_v31  ;;  %v1289_v42 = vsel %vm5111_vm8, %v5654_v61, %v1288_v52  ;;  %v2080_v8 = vld [vmem:[#allocation2 + $0xb0] sm:$0xff]  ;;  %vm3645_vm2 = vcmask 257024  }
  0xfc   : > { %v2525_v51 = vpop.permute.xlu1 %2524  ;;  %1780 = vst.msk [vmem:[#allocation2 + $0x110] sm:$0xff] %vm262_vm6, %v4509_v36  ;;  %v2840_v26 = vld [vmem:[#allocation2 + $0x148] sm:$0xff]  ;;  %574 = vst [vmem:[#allocation2 + $0x178] sm:$0x80] %v573_v17  ;;  %v2843_v14 = vld [vmem:[#allocation2 + $0x160] sm:$0xff] }
  0xfd   : > { %2565 = vst.msk [vmem:[#allocation2 + $0x80] sm:$0xff] %vm522_vm9, %v2525_v51  ;;  %v2024_v45 = vpop.permute.xlu0 %2023  ;;  %v5694_v38 = vsel %vm5376_vm1, %v2777_v19, %v2840_v26  ;;  %v1291_v55 = vld [vmem:[#allocation2 + $0xa8] sm:$0xff] }
  0xfe   : > { %4287 = vmatmul.mubr.msk.bf16.gmra.mrb[24].mxu1 %vm262_vm6, %v5509_v28  ;;  %2842 = vst [vmem:[#allocation2 + $0x148] sm:$0xff] %v5694_v38  ;;  %v2081_v61 = vsel %vm5007_vm3, %v2024_v45, %v2080_v8 }
  0xff   : > { %4290 = vmatprep.mubr.msk.bf16.mxu1 %vm262_vm6, %v5529_v29  ;;  %v2844_v29 = vsel %vm5376_vm1, %v2784_v39, %v2843_v14  ;;  %v2089_v39 = vld [vmem:[#allocation2 + $0xf8] sm:$0xff] }
 0x100   : > { %v2331_v28 = vpop.permute.xlu1 %2330  ;;  %2845 = vst [vmem:[#allocation2 + $0x160] sm:$0xff] %v2844_v29 }
 0x101   : > { %v2383_v30 = vsel %vm5019_vm7, %v2331_v28, %v2078_v20  ;;  %v969_v58 = vpop.permute.xlu0 %968 }
 0x102   : > { %2384 = vst [vmem:[#allocation2 + $0x98] sm:$0xff] %v2383_v30  ;;  %1007 = vst.msk [vmem:[#allocation2 + $0xc0] sm:$0xff] %vm315_vm0, %v969_v58  ;;  %v834_v4 = vld [vmem:[#allocation2 + $0x108] sm:$0xff] }
 0x103   : > { %v835_v49 = vsel %vm4732_vm12, %v756_v41, %v834_v4  ;;  %v2893_v15 = vld [vmem:[#allocation2 + $0x178] sm:$0xff]  ;;  %v2092_v41 = vld [vmem:[#allocation2 + $0x110] sm:$0xff] }
 0x104   : > { %v1238_v57 = vpop.permute.xlu1 %1237  ;;  %v2862_v44 = vld [vmem:[#allocation2 + $0x80] sm:$0xff]  ;;  %836 = vst [vmem:[#allocation2 + $0x108] sm:$0xff] %v835_v49 }
 0x105   : > { %3158 = vmatprep.mubr.bf16.mxu0 %v2862_v44  ;;  %v1555_v33 = vpop.permute.xlu0 %1554  ;;  %v1292_v2 = vsel %vm5111_vm8, %v1238_v57, %v1291_v55 }
 0x106   : > { %v1611_v23 = vsel %vm5048_vm11, %v1555_v33, %v1289_v42  ;;  %3159 = vmatmul.mubr.bf16.gmra.mrb[20].mxu0 %v1608_v43  ;;  %4291 = vmatmul.mubr.msk.bf16.gmra.mrb[28].mxu1 %vm262_vm6, %v5562_v56 }
 0x107   : > { %1612 = vst [vmem:[#allocation2 + $0x90] sm:$0xff] %v1611_v23  ;;  %4294 = vmatprep.mubr.msk.bf16.mxu1 %vm262_vm6, %v5578_v35 }
 0x108   : > { %v2527_v24 = vpop.permute.xlu1 %2526 }
 0x109   : > { %2566 = vst.msk [vmem:[#allocation2 + $0x98] sm:$0xff] %vm522_vm9, %v2527_v24  ;;  %v2026_v32 = vpop.permute.xlu0 %2025  ;;  %v1294_v13 = vld [vmem:[#allocation2 + $0xc0] sm:$0xff] }
 0x10c   : > { %v2333_v6 = vpop.permute.xlu1 %2332 }
 0x10d   : > { %v2386_v56 = vsel %vm5019_vm7, %v2333_v6, %v2081_v61  ;;  %v971_v53 = vpop.permute.xlu0 %970 }
 0x10e   : > { %2387 = vst [vmem:[#allocation2 + $0xb0] sm:$0xff] %v2386_v56  ;;  %1008 = vst.msk [vmem:[#allocation2 + $0xd8] sm:$0xff] %vm315_vm0, %v971_v53  ;;  %4295 = vmatmul.mubr.msk.bf16.gmra.mrb[32].mxu1 %vm262_vm6, %v5610_v11 }
 0x10f   : > { %4298 = vmatprep.mubr.msk.bf16.mxu1 %vm262_vm6, %v5629_v37  ;;  %v2084_v37 = vsel %vm5007_vm3, %v2026_v32, %v2083_v3 }
 0x110   : > { %v1240_v35 = vpop.permute.xlu1 %1239  ;;  %v2865_v22 = vld [vmem:[#allocation2 + $0x98] sm:$0xff] }
 0x111   : > { %3166 = vmatprep.mubr.bf16.mxu0 %v2865_v22  ;;  %v1557_v16 = vpop.permute.xlu0 %1556 }
 0x112   : > { %v1614_v63 = vsel %vm5048_vm11, %v1557_v16, %v1292_v2  ;;  %3167 = vmatmul.mubr.bf16.gmra.mrb[24].mxu0 %v1611_v23 }
 0x113   : > { %1615 = vst [vmem:[#allocation2 + $0xa8] sm:$0xff] %v1614_v63 }
 0x114   : > { %v2529_v60 = vpop.permute.xlu1 %2528 }
 0x115   : > { %2567 = vst.msk [vmem:[#allocation2 + $0xb0] sm:$0xff] %vm522_vm9, %v2529_v60  ;;  %v2028_v11 = vpop.permute.xlu0 %2027  ;;  %v1297_v48 = vld [vmem:[#allocation2 + $0xd8] sm:$0xff] }
 0x116   : > { %4299 = vmatmul.mubr.msk.bf16.gmra.mrb[36].mxu1 %vm262_vm6, %v5646_v0  ;;  %v1295_v0 = vsel %vm5111_vm8, %v1240_v35, %v1294_v13 }
 0x117   : > { %4302 = vmatprep.mubr.msk.bf16.mxu1 %vm262_vm6, %v5673_v54  ;;  %v2086_v54 = vld [vmem:[#allocation2 + $0xe0] sm:$0xff] }
 0x118   : > { %v2335_v46 = vpop.permute.xlu1 %2334  ;;  %v2087_v51 = vsel %vm5007_vm3, %v2028_v11, %v2086_v54 }
 0x119   : > { %v2389_v43 = vsel %vm5019_vm7, %v2335_v46, %v2084_v37  ;;  %v973_v10 = vpop.permute.xlu0 %972 }
 0x11a   : > { %2390 = vst [vmem:[#allocation2 + $0xc8] sm:$0xff] %v2389_v43  ;;  %1009 = vst.msk [vmem:[#allocation2 + $0xf0] sm:$0xff] %vm315_vm0, %v973_v10 }
 0x11c   : > { %v1242_v34 = vpop.permute.xlu1 %1241  ;;  %v2868_v18 = vld [vmem:[#allocation2 + $0xb0] sm:$0xff] }
 0x11d   : > { %3174 = vmatprep.mubr.bf16.mxu0 %v2868_v18  ;;  %v1559_v12 = vpop.permute.xlu0 %1558  ;;  %v1298_v19 = vsel %vm5111_vm8, %v1242_v34, %v1297_v48 }
 0x11e   : > { %v1617_v36 = vsel %vm5048_vm11, %v1559_v12, %v1295_v0  ;;  %3175 = vmatmul.mubr.bf16.gmra.mrb[28].mxu0 %v1614_v63  ;;  %4303 = vmatmul.mubr.msk.bf16.gmra.mrb[40].mxu1 %vm262_vm6, %v5694_v38 }
 0x11f   : > { %1618 = vst [vmem:[#allocation2 + $0xc0] sm:$0xff] %v1617_v36  ;;  %4306 = vmatprep.mubr.msk.bf16.mxu1 %vm262_vm6, %v2844_v29 }
 0x120   : > { %v2531_v50 = vpop.permute.xlu1 %2530 }
 0x121   : > { %2568 = vst.msk [vmem:[#allocation2 + $0xc8] sm:$0xff] %vm522_vm9, %v2531_v50  ;;  %v2030_v25 = vpop.permute.xlu0 %2029  ;;  %v1300_v14 = vld [vmem:[#allocation2 + $0xf0] sm:$0xff] }
 0x122   : > { %v2090_v26 = vsel %vm5007_vm3, %v2030_v25, %v2089_v39 }
 0x124   : > { %v2337_v9 = vpop.permute.xlu1 %2336 }
 0x125   : > { %v2392_v1 = vsel %vm5019_vm7, %v2337_v9, %v2087_v51  ;;  %v975_v5 = vpop.permute.xlu0 %974 }
 0x126   : > { %2393 = vst [vmem:[#allocation2 + $0xe0] sm:$0xff] %v2392_v1  ;;  %1010 = vst.msk [vmem:[#allocation2 + $0x108] sm:$0xff] %vm315_vm0, %v975_v5  ;;  %4307 = vmatmul.mubr.msk.bf16.gmra.mrb[44].mxu1 %vm262_vm6, %v2893_v15 }
 0x128   : > { %v1244_v45 = vpop.permute.xlu1 %1243  ;;  %v2871_v31 = vld [vmem:[#allocation2 + $0xc8] sm:$0xff] }
 0x129   : > { %3182 = vmatprep.mubr.bf16.mxu0 %v2871_v31  ;;  %v1561_v62 = vpop.permute.xlu0 %1560  ;;  %v1301_v30 = vsel %vm5111_vm8, %v1244_v45, %v1300_v14 }
 0x12a   : > { %v1620_v59 = vsel %vm5048_vm11, %v1561_v62, %v1298_v19  ;;  %3183 = vmatmul.mubr.bf16.gmra.mrb[32].mxu0 %v1617_v36 }
 0x12b   : > { %1621 = vst [vmem:[#allocation2 + $0xd8] sm:$0xff] %v1620_v59 }
 0x12c   : > { %v2533_v7 = vpop.permute.xlu1 %2532 }
 0x12d   : > { %2569 = vst.msk [vmem:[#allocation2 + $0xe0] sm:$0xff] %vm522_vm9, %v2533_v7  ;;  %v2032_v17 = vpop.permute.xlu0 %2031  ;;  %v1303_v42 = vld [vmem:[#allocation2 + $0x108] sm:$0xff] }
 0x12e   : > { %v2093_v44 = vsel %vm5007_vm3, %v2032_v17, %v2092_v41 }
 0x130   : > { %v2339_v20 = vpop.permute.xlu1 %2338 }
 0x131   : > { %v2395_v28 = vsel %vm5019_vm7, %v2339_v20, %v2090_v26  ;;  %v1246_v38 = vpop.permute.xlu0 %1245 }
 0x132   : > { %2396 = vst [vmem:[#allocation2 + $0xf8] sm:$0xff] %v2395_v28  ;;  %v1304_v4 = vsel %vm5111_vm8, %v1246_v38, %v1303_v42 }
 0x134   : > { %v1563_v58 = vpop.permute.xlu1 %1562  ;;  %v2874_v29 = vld [vmem:[#allocation2 + $0xe0] sm:$0xff] }
 0x135   : > { %v1623_v52 = vsel %vm5048_vm11, %v1563_v58, %v1301_v30  ;;  %3190 = vmatprep.mubr.bf16.mxu0 %v2874_v29  ;;  %v2535_v57 = vpop.permute.xlu0 %2534  ;;  %v5793_v58 = vld [vmem:[%s5984_s2] ss:$0 sm:$0xff] }
 0x136   : > { %1624 = vst [vmem:[#allocation2 + $0xf0] sm:$0xff] %v1623_v52  ;;  %2570 = vst.msk [vmem:[#allocation2 + $0xf8] sm:$0xff] %vm522_vm9, %v2535_v57  ;;  %3191 = vmatmul.mubr.bf16.gmra.mrb[36].mxu0 %v1620_v59 }
 0x138   : > { %v2341_v33 = vpop.permute.xlu1 %2340 }
 0x139   : > { %v2398_v23 = vsel %vm5019_vm7, %v2341_v33, %v2093_v44  ;;  %v1565_v49 = vpop.permute.xlu0 %1564 }
 0x13a   : > { %2399 = vst [vmem:[#allocation2 + $0x110] sm:$0xff] %v2398_v23  ;;  %v1626_v24 = vsel %vm5048_vm11, %v1565_v49, %v1304_v4 }
 0x13b   : > { %1627 = vst [vmem:[#allocation2 + $0x108] sm:$0xff] %v1626_v24 }
 0x13c   : > { %v2537_v8 = vpop.permute.xlu1 %2536 }
 0x13d   : > { %2571 = vst.msk [vmem:[#allocation2 + $0x110] sm:$0xff] %vm522_vm9, %v2537_v8  ;;  %v2877_v32 = vld [vmem:[#allocation2 + $0xf8] sm:$0xff] }
 0x13e   : > { %3198 = vmatprep.mubr.bf16.mxu0 %v2877_v32 }
 0x13f   : > { %3199 = vmatmul.mubr.bf16.gmra.mrb[40].mxu0 %v1623_v52  ;;  %v5798_v52 = vld [vmem:[%s5984_s2 + $0x1] ss:$0 sm:$0xff] }
 0x144   : > { %v2880_v21 = vld [vmem:[#allocation2 + $0x110] sm:$0xff] }
 0x145   : > { %3206 = vmatprep.mubr.bf16.mxu0 %v2880_v21 }
 0x147   : > { %3207 = vmatmul.mubr.bf16.gmra.mrb[44].mxu0 %v1626_v24 }
 0x17d   : > { %v4160_v40 = vpop.f32.mrb[0].mxu0 }
 0x17e   : > { %v4161_v61 = vpop.f32.mrb[1].mxu0 }
 0x17f   : > { %v4162_v6 = vadd.f32 %v4161_v61, %v4160_v40  ;;  %v4163_v27 = vpop.f32.mrb[2].mxu0 }
 0x180   : > { %v4164_v56 = vpop.f32.mrb[3].mxu0 }
 0x181   : > { %v4165_v53 = vadd.f32 %v4164_v56, %v4163_v27 }
 0x185   : > { %v4232_v55 = vpop.f32.mrb[0].mxu1 }
 0x186   : > { %v4233_v35 = vpop.f32.mrb[1].mxu1 }
 0x187   : > { %v5774_v47 = vadd.f32 %v4233_v35, %v4232_v55  ;;  %v4235_v22 = vpop.f32.mrb[2].mxu1 }
 0x188   : > { %v4236_v2 = vpop.f32.mrb[3].mxu1 }
 0x189   : > { %v5776_v16 = vadd.f32 %v4236_v2, %v4235_v22 }
 0x195   : > { %v4166_v63 = vpop.f32.mrb[4].mxu0 }
 0x196   : > { %v4167_v60 = vpop.f32.mrb[5].mxu0 }
 0x197   : > { %v4168_v3 = vadd.f32 %v4167_v60, %v4166_v63  ;;  %v4169_v11 = vpop.f32.mrb[6].mxu0 }
 0x198   : > { %v4170_v37 = vpop.f32.mrb[7].mxu0 }
 0x199   : > { %v4171_v46 = vadd.f32 %v4170_v37, %v4169_v11 }
 0x19d   : > { %v4238_v43 = vpop.f32.mrb[4].mxu1 }
 0x19e   : > { %v4239_v10 = vpop.f32.mrb[5].mxu1 }
 0x19f   : > { %v5778_v13 = vadd.f32 %v4239_v10, %v4238_v43  ;;  %v4241_v34 = vpop.f32.mrb[6].mxu1 }
 0x1a0   : > { %v4242_v18 = vpop.f32.mrb[7].mxu1 }
 0x1a1   : > { %v5780_v0 = vadd.f32 %v4242_v18, %v4241_v34 }
 0x1aa   : > { %v4172_v12 = vpop.f32.mrb[8].mxu0 }
 0x1ab   : > { %v4173_v36 = vpop.f32.mrb[9].mxu0 }
 0x1ac   : > { %v4174_v50 = vadd.f32 %v4173_v36, %v4172_v12  ;;  %v4175_v54 = vpop.f32.mrb[10].mxu0 }
 0x1ad   : > { %v4176_v25 = vpop.f32.mrb[11].mxu0 }
 0x1ae   : > { %v4177_v15 = vadd.f32 %v4176_v25, %v4175_v54 }
 0x1b1   : > { %v4244_v51 = vpop.f32.mrb[8].mxu1 }
 0x1b2   : > { %v4245_v9 = vpop.f32.mrb[9].mxu1 }
 0x1b3   : > { %v5782_v1 = vadd.f32 %v4245_v9, %v4244_v51  ;;  %v4247_v5 = vpop.f32.mrb[10].mxu1 }
 0x1b4   : > { %v4248_v48 = vpop.f32.mrb[11].mxu1 }
 0x1b5   : > { %v5784_v45 = vadd.f32 %v4248_v48, %v4247_v5 }
 0x1b9   : > { %v4250_v31 = vpop.f32.mrb[12].mxu1 }
 0x1ba   : > { %v4251_v19 = vpop.f32.mrb[13].mxu1 }
 0x1bb   : > { %v5786_v62 = vadd.f32 %v4251_v19, %v4250_v31  ;;  %v4253_v59 = vpop.f32.mrb[14].mxu1 }
 0x1bc   : > { %v4254_v7 = vpop.f32.mrb[15].mxu1 }
 0x1bd   : > { %v4178_v39 = vpop.f32.mrb[12].mxu0  ;;  %v5788_v17 = vadd.f32 %v4254_v7, %v4253_v59 }
 0x1be   : > { %v4179_v26 = vpop.f32.mrb[13].mxu0 }
 0x1bf   : > { %v4180_v20 = vadd.f32 %v4179_v26, %v4178_v39  ;;  %v4181_v28 = vpop.f32.mrb[14].mxu0 }
 0x1c0   : > { %v4182_v38 = vpop.f32.mrb[15].mxu0 }
 0x1c1   : > { %v4183_v14 = vadd.f32 %v4182_v38, %v4181_v28  ;;  %v4280_v30 = vpop.f32.mrb[16].mxu1 }
 0x1c2   : > { %v3290_v29 = vadd.f32 %v4280_v30, %v4168_v3  ;;  %v3281_v41 = vpop.f32.mrb[17].mxu1 }
 0x1c3   : > { %v3282_v57 = vadd.f32 %v4162_v6, %v3281_v41  ;;  %v4281_v44 = vpop.f32.mrb[18].mxu1 }
 0x1c4   : > { %v3418_v42 = vmul.f32 %v5793_v58, %v3290_v29  ;;  %v3293_v33 = vadd.f32 %v4281_v44, %v4171_v46  ;;  %v3284_v4 = vpop.f32.mrb[19].mxu1 }
 0x1c5   : > { %v3416_v23 = vmul.f32 %v5793_v58, %v3282_v57  ;;  %v3285_v49 = vadd.f32 %v4165_v53, %v3284_v4 }
 0x1c6   : > { %v3455_v24 = vadd.f32 %v5798_v52, %v3418_v42  ;;  %v3419_v8 = vmul.f32 %v5793_v58, %v3293_v33 }
 0x1c7   : > { %v3453_v32 = vadd.f32 %v5798_v52, %v3416_v23  ;;  %v3417_v21 = vmul.f32 %v5793_v58, %v3285_v49 }
 0x1c8   : > { %v3487_v40 = vmax.f32 %v3455_v24, 0.0  ;;  %v3456_v61 = vadd.f32 %v5798_v52, %v3419_v8 }
 0x1c9   : > { %v3485_v6 = vmax.f32 %v3453_v32, 0.0  ;;  %v3454_v27 = vadd.f32 %v5798_v52, %v3417_v21  ;;  %v4284_v56 = vpop.f32.mrb[20].mxu1 }
 0x1ca   : > { %v4114_v53 = vpack.c.bf16 %v3487_v40, %v3487_v40  ;;  %v3488_v55 = vmax.f32 %v3456_v61, 0.0  ;;  %v3306_v35 = vadd.f32 %v4284_v56, %v4180_v20  ;;  %v3297_v22 = vpop.f32.mrb[21].mxu1 }
 0x1cb   : > { %v4112_v2 = vpack.c.bf16 %v3485_v6, %v3485_v6  ;;  %v3486_v63 = vmax.f32 %v3454_v27, 0.0  ;;  %v3298_v60 = vadd.f32 %v4174_v50, %v3297_v22  ;;  %v4285_v3 = vpop.f32.mrb[22].mxu1 }
 0x1cc   : > { %3648 = vst.msk [vmem:[%s5812_s21 + $0x8] sm:$0xf] %vm3645_vm2, %v4114_v53  ;;  %v4115_v11 = vpack.c.bf16 %v3488_v55, %v3488_v55  ;;  %v3422_v37 = vmul.f32 %v5793_v58, %v3306_v35  ;;  %v3309_v46 = vadd.f32 %v4285_v3, %v4183_v14  ;;  %v3300_v43 = vpop.f32.mrb[23].mxu1 }
 0x1cd   : > { %3646 = vst.msk [vmem:[%s5812_s21] sm:$0xf] %vm3645_vm2, %v4112_v2  ;;  %v4113_v10 = vpack.c.bf16 %v3486_v63, %v3486_v63  ;;  %v4184_v34 = vpop.f32.mrb[16].mxu0  ;;  %v3420_v18 = vmul.f32 %v5793_v58, %v3298_v60  ;;  %v3301_v12 = vadd.f32 %v4177_v15, %v3300_v43 }
 0x1ce   : > { %3649 = vst.msk [vmem:[%s5812_s21 + $0xc] sm:$0xf] %vm3645_vm2, %v4115_v11  ;;  %v4185_v36 = vpop.f32.mrb[17].mxu0  ;;  %v3459_v50 = vadd.f32 %v5798_v52, %v3422_v37  ;;  %v3423_v54 = vmul.f32 %v5793_v58, %v3309_v46 }
 0x1cf   : > { %3647 = vst.msk [vmem:[%s5812_s21 + $0x4] sm:$0xf] %vm3645_vm2, %v4113_v10  ;;  %v4186_v25 = vadd.f32 %v4185_v36, %v4184_v34  ;;  %v4187_v51 = vpop.f32.mrb[18].mxu0  ;;  %v3457_v9 = vadd.f32 %v5798_v52, %v3420_v18  ;;  %v3421_v5 = vmul.f32 %v5793_v58, %v3301_v12 }
 0x1d0   : > { %v4188_v48 = vpop.f32.mrb[19].mxu0  ;;  %v3491_v31 = vmax.f32 %v3459_v50, 0.0  ;;  %v3460_v15 = vadd.f32 %v5798_v52, %v3423_v54 }
 0x1d1   : > { %v4189_v19 = vadd.f32 %v4188_v48, %v4187_v51  ;;  %v3489_v59 = vmax.f32 %v3457_v9, 0.0  ;;  %v3458_v7 = vadd.f32 %v5798_v52, %v3421_v5  ;;  %v4288_v39 = vpop.f32.mrb[24].mxu1 }
 0x1d2   : > { %v4118_v26 = vpack.c.bf16 %v3491_v31, %v3491_v31  ;;  %v3492_v20 = vmax.f32 %v3460_v15, 0.0  ;;  %v3313_v28 = vpop.f32.mrb[25].mxu1 }
 0x1d3   : > { %v4116_v38 = vpack.c.bf16 %v3489_v59, %v3489_v59  ;;  %v3490_v14 = vmax.f32 %v3458_v7, 0.0  ;;  %v3314_v30 = vadd.f32 %v4186_v25, %v3313_v28  ;;  %v4289_v29 = vpop.f32.mrb[26].mxu1 }
 0x1d4   : > { %3652 = vst.msk [vmem:[%s5812_s21 + $0x18] sm:$0xf] %vm3645_vm2, %v4118_v26  ;;  %v4119_v41 = vpack.c.bf16 %v3492_v20, %v3492_v20  ;;  %v3316_v57 = vpop.f32.mrb[27].mxu1 }
 0x1d5   : > { %3650 = vst.msk [vmem:[%s5812_s21 + $0x10] sm:$0xf] %vm3645_vm2, %v4116_v38  ;;  %v4117_v44 = vpack.c.bf16 %v3490_v14, %v3490_v14  ;;  %v3424_v42 = vmul.f32 %v5793_v58, %v3314_v30  ;;  %v3317_v33 = vadd.f32 %v4189_v19, %v3316_v57 }
 0x1d6   : > { %3653 = vst.msk [vmem:[%s5812_s21 + $0x1c] sm:$0xf] %vm3645_vm2, %v4119_v41 }
 0x1d7   : > { %3651 = vst.msk [vmem:[%s5812_s21 + $0x14] sm:$0xf] %vm3645_vm2, %v4117_v44  ;;  %v3461_v4 = vadd.f32 %v5798_v52, %v3424_v42  ;;  %v3425_v23 = vmul.f32 %v5793_v58, %v3317_v33 }
 0x1d9   : > { %v4190_v49 = vpop.f32.mrb[20].mxu0  ;;  %v3493_v24 = vmax.f32 %v3461_v4, 0.0  ;;  %v3462_v8 = vadd.f32 %v5798_v52, %v3425_v23  ;;  %v5843_v32 = vpop.f32.mrb[28].mxu1 }
 0x1da   : > { %v4191_v21 = vpop.f32.mrb[21].mxu0  ;;  %v3329_v40 = vpop.f32.mrb[29].mxu1 }
 0x1db   : > { %v4192_v61 = vadd.f32 %v4191_v21, %v4190_v49  ;;  %v4120_v6 = vpack.c.bf16 %v3493_v24, %v3493_v24  ;;  %v4193_v27 = vpop.f32.mrb[22].mxu0  ;;  %v3494_v56 = vmax.f32 %v3462_v8, 0.0  ;;  %v5845_v53 = vpop.f32.mrb[30].mxu1 }
 0x1dc   : > { %v4194_v55 = vpop.f32.mrb[23].mxu0  ;;  %v3332_v35 = vpop.f32.mrb[31].mxu1 }
 0x1dd   : > { %v3322_v22 = vadd.f32 %v4288_v39, %v4192_v61  ;;  %3654 = vst.msk [vmem:[%s5812_s21 + $0x20] sm:$0xf] %vm3645_vm2, %v4120_v6  ;;  %v4195_v2 = vadd.f32 %v4194_v55, %v4193_v27  ;;  %v4121_v63 = vpack.c.bf16 %v3494_v56, %v3494_v56 }
 0x1df   : > { %v3426_v60 = vmul.f32 %v5793_v58, %v3322_v22  ;;  %v3325_v3 = vadd.f32 %v4289_v29, %v4195_v2  ;;  %3655 = vst.msk [vmem:[%s5812_s21 + $0x24] sm:$0xf] %vm3645_vm2, %v4121_v63 }
 0x1e1   : > { %v3463_v11 = vadd.f32 %v5798_v52, %v3426_v60  ;;  %v3427_v37 = vmul.f32 %v5793_v58, %v3325_v3  ;;  %v5854_v46 = vpop.f32.mrb[32].mxu1 }
 0x1e2   : > { %v5856_v43 = vpop.f32.mrb[33].mxu1 }
 0x1e3   : > { %v3495_v10 = vmax.f32 %v3463_v11, 0.0  ;;  %v3464_v34 = vadd.f32 %v5798_v52, %v3427_v37  ;;  %v5859_v18 = vpop.f32.mrb[34].mxu1 }
 0x1e4   : > { %v5861_v12 = vpop.f32.mrb[35].mxu1 }
 0x1e5   : > { %v4122_v36 = vpack.c.bf16 %v3495_v10, %v3495_v10  ;;  %v3496_v50 = vmax.f32 %v3464_v34, 0.0  ;;  %v4196_v54 = vpop.f32.mrb[24].mxu0 }
 0x1e6   : > { %v4197_v25 = vpop.f32.mrb[25].mxu0 }
 0x1e7   : > { %3656 = vst.msk [vmem:[%s5812_s21 + $0x28] sm:$0xf] %vm3645_vm2, %v4122_v36  ;;  %v4123_v51 = vpack.c.bf16 %v3496_v50, %v3496_v50  ;;  %v4198_v9 = vadd.f32 %v4197_v25, %v4196_v54  ;;  %v4199_v5 = vpop.f32.mrb[26].mxu0 }
 0x1e8   : > { %v4200_v48 = vpop.f32.mrb[27].mxu0 }
 0x1e9   : > { %3657 = vst.msk [vmem:[%s5812_s21 + $0x2c] sm:$0xf] %vm3645_vm2, %v4123_v51  ;;  %v4201_v31 = vadd.f32 %v4200_v48, %v4199_v5  ;;  %v3330_v15 = vadd.f32 %v4198_v9, %v3329_v40  ;;  %v5867_v19 = vpop.f32.mrb[36].mxu1 }
 0x1ea   : > { %v5869_v59 = vpop.f32.mrb[37].mxu1 }
 0x1eb   : > { %v3428_v7 = vmul.f32 %v5793_v58, %v3330_v15  ;;  %v3333_v39 = vadd.f32 %v4201_v31, %v3332_v35  ;;  %v5872_v26 = vpop.f32.mrb[38].mxu1 }
 0x1ec   : > { %v5874_v20 = vpop.f32.mrb[39].mxu1 }
 0x1ed   : > { %v3465_v28 = vadd.f32 %v5798_v52, %v3428_v7  ;;  %v3429_v38 = vmul.f32 %v5793_v58, %v3333_v39 }
 0x1ef   : > { %v3497_v14 = vmax.f32 %v3465_v28, 0.0  ;;  %v3466_v30 = vadd.f32 %v5798_v52, %v3429_v38 }
 0x1f1   : > { %v4124_v29 = vpack.c.bf16 %v3497_v14, %v3497_v14  ;;  %v3498_v41 = vmax.f32 %v3466_v30, 0.0  ;;  %v4202_v57 = vpop.f32.mrb[28].mxu0  ;;  %v4304_v44 = vpop.f32.mrb[40].mxu1 }
 0x1f2   : > { %v4203_v42 = vpop.f32.mrb[29].mxu0  ;;  %v3386_v33 = vadd.f32 %v4304_v44, %v5778_v13  ;;  %v3377_v4 = vpop.f32.mrb[41].mxu1 }
 0x1f3   : > { %3658 = vst.msk [vmem:[%s5812_s21 + $0x30] sm:$0xf] %vm3645_vm2, %v4124_v29  ;;  %v4125_v23 = vpack.c.bf16 %v3498_v41, %v3498_v41  ;;  %v4204_v49 = vadd.f32 %v4203_v42, %v4202_v57  ;;  %v4205_v24 = vpop.f32.mrb[30].mxu0  ;;  %v3378_v8 = vadd.f32 %v5774_v47, %v3377_v4  ;;  %v4305_v21 = vpop.f32.mrb[42].mxu1 }
 0x1f4   : > { %v4206_v40 = vpop.f32.mrb[31].mxu0  ;;  %v3442_v61 = vmul.f32 %v5793_v58, %v3386_v33  ;;  %v3389_v6 = vadd.f32 %v4305_v21, %v5780_v0  ;;  %v3380_v27 = vpop.f32.mrb[43].mxu1 }
 0x1f5   : > { %3659 = vst.msk [vmem:[%s5812_s21 + $0x34] sm:$0xf] %vm3645_vm2, %v4125_v23  ;;  %v3338_v56 = vadd.f32 %v5843_v32, %v4204_v49  ;;  %v4207_v13 = vadd.f32 %v4206_v40, %v4205_v24  ;;  %v3440_v55 = vmul.f32 %v5793_v58, %v3378_v8  ;;  %v3381_v35 = vadd.f32 %v5776_v16, %v3380_v27 }
 0x1f6   : > { %v3479_v22 = vadd.f32 %v5798_v52, %v3442_v61  ;;  %v3443_v47 = vmul.f32 %v5793_v58, %v3389_v6 }
 0x1f7   : > { %v3430_v2 = vmul.f32 %v5793_v58, %v3338_v56  ;;  %v3341_v63 = vadd.f32 %v5845_v53, %v4207_v13  ;;  %v3477_v0 = vadd.f32 %v5798_v52, %v3440_v55  ;;  %v3441_v60 = vmul.f32 %v5793_v58, %v3381_v35 }
 0x1f8   : > { %v3511_v3 = vmax.f32 %v3479_v22, 0.0  ;;  %v3480_v32 = vadd.f32 %v5798_v52, %v3443_v47 }
 0x1f9   : > { %v3467_v11 = vadd.f32 %v5798_v52, %v3430_v2  ;;  %v3431_v16 = vmul.f32 %v5793_v58, %v3341_v63  ;;  %v3509_v37 = vmax.f32 %v3477_v0, 0.0  ;;  %v3478_v10 = vadd.f32 %v5798_v52, %v3441_v60  ;;  %v4308_v34 = vpop.f32.mrb[44].mxu1 }
 0x1fa   : > { %v4138_v36 = vpack.c.bf16 %v3511_v3, %v3511_v3  ;;  %v3512_v50 = vmax.f32 %v3480_v32, 0.0  ;;  %v3402_v53 = vadd.f32 %v4308_v34, %v5786_v62  ;;  %v3393_v54 = vpop.f32.mrb[45].mxu1 }
 0x1fb   : > { %v3499_v25 = vmax.f32 %v3467_v11, 0.0  ;;  %v3468_v51 = vadd.f32 %v5798_v52, %v3431_v16  ;;  %v4136_v9 = vpack.c.bf16 %v3509_v37, %v3509_v37  ;;  %v3510_v5 = vmax.f32 %v3478_v10, 0.0  ;;  %v4309_v48 = vpop.f32.mrb[46].mxu1 }
 0x1fc   : > { %3672 = vst.msk [vmem:[%s5812_s21 + $0x68] sm:$0xf] %vm3645_vm2, %v4138_v36  ;;  %v4139_v31 = vpack.c.bf16 %v3512_v50, %v3512_v50  ;;  %v3446_v15 = vmul.f32 %v5793_v58, %v3402_v53  ;;  %v3394_v7 = vadd.f32 %v5782_v1, %v3393_v54  ;;  %v3405_v39 = vadd.f32 %v4309_v48, %v5788_v17  ;;  %v3396_v62 = vpop.f32.mrb[47].mxu1 }
 0x1fd   : > { %v4126_v28 = vpack.c.bf16 %v3499_v25, %v3499_v25  ;;  %v3500_v38 = vmax.f32 %v3468_v51, 0.0  ;;  %3670 = vst.msk [vmem:[%s5812_s21 + $0x60] sm:$0xf] %vm3645_vm2, %v4136_v9  ;;  %v4137_v14 = vpack.c.bf16 %v3510_v5, %v3510_v5  ;;  %v4208_v30 = vpop.f32.mrb[32].mxu0  ;;  %v3397_v29 = vadd.f32 %v5784_v45, %v3396_v62 }
 0x1fe   : > { %3673 = vst.msk [vmem:[%s5812_s21 + $0x6c] sm:$0xf] %vm3645_vm2, %v4139_v31  ;;  %v4209_v41 = vpop.f32.mrb[33].mxu0  ;;  %v3483_v57 = vadd.f32 %v5798_v52, %v3446_v15  ;;  %v3444_v1 = vmul.f32 %v5793_v58, %v3394_v7  ;;  %v3447_v44 = vmul.f32 %v5793_v58, %v3405_v39 }
 0x1ff   : > { %3660 = vst.msk [vmem:[%s5812_s21 + $0x38] sm:$0xf] %vm3645_vm2, %v4126_v28  ;;  %v4127_v17 = vpack.c.bf16 %v3500_v38, %v3500_v38  ;;  %3671 = vst.msk [vmem:[%s5812_s21 + $0x64] sm:$0xf] %vm3645_vm2, %v4137_v14  ;;  %v4210_v42 = vadd.f32 %v4209_v41, %v4208_v30  ;;  %v4211_v33 = vpop.f32.mrb[34].mxu0  ;;  %v3445_v45 = vmul.f32 %v5793_v58, %v3397_v29 }
 0x200   : > { %v4212_v4 = vpop.f32.mrb[35].mxu0  ;;  %v3515_v23 = vmax.f32 %v3483_v57, 0.0  ;;  %v3481_v49 = vadd.f32 %v5798_v52, %v3444_v1  ;;  %v3484_v24 = vadd.f32 %v5798_v52, %v3447_v44 }
 0x201   : > { %3661 = vst.msk [vmem:[%s5812_s21 + $0x3c] sm:$0xf] %vm3645_vm2, %v4127_v17  ;;  %v3346_v8 = vadd.f32 %v4210_v42, %v5856_v43  ;;  %v4213_v21 = vadd.f32 %v4212_v4, %v4211_v33  ;;  %v3482_v40 = vadd.f32 %v5798_v52, %v3445_v45 }
 0x202   : > { %v4142_v61 = vpack.c.bf16 %v3515_v23, %v3515_v23  ;;  %v3513_v6 = vmax.f32 %v3481_v49, 0.0  ;;  %v3516_v27 = vmax.f32 %v3484_v24, 0.0 }
 0x203   : > { %v3432_v56 = vmul.f32 %v5793_v58, %v3346_v8  ;;  %v3349_v13 = vadd.f32 %v4213_v21, %v5861_v12  ;;  %v3514_v55 = vmax.f32 %v3482_v40, 0.0 }
 0x204   : > { %3676 = vst.msk [vmem:[%s5812_s21 + $0x78] sm:$0xf] %vm3645_vm2, %v4142_v61  ;;  %v4140_v35 = vpack.c.bf16 %v3513_v6, %v3513_v6  ;;  %v4143_v22 = vpack.c.bf16 %v3516_v27, %v3516_v27 }
 0x205   : > { %v3469_v43 = vadd.f32 %v5798_v52, %v3432_v56  ;;  %v3433_v47 = vmul.f32 %v5793_v58, %v3349_v13  ;;  %v4141_v2 = vpack.c.bf16 %v3514_v55, %v3514_v55 }
 0x206   : > { %3674 = vst.msk [vmem:[%s5812_s21 + $0x70] sm:$0xf] %vm3645_vm2, %v4140_v35  ;;  %3677 = vst.msk [vmem:[%s5812_s21 + $0x7c] sm:$0xf] %vm3645_vm2, %v4143_v22 }
 0x207   : > { %v3501_v63 = vmax.f32 %v3469_v43, 0.0  ;;  %v3470_v0 = vadd.f32 %v5798_v52, %v3433_v47  ;;  %3675 = vst.msk [vmem:[%s5812_s21 + $0x74] sm:$0xf] %vm3645_vm2, %v4141_v2 }
 0x209   : > { %v4128_v12 = vpack.c.bf16 %v3501_v63, %v3501_v63  ;;  %v3502_v60 = vmax.f32 %v3470_v0, 0.0  ;;  %v4214_v3 = vpop.f32.mrb[36].mxu0 }
 0x20a   : > { %v4215_v32 = vpop.f32.mrb[37].mxu0 }
 0x20b   : > { %3662 = vst.msk [vmem:[%s5812_s21 + $0x40] sm:$0xf] %vm3645_vm2, %v4128_v12  ;;  %v4129_v11 = vpack.c.bf16 %v3502_v60, %v3502_v60  ;;  %v4216_v16 = vadd.f32 %v4215_v32, %v4214_v3  ;;  %v4217_v37 = vpop.f32.mrb[38].mxu0 }
 0x20c   : > { %v4218_v10 = vpop.f32.mrb[39].mxu0 }
 0x20d   : > { %3663 = vst.msk [vmem:[%s5812_s21 + $0x44] sm:$0xf] %vm3645_vm2, %v4129_v11  ;;  %v3354_v34 = vadd.f32 %v5854_v46, %v4216_v16  ;;  %v4219_v36 = vadd.f32 %v4218_v10, %v4217_v37 }
 0x20f   : > { %v3434_v50 = vmul.f32 %v5793_v58, %v3354_v34  ;;  %v3357_v53 = vadd.f32 %v5859_v18, %v4219_v36 }
 0x211   : > { %v3471_v54 = vadd.f32 %v5798_v52, %v3434_v50  ;;  %v3435_v25 = vmul.f32 %v5793_v58, %v3357_v53 }
 0x212   : > { %v4220_v51 = vpop.f32.mrb[40].mxu0 }
 0x213   : > { %v3503_v9 = vmax.f32 %v3471_v54, 0.0  ;;  %v3472_v5 = vadd.f32 %v5798_v52, %v3435_v25  ;;  %v4221_v48 = vpop.f32.mrb[41].mxu0 }
 0x214   : > { %v4222_v31 = vadd.f32 %v4221_v48, %v4220_v51  ;;  %v4223_v15 = vpop.f32.mrb[42].mxu0 }
 0x215   : > { %v4130_v7 = vpack.c.bf16 %v3503_v9, %v3503_v9  ;;  %v3504_v46 = vmax.f32 %v3472_v5, 0.0  ;;  %v4224_v39 = vpop.f32.mrb[43].mxu0 }
 0x216   : > { %v3362_v62 = vadd.f32 %v4222_v31, %v5869_v59  ;;  %v4225_v28 = vadd.f32 %v4224_v39, %v4223_v15 }
 0x217   : > { %3664 = vst.msk [vmem:[%s5812_s21 + $0x48] sm:$0xf] %vm3645_vm2, %v4130_v7  ;;  %v4131_v18 = vpack.c.bf16 %v3504_v46, %v3504_v46 }
 0x218   : > { %v3436_v38 = vmul.f32 %v5793_v58, %v3362_v62  ;;  %v3365_v14 = vadd.f32 %v4225_v28, %v5874_v20 }
 0x219   : > { %3665 = vst.msk [vmem:[%s5812_s21 + $0x4c] sm:$0xf] %vm3645_vm2, %v4131_v18 }
 0x21a   : > { %v3473_v30 = vadd.f32 %v5798_v52, %v3436_v38  ;;  %v3437_v29 = vmul.f32 %v5793_v58, %v3365_v14  ;;  %v4226_v41 = vpop.f32.mrb[44].mxu0 }
 0x21b   : > { %v4227_v57 = vpop.f32.mrb[45].mxu0 }
 0x21c   : > { %v3505_v1 = vmax.f32 %v3473_v30, 0.0  ;;  %v3474_v59 = vadd.f32 %v5798_v52, %v3437_v29  ;;  %v4228_v44 = vadd.f32 %v4227_v57, %v4226_v41  ;;  %v4229_v17 = vpop.f32.mrb[46].mxu0 }
 0x21d   : > { %v4230_v42 = vpop.f32.mrb[47].mxu0 }
 0x21e   : > { %v4132_v33 = vpack.c.bf16 %v3505_v1, %v3505_v1  ;;  %v3506_v45 = vmax.f32 %v3474_v59, 0.0  ;;  %v3370_v20 = vadd.f32 %v5867_v19, %v4228_v44  ;;  %v4231_v4 = vadd.f32 %v4230_v42, %v4229_v17 }
 0x220   : > { %3666 = vst.msk [vmem:[%s5812_s21 + $0x50] sm:$0xf] %vm3645_vm2, %v4132_v33  ;;  %v4133_v23 = vpack.c.bf16 %v3506_v45, %v3506_v45  ;;  %v3438_v49 = vmul.f32 %v5793_v58, %v3370_v20  ;;  %v3373_v24 = vadd.f32 %v5872_v26, %v4231_v4 }
 0x222   : > { %3667 = vst.msk [vmem:[%s5812_s21 + $0x54] sm:$0xf] %vm3645_vm2, %v4133_v23  ;;  %v3475_v8 = vadd.f32 %v5798_v52, %v3438_v49  ;;  %v3439_v21 = vmul.f32 %v5793_v58, %v3373_v24 }
 0x224   : > { %v3507_v40 = vmax.f32 %v3475_v8, 0.0  ;;  %v3476_v61 = vadd.f32 %v5798_v52, %v3439_v21 }
 0x226   : > { %v4134_v6 = vpack.c.bf16 %v3507_v40, %v3507_v40  ;;  %v3508_v27 = vmax.f32 %v3476_v61, 0.0 }
 0x228   : > { %3668 = vst.msk [vmem:[%s5812_s21 + $0x58] sm:$0xf] %vm3645_vm2, %v4134_v6  ;;  %v4135_v19 = vpack.c.bf16 %v3508_v27, %v3508_v27 }
 0x22a   : > { %3669 = vst.msk [vmem:[%s5812_s21 + $0x5c] sm:$0xf] %vm3645_vm2, %v4135_v19 }
 0x22b PF: > { %s13_s14 = sadd.s32 1, %s4532_s14   ;;  %s6012_s12 = smov %s4528_s13 }
 0x22c   : > { %p10_p5 = scmp.ge.s32.totalorder %s13_s14, 4   ;;  %s6013_s13 = smov %s6015_s15 }
 0x22e   :  { %12 = sbr.rel (!%p10_p5) target bundleno = 2 (0x2), region = 79 }

</bundles_post_ra>
